<compile_context>
chip_gen: v7x
topology: tpu7x:2x2x1
jax: 0.10.0
libtpu: 0.0.40
codegen_flags: <defaults>
</compile_context>

<pallas_src>
import jax
import jax.numpy as jnp
from jax.experimental import pallas as pl
from jax.experimental.pallas import tpu as pltpu

INPUT_SIZE = 4096      # module default (e.g. a 1x64x64 image flattened)
H1 = 512
H2 = 256
NUM_CLASSES = 1
OUT_PAD = 128          # pad the 1-wide output to a full lane register


def _leaky_relu(x, slope=0.2):
    return jnp.where(x > 0, x, slope * x)


def _pick_tb(batch):
    """Batch tile: amortize the ~0.35us/grid-step overhead with big tiles, but
    keep >=2 (ideally >=4) grid steps so v7x's two TensorCores both get work.
    Small batches get one full-batch tile (block dims == array dims)."""
    if batch >= 2048:
        return 512
    if batch >= 512:
        return 256
    if batch >= 256:
        return 128
    return batch


def discriminator_kernel(x_ref, w1_ref, b1_ref, w2_ref, b2_ref, w3_ref, b3_ref,
                         o_ref):
    # Full MLP hot path for one batch tile: bf16 MXU matmuls, f32 accumulation,
    # f32 bias/activation, sigmoid via EUP exp + approx reciprocal.
    # x arrives f32 straight from HBM; the bf16 cast runs on the VPU here
    # (free under MXU/DMA) instead of as a separate XLA pass in the wrapper.
    x = x_ref[...].astype(jnp.bfloat16)                               # (TB, D)
    h = jnp.dot(x, w1_ref[...], preferred_element_type=jnp.float32)   # (TB, 512)
    h = _leaky_relu(h + b1_ref[...])
    h = jnp.dot(h.astype(w2_ref.dtype), w2_ref[...],
                preferred_element_type=jnp.float32)                   # (TB, 256)
    h = _leaky_relu(h + b2_ref[...])
    h = jnp.dot(h.astype(w3_ref.dtype), w3_ref[...],
                preferred_element_type=jnp.float32)                   # (TB, 128)
    h = h + b3_ref[...]
    # sigmoid(h) = 1 / (1 + exp(-h)) : exp on the EUP, approx reciprocal.
    o_ref[...] = pl.reciprocal(1.0 + jnp.exp(-h), approx=True).astype(o_ref.dtype)


def prepare_params(params):
    """One-time (outside the jit'd hot path) packing of parameters:
    bf16 weights, f32 biases reshaped to (1, H), W3/b3 padded to 128 lanes."""
    w1, b1, w2, b2, w3, b3 = params
    w1p = w1.astype(jnp.bfloat16)                                    # (4096, 512)
    w2p = w2.astype(jnp.bfloat16)                                    # (512, 256)
    w3p = (jnp.zeros((H2, OUT_PAD), jnp.bfloat16)
           .at[:, :NUM_CLASSES].set(w3.astype(jnp.bfloat16)))        # (256, 128)
    b1p = b1.reshape(1, H1).astype(jnp.float32)
    b2p = b2.reshape(1, H2).astype(jnp.float32)
    b3p = (jnp.zeros((1, OUT_PAD), jnp.float32)
           .at[:, :NUM_CLASSES].set(b3.astype(jnp.float32)))
    return (w1p, b1p, w2p, b2p, w3p, b3p)


@jax.jit
def discriminator_forward(x, prepared_params):
    """x: (B, C, H, W) or (B, INPUT_SIZE). Returns (B, NUM_CLASSES) f32."""
    w1, b1, w2, b2, w3p, b3p = prepared_params
    B = x.shape[0]
    xf = x.reshape(B, -1)          # == torch view(B, -1); stays f32, no pad/cast pass
    D = xf.shape[1]

    TB = _pick_tb(B)
    grid = (pl.cdiv(B, TB),)       # partial last tile is masked by Pallas

    out = pl.pallas_call(
        discriminator_kernel,
        out_shape=jax.ShapeDtypeStruct((B, OUT_PAD), jnp.bfloat16),
        grid_spec=pltpu.PrefetchScalarGridSpec(
            num_scalar_prefetch=0,
            grid=grid,
            in_specs=[
                pl.BlockSpec((TB, D), lambda i: (i, 0)),        # x tile (f32)
                pl.BlockSpec((D, H1), lambda i: (0, 0)),        # W1 (bf16, resident)
                pl.BlockSpec((1, H1), lambda i: (0, 0)),        # b1 (f32)
                pl.BlockSpec((H1, H2), lambda i: (0, 0)),       # W2 (bf16, resident)
                pl.BlockSpec((1, H2), lambda i: (0, 0)),        # b2 (f32)
                pl.BlockSpec((H2, OUT_PAD), lambda i: (0, 0)),  # W3 padded (bf16)
                pl.BlockSpec((1, OUT_PAD), lambda i: (0, 0)),   # b3 padded (f32)
            ],
            out_specs=pl.BlockSpec((TB, OUT_PAD), lambda i: (i, 0)),
        ),
        compiler_params=pltpu.CompilerParams(
            dimension_semantics=("parallel",),
            vmem_limit_bytes=40 * 1024 * 1024),
    )(xf, w1, b1, w2, b2, w3p, b3p)

    # Columns 1..127 and any masked partial-tile rows are garbage; slice them off.
    return out[:, :NUM_CLASSES].astype(jnp.float32)


def init_params(key, input_size=INPUT_SIZE):
    """Deterministic init mimicking PyTorch nn.Linear default
    (U[-1/sqrt(fan_in), 1/sqrt(fan_in)]). Weights stored as (in, out)."""
    ks = jax.random.split(key, 6)

    def lin(kw, kb, fan_in, fan_out):
        bound = 1.0 / jnp.sqrt(fan_in)
        w = jax.random.uniform(kw, (fan_in, fan_out), jnp.float32, -bound, bound)
        b = jax.random.uniform(kb, (fan_out,), jnp.float32, -bound, bound)
        return w, b

    w1, b1 = lin(ks[0], ks[1], input_size, H1)
    w2, b2 = lin(ks[2], ks[3], H1, H2)
    w3, b3 = lin(ks[4], ks[5], H2, NUM_CLASSES)
    return (w1, b1, w2, b2, w3, b3)


def _reference_forward(x, params):
    """Pure-JAX f32 reference of the PyTorch forward."""
    w1, b1, w2, b2, w3, b3 = params
    y = x.reshape(x.shape[0], -1).astype(jnp.float32)
    h = y @ w1 + b1
    h = jnp.where(h > 0, h, 0.2 * h)
    h = h @ w2 + b2
    h = jnp.where(h > 0, h, 0.2 * h)
    h = h @ w3 + b3
    return jax.nn.sigmoid(h)


if __name__ == "__main__":
    key = jax.random.PRNGKey(0)
    k_x, k_p = jax.random.split(key)

    # Small deterministic input: batch=2, a 1x64x64 "image" -> 4096 features.
    x = jax.random.normal(k_x, (2, 1, 64, 64), dtype=jnp.float32)
    params = init_params(k_p)
    prepared = prepare_params(params)

    out = discriminator_forward(x, prepared)
    out = jax.block_until_ready(out)

    ref = _reference_forward(x, params)
    assert out.shape == (2, NUM_CLASSES), out.shape
    # bf16 matmul operands / bf16 writeback with f32 accumulation vs. the
    # f32 reference: loose tolerance.
    assert jnp.allclose(out, ref, atol=2e-2, rtol=2e-2), (out, ref)

    print("KERNEL_OK")
</pallas_src>

<mosaic_0001>
module attributes {stable_mosaic.version = 11 : i64} {
  func.func @discriminator_kernel(%arg0: i32, %arg1: memref<2x4096xf32, #tpu.memory_space<vmem>>, %arg2: memref<4096x512xbf16, #tpu.memory_space<vmem>>, %arg3: memref<1x512xf32, #tpu.memory_space<vmem>>, %arg4: memref<512x256xbf16, #tpu.memory_space<vmem>>, %arg5: memref<1x256xf32, #tpu.memory_space<vmem>>, %arg6: memref<256x128xbf16, #tpu.memory_space<vmem>>, %arg7: memref<1x128xf32, #tpu.memory_space<vmem>>, %arg8: memref<2x128xbf16, #tpu.memory_space<vmem>>) attributes {dimension_semantics = [#tpu.dimension_semantics<parallel>], iteration_bounds = array<i64: 1>, scalar_prefetch = 0 : i64, scratch_operands = 0 : i64, tpu.core_type = #tpu.core_type<tc>, window_params = [{transform_indices = @transform_0, window_bounds = array<i64: 2, 4096>}, {pipeline_mode = #tpu.pipeline_mode<synchronous>, transform_indices = @transform_1, window_bounds = array<i64: 4096, 512>}, {pipeline_mode = #tpu.pipeline_mode<synchronous>, transform_indices = @transform_2, window_bounds = array<i64: 1, 512>}, {pipeline_mode = #tpu.pipeline_mode<synchronous>, transform_indices = @transform_3, window_bounds = array<i64: 512, 256>}, {pipeline_mode = #tpu.pipeline_mode<synchronous>, transform_indices = @transform_4, window_bounds = array<i64: 1, 256>}, {pipeline_mode = #tpu.pipeline_mode<synchronous>, transform_indices = @transform_5, window_bounds = array<i64: 256, 128>}, {pipeline_mode = #tpu.pipeline_mode<synchronous>, transform_indices = @transform_6, window_bounds = array<i64: 1, 128>}, {transform_indices = @transform_7, window_bounds = array<i64: 2, 128>}]} {
    %c0 = arith.constant 0 : index
    %c0_0 = arith.constant 0 : index
    %0 = vector.load %arg1[%c0, %c0_0] : memref<2x4096xf32, #tpu.memory_space<vmem>>, vector<2x4096xf32>
    %1 = arith.truncf %0 : vector<2x4096xf32> to vector<2x4096xbf16>
    %c0_1 = arith.constant 0 : index
    %c0_2 = arith.constant 0 : index
    %2 = vector.load %arg2[%c0_1, %c0_2] : memref<4096x512xbf16, #tpu.memory_space<vmem>>, vector<4096x512xbf16>
    %cst = arith.constant dense<0.000000e+00> : vector<2x512xf32>
    %3 = tpu.matmul %1, %2, %cst {dimension_numbers = #tpu.dot_dimension_numbers<[1], [0], [0], [1], [0, 0, 1, 1], [], []>} : vector<2x4096xbf16>, vector<4096x512xbf16>, vector<2x512xf32> -> vector<2x512xf32>
    %c0_3 = arith.constant 0 : index
    %c0_4 = arith.constant 0 : index
    %4 = vector.load %arg3[%c0_3, %c0_4] : memref<1x512xf32, #tpu.memory_space<vmem>>, vector<1x512xf32>
    %5 = vector.broadcast %4 : vector<1x512xf32> to vector<2x512xf32>
    %6 = arith.addf %3, %5 : vector<2x512xf32>
    %cst_5 = arith.constant 0.000000e+00 : f32
    %7 = vector.broadcast %cst_5 : f32 to vector<2x512xf32>
    %8 = arith.cmpf ogt, %6, %7 : vector<2x512xf32>
    %cst_6 = arith.constant 2.000000e-01 : f32
    %9 = vector.broadcast %cst_6 : f32 to vector<2x512xf32>
    %10 = arith.mulf %9, %6 : vector<2x512xf32>
    %11 = arith.select %8, %6, %10 : vector<2x512xi1>, vector<2x512xf32>
    %12 = arith.truncf %11 : vector<2x512xf32> to vector<2x512xbf16>
    %c0_7 = arith.constant 0 : index
    %c0_8 = arith.constant 0 : index
    %13 = vector.load %arg4[%c0_7, %c0_8] : memref<512x256xbf16, #tpu.memory_space<vmem>>, vector<512x256xbf16>
    %cst_9 = arith.constant dense<0.000000e+00> : vector<2x256xf32>
    %14 = tpu.matmul %12, %13, %cst_9 {dimension_numbers = #tpu.dot_dimension_numbers<[1], [0], [0], [1], [0, 0, 1, 1], [], []>} : vector<2x512xbf16>, vector<512x256xbf16>, vector<2x256xf32> -> vector<2x256xf32>
    %c0_10 = arith.constant 0 : index
    %c0_11 = arith.constant 0 : index
    %15 = vector.load %arg5[%c0_10, %c0_11] : memref<1x256xf32, #tpu.memory_space<vmem>>, vector<1x256xf32>
    %16 = vector.broadcast %15 : vector<1x256xf32> to vector<2x256xf32>
    %17 = arith.addf %14, %16 : vector<2x256xf32>
    %cst_12 = arith.constant 0.000000e+00 : f32
    %18 = vector.broadcast %cst_12 : f32 to vector<2x256xf32>
    %19 = arith.cmpf ogt, %17, %18 : vector<2x256xf32>
    %cst_13 = arith.constant 2.000000e-01 : f32
    %20 = vector.broadcast %cst_13 : f32 to vector<2x256xf32>
    %21 = arith.mulf %20, %17 : vector<2x256xf32>
    %22 = arith.select %19, %17, %21 : vector<2x256xi1>, vector<2x256xf32>
    %23 = arith.truncf %22 : vector<2x256xf32> to vector<2x256xbf16>
    %c0_14 = arith.constant 0 : index
    %c0_15 = arith.constant 0 : index
    %24 = vector.load %arg6[%c0_14, %c0_15] : memref<256x128xbf16, #tpu.memory_space<vmem>>, vector<256x128xbf16>
    %cst_16 = arith.constant dense<0.000000e+00> : vector<2x128xf32>
    %25 = tpu.matmul %23, %24, %cst_16 {dimension_numbers = #tpu.dot_dimension_numbers<[1], [0], [0], [1], [0, 0, 1, 1], [], []>} : vector<2x256xbf16>, vector<256x128xbf16>, vector<2x128xf32> -> vector<2x128xf32>
    %c0_17 = arith.constant 0 : index
    %c0_18 = arith.constant 0 : index
    %26 = vector.load %arg7[%c0_17, %c0_18] : memref<1x128xf32, #tpu.memory_space<vmem>>, vector<1x128xf32>
    %27 = vector.broadcast %26 : vector<1x128xf32> to vector<2x128xf32>
    %28 = arith.addf %25, %27 : vector<2x128xf32>
    %cst_19 = arith.constant 0.000000e+00 : f32
    %29 = vector.broadcast %cst_19 : f32 to vector<2x128xf32>
    %30 = arith.subf %29, %28 : vector<2x128xf32>
    %31 = math.exp %30 : vector<2x128xf32>
    %cst_20 = arith.constant 1.000000e+00 : f32
    %32 = vector.broadcast %cst_20 : f32 to vector<2x128xf32>
    %33 = arith.addf %32, %31 : vector<2x128xf32>
    %34 = tpu.reciprocal %33 {approx = true} : vector<2x128xf32> -> vector<2x128xf32>
    %35 = arith.truncf %34 : vector<2x128xf32> to vector<2x128xbf16>
    %c0_21 = arith.constant 0 : index
    %c0_22 = arith.constant 0 : index
    %36 = vector.load %arg8[%c0_21, %c0_22] : memref<2x128xbf16, #tpu.memory_space<vmem>>, vector<2x128xbf16>
    tpu.vector_store %arg8[%c0_21, %c0_22], %35 {strides = array<i32>} : memref<2x128xbf16, #tpu.memory_space<vmem>>, vector<2x128xbf16>,
    return
  }
  func.func @transform_0(%arg0: i32) -> (i32, i32) {
    %c0_i32 = arith.constant 0 : i32
    %c0_i32_0 = arith.constant 0 : i32
    return %arg0, %c0_i32 : i32, i32
  }
  func.func @transform_1(%arg0: i32) -> (i32, i32) {
    %c0_i32 = arith.constant 0 : i32
    %c0_i32_0 = arith.constant 0 : i32
    %c0_i32_1 = arith.constant 0 : i32
    return %c0_i32, %c0_i32_0 : i32, i32
  }
  func.func @transform_2(%arg0: i32) -> (i32, i32) {
    %c0_i32 = arith.constant 0 : i32
    %c0_i32_0 = arith.constant 0 : i32
    %c0_i32_1 = arith.constant 0 : i32
    return %c0_i32, %c0_i32_0 : i32, i32
  }
  func.func @transform_3(%arg0: i32) -> (i32, i32) {
    %c0_i32 = arith.constant 0 : i32
    %c0_i32_0 = arith.constant 0 : i32
    %c0_i32_1 = arith.constant 0 : i32
    return %c0_i32, %c0_i32_0 : i32, i32
  }
  func.func @transform_4(%arg0: i32) -> (i32, i32) {
    %c0_i32 = arith.constant 0 : i32
    %c0_i32_0 = arith.constant 0 : i32
    %c0_i32_1 = arith.constant 0 : i32
    return %c0_i32, %c0_i32_0 : i32, i32
  }
  func.func @transform_5(%arg0: i32) -> (i32, i32) {
    %c0_i32 = arith.constant 0 : i32
    %c0_i32_0 = arith.constant 0 : i32
    %c0_i32_1 = arith.constant 0 : i32
    return %c0_i32, %c0_i32_0 : i32, i32
  }
  func.func @transform_6(%arg0: i32) -> (i32, i32) {
    %c0_i32 = arith.constant 0 : i32
    %c0_i32_0 = arith.constant 0 : i32
    %c0_i32_1 = arith.constant 0 : i32
    return %c0_i32, %c0_i32_0 : i32, i32
  }
  func.func @transform_7(%arg0: i32) -> (i32, i32) {
    %c0_i32 = arith.constant 0 : i32
    %c0_i32_0 = arith.constant 0 : i32
    return %arg0, %c0_i32 : i32, i32
  }
}

</mosaic_0001>

<bundles_post_ra>
// kernel: discriminator_forward.1
= control target key start
LH: loop header
LB: loop body
LE: loop exit
PB: predicated region body
PF: predicated region fallthrough
CT: control target
= control target key end

     0   :  { %12 = vsyncpa [#allocation3], 0  ;;  %s11997_s0 = inlined_call_operand.vmem [shape: f32[2,4096], index: 0, kind: input, shape index: {}]   ;;  %s11998_s1 = inlined_call_operand.hbm [shape: bf16[4096,512], index: 1, kind: input, shape index: {}]   ;;  %s11999_s2 = inlined_call_operand.hbm [shape: f32[1,512], index: 2, kind: input, shape index: {}]   ;;  %s12000_s3 = inlined_call_operand.hbm [shape: bf16[512,256], index: 3, kind: input, shape index: {}]   ;;  %s12001_s4 = inlined_call_operand.hbm [shape: f32[1,256], index: 4, kind: input, shape index: {}]   ;;  %s12002_s5 = inlined_call_operand.hbm [shape: bf16[256,128], index: 5, kind: input, shape index: {}]   ;;  %s12003_s6 = inlined_call_operand.hbm [shape: f32[1,128], index: 6, kind: input, shape index: {}]   ;;  %s12004_s7 = inlined_call_operand.vmem [shape: bf16[2,128], index: 7, kind: output, shape index: {}]  }
   0x1   :  { %13 = vsyncpa [#allocation5], 0 }
   0x2   :  { %14 = vsyncpa [#allocation8], 0 }
   0x3   :  { %15 = vsyncpa [#allocation11], 0  ;;  %s11557_s24 = smov [#allocation4]   ;;  %s11558_s26 = smov [#allocation7]  }
   0x4   :  { %s36_s25 = sshll.u32 %s11557_s24, 4  ;;  %s58_s27 = sshll.u32 %s11558_s26, 4  ;;  %s37_s25 = int_to_ptr.vmem [resolvable:$true] %s36_s25  ;;  %s59_s27 = int_to_ptr.vmem [resolvable:$true] %s58_s27 }
   0x5   :  { %s11417_s30 = scalar_lea.hbm %s11999_s2, 64 }
   0x6   :  { %p11418_p0 = scmp.ne.s32.totalorder %s11999_s2, %s11417_s30  ;;  %p11421_p1 = scmp.lt.u32.totalorder %s11417_s30, %s11999_s2 }
   0x8   :  { %p11423_p2 = pnand %p11421_p1, %p11418_p0 }
   0xa   :  { %11426 = shalt.err (!%p11423_p2)
}
   0xb   :  { %s11427_s12 = scalar_lea.vmem %s37_s25, 64  ;;  %p11432_p4 = scmp.lt.s32.totalorder %s37_s25, %s37_s25 }
   0xc   :  { %p11428_p3 = scmp.ne.s32.totalorder %s37_s25, %s11427_s12  ;;  %p11433_p5 = scmp.lt.s32.totalorder %s11427_s12, %s11427_s12 }
   0xe   :  { %p11434_p6 = por %p11433_p5, %p11432_p4 }
  0x10   :  { %p11435_p7 = pnand %p11434_p6, %p11428_p3 }
  0x12   :  { %11438 = shalt.err (!%p11435_p7)
}
  0x13   :  { %39 = dma.hbm_to_vmem [thread:$0]  %s11999_s2, 64, %s37_s25, [#allocation5]  }
  0x14   :  { %s11439_s17 = scalar_lea.hbm %s12001_s4, 32 }
  0x15   :  { %p11440_p8 = scmp.ne.s32.totalorder %s12001_s4, %s11439_s17  ;;  %p11443_p9 = scmp.lt.u32.totalorder %s11439_s17, %s12001_s4 }
  0x17   :  { %p11445_p10 = pnand %p11443_p9, %p11440_p8 }
  0x19   :  { %11448 = shalt.err (!%p11445_p10)
}
  0x1a   :  { %s11449_s22 = scalar_lea.vmem %s59_s27, 32  ;;  %p11454_p12 = scmp.lt.s32.totalorder %s59_s27, %s59_s27 }
  0x1b   :  { %p11450_p11 = scmp.ne.s32.totalorder %s59_s27, %s11449_s22  ;;  %p11455_p13 = scmp.lt.s32.totalorder %s11449_s22, %s11449_s22 }
  0x1d   :  { %p11456_p0 = por %p11455_p13, %p11454_p12 }
  0x1f   :  { %p11457_p1 = pnand %p11456_p0, %p11450_p11 }
  0x21   :  { %11460 = shalt.err (!%p11457_p1)
}
  0x22   :  { %61 = dma.hbm_to_vmem [thread:$0]  %s12001_s4, 32, %s59_s27, [#allocation8]  }
  0x23   :  { %s11559_s24 = smov [#allocation2]   ;;  %s11461_s29 = scalar_lea.hbm %s11998_s1, 131072 }
  0x24   :  { %s23_s25 = sshll.u32 %s11559_s24, 4  ;;  %p11462_p2 = scmp.ne.s32.totalorder %s11998_s1, %s11461_s29  ;;  %s24_s25 = int_to_ptr.vmem [resolvable:$true] %s23_s25 }
  0x25   :  { %p11465_p3 = scmp.lt.u32.totalorder %s11461_s29, %s11998_s1 }
  0x27   :  { %p11467_p4 = pnand %p11465_p3, %p11462_p2 }
  0x29   :  { %11470 = shalt.err (!%p11467_p4)
}
  0x2a   :  { %s11471_s11 = scalar_lea.vmem %s24_s25, 131072  ;;  %p11476_p6 = scmp.lt.s32.totalorder %s24_s25, %s24_s25 }
  0x2b   :  { %p11472_p5 = scmp.ne.s32.totalorder %s24_s25, %s11471_s11  ;;  %p11477_p7 = scmp.lt.s32.totalorder %s11471_s11, %s11471_s11 }
  0x2d   :  { %p11478_p8 = por %p11477_p7, %p11476_p6 }
  0x2f   :  { %p11479_p9 = pnand %p11478_p8, %p11472_p5 }
  0x31   :  { %11482 = shalt.err (!%p11479_p9)
}
  0x32   :  { %s11560_s4 = smov 256   ;;  %s11561_s27 = smov 16  }
  0x33   :  { %29 = dma.hbm_to_vmem [thread:$0]  %s11998_s1, 131072, %s24_s25, [#allocation3], %s11560_s4, %s11560_s4, %s11561_s27  }
  0x34   :  { %s11562_s14 = smov [#allocation6]   ;;  %s11483_s18 = scalar_lea.hbm %s12000_s3, 8192 }
  0x35   :  { %s45_s15 = sshll.u32 %s11562_s14, 4  ;;  %p11484_p10 = scmp.ne.s32.totalorder %s12000_s3, %s11483_s18  ;;  %s46_s15 = int_to_ptr.vmem [resolvable:$true] %s45_s15 }
  0x36   :  { %p11487_p11 = scmp.lt.u32.totalorder %s11483_s18, %s12000_s3 }
  0x38   :  { %p11489_p12 = pnand %p11487_p11, %p11484_p10 }
  0x3a   :  { %11492 = shalt.err (!%p11489_p12)
}
  0x3b   :  { %s11493_s2 = scalar_lea.vmem %s46_s15, 8192  ;;  %p11498_p0 = scmp.lt.s32.totalorder %s46_s15, %s46_s15 }
  0x3c   :  { %p11494_p13 = scmp.ne.s32.totalorder %s46_s15, %s11493_s2  ;;  %p11499_p1 = scmp.lt.s32.totalorder %s11493_s2, %s11493_s2 }
  0x3e   :  { %p11500_p2 = por %p11499_p1, %p11498_p0 }
  0x40   :  { %p11501_p3 = pnand %p11500_p2, %p11494_p13 }
  0x42   :  { %11504 = shalt.err (!%p11501_p3)
}
  0x43   :  { %s11563_s1 = smov 128   ;;  %s11564_s23 = smov 8  }
  0x44   :  { %51 = dma.hbm_to_vmem [thread:$0]  %s12000_s3, 8192, %s46_s15, [#allocation5], %s11563_s1, %s11563_s1, %s11564_s23  }
  0x45   :  { %s11565_s26 = smov [#allocation9]   ;;  %s11505_s8 = scalar_lea.hbm %s12002_s5, 2048 }
  0x46   :  { %s67_s28 = sshll.u32 %s11565_s26, 4  ;;  %p11506_p4 = scmp.ne.s32.totalorder %s12002_s5, %s11505_s8  ;;  %s68_s28 = int_to_ptr.vmem [resolvable:$true] %s67_s28 }
  0x47   :  { %p11509_p5 = scmp.lt.u32.totalorder %s11505_s8, %s12002_s5 }
  0x49   :  { %p11511_p6 = pnand %p11509_p5, %p11506_p4 }
  0x4b   :  { %11514 = shalt.err (!%p11511_p6)
}
  0x4c   :  { %s11515_s27 = scalar_lea.vmem %s68_s28, 2048  ;;  %p11520_p8 = scmp.lt.s32.totalorder %s68_s28, %s68_s28 }
  0x4d   :  { %p11516_p7 = scmp.ne.s32.totalorder %s68_s28, %s11515_s27  ;;  %p11521_p9 = scmp.lt.s32.totalorder %s11515_s27, %s11515_s27 }
  0x4f   :  { %p11522_p10 = por %p11521_p9, %p11520_p8 }
  0x51   :  { %p11523_p11 = pnand %p11522_p10, %p11516_p7 }
  0x53   :  { %11526 = shalt.err (!%p11523_p11)
}
  0x54   :  { %s11566_s3 = smov 64   ;;  %s11567_s12 = smov 4  }
  0x55   :  { %73 = dma.hbm_to_vmem [thread:$0]  %s12002_s5, 2048, %s68_s28, [#allocation8], %s11566_s3, %s11566_s3, %s11567_s12  }
  0x56   :  { %s11568_s15 = smov [#allocation10]   ;;  %s11527_s19 = scalar_lea.hbm %s12003_s6, 16 }
  0x57   :  { %s80_s16 = sshll.u32 %s11568_s15, 4  ;;  %p11528_p12 = scmp.ne.s32.totalorder %s12003_s6, %s11527_s19  ;;  %s81_s16 = int_to_ptr.vmem [resolvable:$true] %s80_s16 }
  0x58   :  { %p11531_p13 = scmp.lt.u32.totalorder %s11527_s19, %s12003_s6 }
  0x5a   :  { %p11533_p0 = pnand %p11531_p13, %p11528_p12 }
  0x5c   :  { %11536 = shalt.err (!%p11533_p0)
}
  0x5d   :  { %s11537_s1 = scalar_lea.vmem %s81_s16, 16  ;;  %s11541_s5 = scalar_lea.vmem %s81_s16, 32 }
  0x5e   :  { %p11538_p1 = scmp.ne.s32.totalorder %s81_s16, %s11537_s1  ;;  %p11542_p2 = scmp.lt.s32.totalorder %s81_s16, %s81_s16 }
  0x5f   :  { %p11543_p3 = scmp.lt.s32.totalorder %s11541_s5, %s11537_s1 }
  0x61   :  { %p11544_p4 = por %p11543_p3, %p11542_p2 }
  0x63   :  { %p11545_p5 = pnand %p11544_p4, %p11538_p1 }
  0x65   :  { %11548 = shalt.err (!%p11545_p5)
}
  0x66   :  { %83 = dma.hbm_to_vmem [thread:$0]  %s12003_s6, 16, %s81_s16, [#allocation11]  }
  0x67   :  { %11549 = dma.done.wait [#allocation3], 131072  }
  0x68   :  { %11550 = vsyncadd [#allocation3], 4294836224 }
  0x69   :  { %11551 = dma.done.wait [#allocation5], 8256  }
  0x6a   :  { %11552 = vsyncadd [#allocation5], 4294959040 }
  0x6b   :  { %11553 = dma.done.wait [#allocation8], 2080  }
  0x6c   :  { %11554 = vsyncadd [#allocation8], 4294965216 }
  0x6d   :  { %11555 = dma.done.wait [#allocation11], 16  }
  0x6e   :  { %11556 = vsyncadd [#allocation11], 4294967280  ;;  %v9757_v0 = vld [vmem:[#allocation2 + $0x4] ss:$16 sps:$4 sm:$0xff]   ;;  %v9761_v2 = vld [vmem:[#allocation2] ss:$16 sps:$4 sm:$0xff]   ;;  %v123_v38 = vlaneseq }
  0x6f   :  { %v9759_v1 = vld [vmem:[#allocation2 + $0x204] ss:$16 sps:$4 sm:$0xff]   ;;  %6485 = vmatprep.subr.bf16.mxu1 %v9757_v0  ;;  %v9762_v3 = vld [vmem:[#allocation2 + $0x200] ss:$16 sps:$4 sm:$0xff]   ;;  %v11569_v36 = vmov 1983009808  }
  0x70   :  { %6526 = vmatprep.subr.bf16.mxu0 %v9759_v1  ;;  %v9763_v4 = vld [vmem:[#allocation2 + $0x24] ss:$16 sps:$4 sm:$0xff]   ;;  %6486 = vmatpush1.bf16.msra.mxu1 %v9761_v2  ;;  %v9767_v6 = vld [vmem:[#allocation2 + $0x20] ss:$16 sps:$4 sm:$0xff]   ;;  %v121_v37 = vunpack.c.l.s4 %v11569_v36  ;;  %v11682_v43 = vshrl.u32 %v123_v38, 7 }
  0x71   :  { %6527 = vmatpush1.bf16.msra.mxu0 %v9762_v3  ;;  %v9765_v5 = vld [vmem:[#allocation2 + $0x224] ss:$16 sps:$4 sm:$0xff]   ;;  %6487 = vmatprep.subr.bf16.mxu1 %v9763_v4  ;;  %v9768_v7 = vld [vmem:[#allocation2 + $0x220] ss:$16 sps:$4 sm:$0xff]  }
  0x72   :  { %6528 = vmatprep.subr.bf16.mxu0 %v9765_v5  ;;  %v9769_v8 = vld [vmem:[#allocation2 + $0x44] ss:$16 sps:$4 sm:$0xff]   ;;  %v9773_v10 = vld [vmem:[#allocation2 + $0x40] ss:$16 sps:$4 sm:$0xff]   ;;  %v122_v42 = vunpack.c.0.s8 %v121_v37  ;;  %v9889_v37 = vld [vmem:[#allocation2 + $0xac] ss:$16 sps:$4 sm:$0xff]  }
  0x73   :  { %v9771_v9 = vld [vmem:[#allocation2 + $0x244] ss:$16 sps:$4 sm:$0xff]   ;;  %v9774_v11 = vld [vmem:[#allocation2 + $0x240] ss:$16 sps:$4 sm:$0xff]  }
  0x74   :  { %6488 = vmatpush1.bf16.msra.mxu1 %v9767_v6  ;;  %v9775_v12 = vld [vmem:[#allocation2 + $0x64] ss:$16 sps:$4 sm:$0xff]   ;;  %v9779_v14 = vld [vmem:[#allocation2 + $0x60] ss:$16 sps:$4 sm:$0xff]   ;;  %v11685_v49 = vsub.s32 %v122_v42, %v11682_v43  ;;  %v11704_v42 = vld [vmem:[%s11997_s0 + $0x8] sm:$0xff] }
  0x75   :  { %6529 = vmatpush1.bf16.msra.mxu0 %v9768_v7  ;;  %6489 = vmatprep.subr.bf16.mxu1 %v9769_v8  ;;  %v9777_v13 = vld [vmem:[#allocation2 + $0x264] ss:$16 sps:$4 sm:$0xff]   ;;  %v9780_v15 = vld [vmem:[#allocation2 + $0x260] ss:$16 sps:$4 sm:$0xff]  }
  0x76   :  { %6530 = vmatprep.subr.bf16.mxu0 %v9771_v9  ;;  %v9781_v16 = vld [vmem:[#allocation2 + $0x84] ss:$16 sps:$4 sm:$0xff]   ;;  %v9785_v18 = vld [vmem:[#allocation2 + $0x80] ss:$16 sps:$4 sm:$0xff]  }
  0x77   :  { %v9783_v17 = vld [vmem:[#allocation2 + $0x284] ss:$16 sps:$4 sm:$0xff]   ;;  %v9786_v19 = vld [vmem:[#allocation2 + $0x280] ss:$16 sps:$4 sm:$0xff]  }
  0x78   :  { %6490 = vmatpush1.bf16.msra.mxu1 %v9773_v10  ;;  %v9787_v20 = vld [vmem:[#allocation2 + $0xa4] ss:$16 sps:$4 sm:$0xff]   ;;  %v9791_v22 = vld [vmem:[#allocation2 + $0xa0] ss:$16 sps:$4 sm:$0xff]  }
  0x79   :  { %6531 = vmatpush1.bf16.msra.mxu0 %v9774_v11  ;;  %6491 = vmatprep.subr.bf16.mxu1 %v9775_v12  ;;  %v9789_v21 = vld [vmem:[#allocation2 + $0x2a4] ss:$16 sps:$4 sm:$0xff]   ;;  %v9792_v23 = vld [vmem:[#allocation2 + $0x2a0] ss:$16 sps:$4 sm:$0xff]  }
  0x7a   :  { %6532 = vmatprep.subr.bf16.mxu0 %v9777_v13  ;;  %v9793_v24 = vld [vmem:[#allocation2 + $0xc4] ss:$16 sps:$4 sm:$0xff]   ;;  %v9797_v26 = vld [vmem:[#allocation2 + $0xc0] ss:$16 sps:$4 sm:$0xff]  }
  0x7b   :  { %v9795_v25 = vld [vmem:[#allocation2 + $0x2c4] ss:$16 sps:$4 sm:$0xff]   ;;  %v9798_v27 = vld [vmem:[#allocation2 + $0x2c0] ss:$16 sps:$4 sm:$0xff]  }
  0x7c   :  { %6492 = vmatpush1.bf16.msra.mxu1 %v9779_v14  ;;  %v9799_v28 = vld [vmem:[#allocation2 + $0xe4] ss:$16 sps:$4 sm:$0xff]   ;;  %v9803_v30 = vld [vmem:[#allocation2 + $0xe0] ss:$16 sps:$4 sm:$0xff]  }
  0x7d   :  { %6533 = vmatpush1.bf16.msra.mxu0 %v9780_v15  ;;  %6493 = vmatprep.subr.bf16.mxu1 %v9781_v16  ;;  %v9801_v29 = vld [vmem:[#allocation2 + $0x2e4] ss:$16 sps:$4 sm:$0xff]   ;;  %v9804_v31 = vld [vmem:[#allocation2 + $0x2e0] ss:$16 sps:$4 sm:$0xff]   ;;  %v9859_v15 = vld [vmem:[#allocation2 + $0xc] ss:$16 sps:$4 sm:$0xff]  }
  0x7e   :  { %6534 = vmatprep.subr.bf16.mxu0 %v9783_v17  ;;  %v9805_v32 = vld [vmem:[#allocation2 + $0x104] ss:$16 sps:$4 sm:$0xff]   ;;  %v9809_v34 = vld [vmem:[#allocation2 + $0x100] ss:$16 sps:$4 sm:$0xff]  }
  0x7f   :  { %v9807_v33 = vld [vmem:[#allocation2 + $0x304] ss:$16 sps:$4 sm:$0xff]   ;;  %v9810_v35 = vld [vmem:[#allocation2 + $0x300] ss:$16 sps:$4 sm:$0xff]  }
  0x80   :  { %6494 = vmatpush1.bf16.msra.mxu1 %v9785_v18  ;;  %v9811_v39 = vld [vmem:[#allocation2 + $0x124] ss:$16 sps:$4 sm:$0xff]   ;;  %v9815_v41 = vld [vmem:[#allocation2 + $0x120] ss:$16 sps:$4 sm:$0xff]  }
  0x81   :  { %6535 = vmatpush1.bf16.msra.mxu0 %v9786_v19  ;;  %6495 = vmatprep.subr.bf16.mxu1 %v9787_v20  ;;  %v9813_v40 = vld [vmem:[#allocation2 + $0x324] ss:$16 sps:$4 sm:$0xff]   ;;  %v9816_v44 = vld [vmem:[#allocation2 + $0x320] ss:$16 sps:$4 sm:$0xff]   ;;  %v9857_v19 = vld [vmem:[#allocation2 + $0x8] ss:$16 sps:$4 sm:$0xff]  }
  0x82   :  { %6536 = vmatprep.subr.bf16.mxu0 %v9789_v21  ;;  %v9817_v45 = vld [vmem:[#allocation2 + $0x144] ss:$16 sps:$4 sm:$0xff]   ;;  %v9821_v47 = vld [vmem:[#allocation2 + $0x140] ss:$16 sps:$4 sm:$0xff]   ;;  %v9865_v21 = vld [vmem:[#allocation2 + $0x2c] ss:$16 sps:$4 sm:$0xff]  }
  0x83   :  { %v9819_v46 = vld [vmem:[#allocation2 + $0x344] ss:$16 sps:$4 sm:$0xff]   ;;  %v9822_v48 = vld [vmem:[#allocation2 + $0x340] ss:$16 sps:$4 sm:$0xff]  }
  0x84   :  { %6496 = vmatpush1.bf16.msra.mxu1 %v9791_v22  ;;  %v9823_v50 = vld [vmem:[#allocation2 + $0x164] ss:$16 sps:$4 sm:$0xff]   ;;  %v9827_v53 = vld [vmem:[#allocation2 + $0x160] ss:$16 sps:$4 sm:$0xff]  }
  0x85   :  { %6537 = vmatpush1.bf16.msra.mxu0 %v9792_v23  ;;  %6497 = vmatprep.subr.bf16.mxu1 %v9793_v24  ;;  %v9825_v51 = vld [vmem:[#allocation2 + $0x364] ss:$16 sps:$4 sm:$0xff]   ;;  %v9828_v56 = vld [vmem:[#allocation2 + $0x360] ss:$16 sps:$4 sm:$0xff]   ;;  %v9863_v23 = vld [vmem:[#allocation2 + $0x28] ss:$16 sps:$4 sm:$0xff]  }
  0x86   :  { %6538 = vmatprep.subr.bf16.mxu0 %v9795_v25  ;;  %v103_v52 = vld [vmem:[%s11997_s0] sm:$0xff]  ;;  %v9871_v25 = vld [vmem:[#allocation2 + $0x4c] ss:$16 sps:$4 sm:$0xff]  }
  0x87   :  { %v126_v54 = vrot.slane %v103_v52, %v11685_v49  ;;  %v119_v55 = vcombine.high %v103_v52, %v103_v52  ;;  %v9829_v57 = vld [vmem:[#allocation2 + $0x184] ss:$16 sps:$4 sm:$0xff]   ;;  %v9833_v61 = vld [vmem:[#allocation2 + $0x180] ss:$16 sps:$4 sm:$0xff]  }
  0x88   :  { %6498 = vmatpush1.bf16.msra.mxu1 %v9797_v26  ;;  %v9831_v58 = vld [vmem:[#allocation2 + $0x384] ss:$16 sps:$4 sm:$0xff]   ;;  %v9834_v0 = vld [vmem:[#allocation2 + $0x380] ss:$16 sps:$4 sm:$0xff]  }
  0x89   :  { %6539 = vmatpush1.bf16.msra.mxu0 %v9798_v27  ;;  %6499 = vmatprep.subr.bf16.mxu1 %v9799_v28  ;;  %v134_v59 = vcombine.high %v126_v54, %v126_v54  ;;  %v133_v60 = vrot.slane %v119_v55, %v11685_v49  ;;  %v9835_v1 = vld [vmem:[#allocation2 + $0x1a4] ss:$16 sps:$4 sm:$0xff]   ;;  %v9839_v4 = vld [vmem:[#allocation2 + $0x1a0] ss:$16 sps:$4 sm:$0xff]   ;;  %v11695_v16 = vpack.c.bf16 %v126_v54, %v126_v54  ;;  %v9869_v27 = vld [vmem:[#allocation2 + $0x48] ss:$16 sps:$4 sm:$0xff]  }
  0x8a   :  { %6540 = vmatprep.subr.bf16.mxu0 %v9801_v29  ;;  %v9837_v2 = vld [vmem:[#allocation2 + $0x3a4] ss:$16 sps:$4 sm:$0xff]   ;;  %v9840_v5 = vld [vmem:[#allocation2 + $0x3a0] ss:$16 sps:$4 sm:$0xff]   ;;  %v9877_v29 = vld [vmem:[#allocation2 + $0x6c] ss:$16 sps:$4 sm:$0xff]  }
  0x8b   :  { %v288_v62 = vpack.c.bf16 %v134_v59, %v134_v59  ;;  %v135_v63 = vcombine.high %v133_v60, %v133_v60  ;;  %v9841_v6 = vld [vmem:[#allocation2 + $0x1c4] ss:$16 sps:$4 sm:$0xff]   ;;  %v9845_v8 = vld [vmem:[#allocation2 + $0x1c0] ss:$16 sps:$4 sm:$0xff]   ;;  %v11697_v18 = vpack.c.bf16 %v133_v60, %v133_v60  ;;  %v9907_v55 = vld [vmem:[#allocation2 + $0x10c] ss:$16 sps:$4 sm:$0xff]  }
  0x8c   :  { %6500 = vmatpush1.bf16.msra.mxu1 %v9803_v30  ;;  %v9843_v7 = vld [vmem:[#allocation2 + $0x3c4] ss:$16 sps:$4 sm:$0xff]   ;;  %v9846_v9 = vld [vmem:[#allocation2 + $0x3c0] ss:$16 sps:$4 sm:$0xff]   ;;  %v9913_v59 = vld [vmem:[#allocation2 + $0x12c] ss:$16 sps:$4 sm:$0xff]  }
  0x8d   :  { %6541 = vmatpush1.bf16.msra.mxu0 %v9804_v31  ;;  %6501 = vmatprep.subr.bf16.mxu1 %v9805_v32  ;;  %v11692_v3 = vpack.c.bf16 %v135_v63, %v135_v63  ;;  %v9847_v10 = vld [vmem:[#allocation2 + $0x1e4] ss:$16 sps:$4 sm:$0xff]   ;;  %v9851_v12 = vld [vmem:[#allocation2 + $0x1e0] ss:$16 sps:$4 sm:$0xff]   ;;  %v9875_v31 = vld [vmem:[#allocation2 + $0x68] ss:$16 sps:$4 sm:$0xff]  }
  0x8e   :  { %6542 = vmatprep.subr.bf16.mxu0 %v9807_v33  ;;  %6517 = vmatprep.mubr.bf16.mxu1 %v288_v62  ;;  %v9849_v11 = vld [vmem:[#allocation2 + $0x3e4] ss:$16 sps:$4 sm:$0xff]   ;;  %v9852_v13 = vld [vmem:[#allocation2 + $0x3e0] ss:$16 sps:$4 sm:$0xff]   ;;  %v9883_v33 = vld [vmem:[#allocation2 + $0x8c] ss:$16 sps:$4 sm:$0xff]  }
  0x8f   :  { %6558 = vmatprep.mubr.bf16.mxu0 %v11692_v3  ;;  %v9856_v14 = vld [vmem:[#allocation2 + $0x404] ss:$16 sps:$4 sm:$0xff]   ;;  %v9854_v17 = vld [vmem:[#allocation2 + $0x400] ss:$16 sps:$4 sm:$0xff]   ;;  %v9919_v63 = vld [vmem:[#allocation2 + $0x14c] ss:$16 sps:$4 sm:$0xff]  }
  0x90   :  { %6502 = vmatpush1.bf16.msra.mxu1 %v9809_v34  ;;  %v9862_v20 = vld [vmem:[#allocation2 + $0x424] ss:$16 sps:$4 sm:$0xff]   ;;  %v9860_v22 = vld [vmem:[#allocation2 + $0x420] ss:$16 sps:$4 sm:$0xff]  }
  0x91   :  { %6543 = vmatpush1.bf16.msra.mxu0 %v9810_v35  ;;  %6503 = vmatprep.subr.bf16.mxu1 %v9811_v39  ;;  %v9868_v24 = vld [vmem:[#allocation2 + $0x444] ss:$16 sps:$4 sm:$0xff]   ;;  %v9866_v26 = vld [vmem:[#allocation2 + $0x440] ss:$16 sps:$4 sm:$0xff]   ;;  %v9881_v35 = vld [vmem:[#allocation2 + $0x88] ss:$16 sps:$4 sm:$0xff]  }
  0x92   :  { %6544 = vmatprep.subr.bf16.mxu0 %v9813_v40  ;;  %v9874_v28 = vld [vmem:[#allocation2 + $0x464] ss:$16 sps:$4 sm:$0xff]   ;;  %v9872_v30 = vld [vmem:[#allocation2 + $0x460] ss:$16 sps:$4 sm:$0xff]   ;;  %v9887_v39 = vld [vmem:[#allocation2 + $0xa8] ss:$16 sps:$4 sm:$0xff]  }
  0x93   :  { %v9880_v32 = vld [vmem:[#allocation2 + $0x484] ss:$16 sps:$4 sm:$0xff]   ;;  %v9878_v34 = vld [vmem:[#allocation2 + $0x480] ss:$16 sps:$4 sm:$0xff]  }
  0x94   :  { %6504 = vmatpush1.bf16.msra.mxu1 %v9815_v41  ;;  %v9886_v36 = vld [vmem:[#allocation2 + $0x4a4] ss:$16 sps:$4 sm:$0xff]   ;;  %v9884_v38 = vld [vmem:[#allocation2 + $0x4a0] ss:$16 sps:$4 sm:$0xff]   ;;  %v9895_v41 = vld [vmem:[#allocation2 + $0xcc] ss:$16 sps:$4 sm:$0xff]  }
  0x95   :  { %6545 = vmatpush1.bf16.msra.mxu0 %v9816_v44  ;;  %6505 = vmatprep.subr.bf16.mxu1 %v9817_v45  ;;  %v9892_v40 = vld [vmem:[#allocation2 + $0x4c4] ss:$16 sps:$4 sm:$0xff]   ;;  %v11708_v44 = vrot.slane %v11704_v42, %v11685_v49  ;;  %v9890_v45 = vld [vmem:[#allocation2 + $0x4c0] ss:$16 sps:$4 sm:$0xff]  }
  0x96   :  { %6546 = vmatprep.subr.bf16.mxu0 %v9819_v46  ;;  %v9893_v46 = vld [vmem:[#allocation2 + $0xc8] ss:$16 sps:$4 sm:$0xff]   ;;  %v9896_v52 = vld [vmem:[#allocation2 + $0x4e0] ss:$16 sps:$4 sm:$0xff]   ;;  %v9904_v54 = vld [vmem:[#allocation2 + $0x504] ss:$16 sps:$4 sm:$0xff]  }
  0x97   :  { %v9908_v60 = vld [vmem:[#allocation2 + $0x520] ss:$16 sps:$4 sm:$0xff]  }
  0x98   :  { %6506 = vmatpush1.bf16.msra.mxu1 %v9821_v47  ;;  %v151_v47 = vcombine.high %v11708_v44, %v11708_v44 }
  0x99   :  { %6547 = vmatpush1.bf16.msra.mxu0 %v9822_v48  ;;  %6507 = vmatprep.subr.bf16.mxu1 %v9823_v50  ;;  %v9898_v48 = vld [vmem:[#allocation2 + $0x4e4] ss:$16 sps:$4 sm:$0xff]   ;;  %v9901_v50 = vld [vmem:[#allocation2 + $0xec] ss:$16 sps:$4 sm:$0xff]  }
  0x9a   :  { %6548 = vmatprep.subr.bf16.mxu0 %v9825_v51  ;;  %v11712_v51 = vpack.c.bf16 %v151_v47, %v151_v47  ;;  %v9979_v47 = vld [vmem:[#allocation2 + $0x28c] ss:$16 sps:$4 sm:$0xff]  }
  0x9c   :  { %6508 = vmatpush1.bf16.msra.mxu1 %v9827_v53  ;;  %v9899_v53 = vld [vmem:[#allocation2 + $0xe8] ss:$16 sps:$4 sm:$0xff]  }
  0x9d   :  { %6549 = vmatpush1.bf16.msra.mxu0 %v9828_v56  ;;  %6509 = vmatprep.subr.bf16.mxu1 %v9829_v57  ;;  %v9902_v56 = vld [vmem:[#allocation2 + $0x500] ss:$16 sps:$4 sm:$0xff]   ;;  %v9905_v57 = vld [vmem:[#allocation2 + $0x108] ss:$16 sps:$4 sm:$0xff]  }
  0x9e   :  { %6550 = vmatprep.subr.bf16.mxu0 %v9831_v58  ;;  %v9910_v58 = vld [vmem:[#allocation2 + $0x524] ss:$16 sps:$4 sm:$0xff]  }
  0xa0   :  { %6510 = vmatpush1.bf16.msra.mxu1 %v9833_v61  ;;  %v9911_v61 = vld [vmem:[#allocation2 + $0x128] ss:$16 sps:$4 sm:$0xff]  }
  0xa1   :  { %6551 = vmatpush1.bf16.msra.mxu0 %v9834_v0  ;;  %6511 = vmatprep.subr.bf16.mxu1 %v9835_v1  ;;  %v9914_v0 = vld [vmem:[#allocation2 + $0x540] ss:$16 sps:$4 sm:$0xff]   ;;  %v9917_v1 = vld [vmem:[#allocation2 + $0x148] ss:$16 sps:$4 sm:$0xff]  }
  0xa2   :  { %6552 = vmatprep.subr.bf16.mxu0 %v9837_v2  ;;  %v9922_v2 = vld [vmem:[#allocation2 + $0x564] ss:$16 sps:$4 sm:$0xff]  }
  0xa4   :  { %6512 = vmatpush1.bf16.msra.mxu1 %v9839_v4  ;;  %v9925_v4 = vld [vmem:[#allocation2 + $0x16c] ss:$16 sps:$4 sm:$0xff]  }
  0xa5   :  { %6553 = vmatpush1.bf16.msra.mxu0 %v9840_v5  ;;  %6513 = vmatprep.subr.bf16.mxu1 %v9841_v6  ;;  %v9920_v5 = vld [vmem:[#allocation2 + $0x560] ss:$16 sps:$4 sm:$0xff]   ;;  %v9923_v6 = vld [vmem:[#allocation2 + $0x168] ss:$16 sps:$4 sm:$0xff]  }
  0xa6   :  { %6554 = vmatprep.subr.bf16.mxu0 %v9843_v7  ;;  %v9928_v7 = vld [vmem:[#allocation2 + $0x584] ss:$16 sps:$4 sm:$0xff]  }
  0xa8   :  { %6514 = vmatpush1.bf16.msra.mxu1 %v9845_v8  ;;  %v9931_v8 = vld [vmem:[#allocation2 + $0x18c] ss:$16 sps:$4 sm:$0xff]  }
  0xa9   :  { %6555 = vmatpush1.bf16.msra.mxu0 %v9846_v9  ;;  %6515 = vmatprep.subr.bf16.mxu1 %v9847_v10  ;;  %v9926_v9 = vld [vmem:[#allocation2 + $0x580] ss:$16 sps:$4 sm:$0xff]   ;;  %v9929_v10 = vld [vmem:[#allocation2 + $0x188] ss:$16 sps:$4 sm:$0xff]  }
  0xaa   :  { %6556 = vmatprep.subr.bf16.mxu0 %v9849_v11  ;;  %v9934_v11 = vld [vmem:[#allocation2 + $0x5a4] ss:$16 sps:$4 sm:$0xff]  }
  0xac   :  { %6516 = vmatpush1.bf16.msra.mxu1 %v9851_v12  ;;  %v9937_v12 = vld [vmem:[#allocation2 + $0x1ac] ss:$16 sps:$4 sm:$0xff]  }
  0xad   :  { %6557 = vmatpush1.bf16.msra.mxu0 %v9852_v13  ;;  %7141 = vmatprep.subr.bf16.mxu1 %v9859_v15  ;;  %v9932_v13 = vld [vmem:[#allocation2 + $0x5a0] ss:$16 sps:$4 sm:$0xff]   ;;  %v9940_v15 = vld [vmem:[#allocation2 + $0x5c4] ss:$16 sps:$4 sm:$0xff]  }
  0xae   :  { %6567 = vmatprep.subr.bf16.mxu0 %v9856_v14  ;;  %v9935_v14 = vld [vmem:[#allocation2 + $0x1a8] ss:$16 sps:$4 sm:$0xff]  }
  0xaf   :  { %6518 = vmatmul.mubr.bf16.vlgmr.msra.gmra.mrb[0].mxu1 %v11695_v16 }
  0xb0   :  { %6559 = vmatmul.mubr.bf16.vlgmr.msra.gmra.mrb[0].mxu0 %v11697_v18  ;;  %7142 = vmatpush1.bf16.msra.mxu1 %v9857_v19  ;;  %v136_v19 = vcombine.high %v11704_v42, %v11704_v42  ;;  %v9970_v42 = vld [vmem:[#allocation2 + $0x664] ss:$16 sps:$4 sm:$0xff]  }
  0xb1   :  { %6568 = vmatpush1.bf16.msra.mxu0 %v9854_v17  ;;  %7143 = vmatprep.subr.bf16.mxu1 %v9865_v21  ;;  %v9943_v17 = vld [vmem:[#allocation2 + $0x1cc] ss:$16 sps:$4 sm:$0xff]   ;;  %v9941_v21 = vld [vmem:[#allocation2 + $0x1c8] ss:$16 sps:$4 sm:$0xff]  }
  0xb2   :  { %6569 = vmatprep.subr.bf16.mxu0 %v9862_v20  ;;  %7173 = vmatprep.mubr.bf16.mxu1 %v288_v62  ;;  %v9916_v62 = vld [vmem:[#allocation2 + $0x544] ss:$16 sps:$4 sm:$0xff]   ;;  %v9938_v20 = vld [vmem:[#allocation2 + $0x5c0] ss:$16 sps:$4 sm:$0xff]  }
  0xb3   :  { %6599 = vmatprep.mubr.bf16.mxu0 %v11712_v51 }
  0xb4   :  { %7144 = vmatpush1.bf16.msra.mxu1 %v9863_v23  ;;  %v9949_v23 = vld [vmem:[#allocation2 + $0x1ec] ss:$16 sps:$4 sm:$0xff]  }
  0xb5   :  { %6570 = vmatpush1.bf16.msra.mxu0 %v9860_v22  ;;  %7145 = vmatprep.subr.bf16.mxu1 %v9871_v25  ;;  %v9946_v22 = vld [vmem:[#allocation2 + $0x5e4] ss:$16 sps:$4 sm:$0xff]   ;;  %v9944_v25 = vld [vmem:[#allocation2 + $0x5e0] ss:$16 sps:$4 sm:$0xff]  }
  0xb6   :  { %6571 = vmatprep.subr.bf16.mxu0 %v9868_v24  ;;  %v11718_v24 = vrot.slane %v136_v19, %v11685_v49  ;;  %v10027_v19 = vld [vmem:[#allocation2 + $0x38c] ss:$16 sps:$4 sm:$0xff]  }
  0xb8   :  { %7146 = vmatpush1.bf16.msra.mxu1 %v9869_v27  ;;  %v9952_v27 = vld [vmem:[#allocation2 + $0x604] ss:$16 sps:$4 sm:$0xff]  }
  0xb9   :  { %6572 = vmatpush1.bf16.msra.mxu0 %v9866_v26  ;;  %7147 = vmatprep.subr.bf16.mxu1 %v9877_v29  ;;  %v9947_v26 = vld [vmem:[#allocation2 + $0x1e8] ss:$16 sps:$4 sm:$0xff]   ;;  %v152_v29 = vcombine.high %v11718_v24, %v11718_v24 }
  0xba   :  { %6573 = vmatprep.subr.bf16.mxu0 %v9874_v28  ;;  %v9955_v28 = vld [vmem:[#allocation2 + $0x20c] ss:$16 sps:$4 sm:$0xff]  }
  0xbc   :  { %7148 = vmatpush1.bf16.msra.mxu1 %v9875_v31  ;;  %v9950_v31 = vld [vmem:[#allocation2 + $0x600] ss:$16 sps:$4 sm:$0xff]  }
  0xbd   :  { %6574 = vmatpush1.bf16.msra.mxu0 %v9872_v30  ;;  %7149 = vmatprep.subr.bf16.mxu1 %v9883_v33  ;;  %v11724_v30 = vpack.c.bf16 %v11708_v44, %v11708_v44  ;;  %v9958_v33 = vld [vmem:[#allocation2 + $0x624] ss:$16 sps:$4 sm:$0xff]   ;;  %v9968_v44 = vld [vmem:[#allocation2 + $0x660] ss:$16 sps:$4 sm:$0xff]  }
  0xbe   :  { %6575 = vmatprep.subr.bf16.mxu0 %v9880_v32  ;;  %v9953_v32 = vld [vmem:[#allocation2 + $0x208] ss:$16 sps:$4 sm:$0xff]  }
  0xc0   :  { %7150 = vmatpush1.bf16.msra.mxu1 %v9881_v35  ;;  %v11726_v35 = vpack.c.bf16 %v152_v29, %v152_v29  ;;  %v10034_v29 = vld [vmem:[#allocation2 + $0x7c0] ss:$16 sps:$4 sm:$0xff]  }
  0xc1   :  { %6576 = vmatpush1.bf16.msra.mxu0 %v9878_v34  ;;  %7151 = vmatprep.subr.bf16.mxu1 %v9889_v37  ;;  %v9961_v34 = vld [vmem:[#allocation2 + $0x22c] ss:$16 sps:$4 sm:$0xff]   ;;  %v9959_v37 = vld [vmem:[#allocation2 + $0x228] ss:$16 sps:$4 sm:$0xff]  }
  0xc2   :  { %6577 = vmatprep.subr.bf16.mxu0 %v9886_v36  ;;  %v9956_v36 = vld [vmem:[#allocation2 + $0x620] ss:$16 sps:$4 sm:$0xff]  }
  0xc4   :  { %7152 = vmatpush1.bf16.msra.mxu1 %v9887_v39  ;;  %v9967_v39 = vld [vmem:[#allocation2 + $0x24c] ss:$16 sps:$4 sm:$0xff]  }
  0xc5   :  { %6578 = vmatpush1.bf16.msra.mxu0 %v9884_v38  ;;  %7153 = vmatprep.subr.bf16.mxu1 %v9895_v41  ;;  %v9964_v38 = vld [vmem:[#allocation2 + $0x644] ss:$16 sps:$4 sm:$0xff]   ;;  %v9965_v41 = vld [vmem:[#allocation2 + $0x248] ss:$16 sps:$4 sm:$0xff]  }
  0xc6   :  { %6579 = vmatprep.subr.bf16.mxu0 %v9892_v40  ;;  %v9962_v40 = vld [vmem:[#allocation2 + $0x640] ss:$16 sps:$4 sm:$0xff]  }
  0xc8   :  { %7154 = vmatpush1.bf16.msra.mxu1 %v9893_v46  ;;  %v9976_v46 = vld [vmem:[#allocation2 + $0x684] ss:$16 sps:$4 sm:$0xff]  }
  0xc9   :  { %6580 = vmatpush1.bf16.msra.mxu0 %v9890_v45  ;;  %7155 = vmatprep.subr.bf16.mxu1 %v9901_v50  ;;  %v9971_v45 = vld [vmem:[#allocation2 + $0x268] ss:$16 sps:$4 sm:$0xff]   ;;  %v9982_v50 = vld [vmem:[#allocation2 + $0x6a4] ss:$16 sps:$4 sm:$0xff]  }
  0xca   :  { %6581 = vmatprep.subr.bf16.mxu0 %v9898_v48  ;;  %v9974_v48 = vld [vmem:[#allocation2 + $0x680] ss:$16 sps:$4 sm:$0xff]  }
  0xcc   :  { %7156 = vmatpush1.bf16.msra.mxu1 %v9899_v53  ;;  %v9980_v53 = vld [vmem:[#allocation2 + $0x6a0] ss:$16 sps:$4 sm:$0xff]  }
  0xcd   :  { %6582 = vmatpush1.bf16.msra.mxu0 %v9896_v52  ;;  %7157 = vmatprep.subr.bf16.mxu1 %v9907_v55  ;;  %v9985_v52 = vld [vmem:[#allocation2 + $0x2ac] ss:$16 sps:$4 sm:$0xff]   ;;  %v9988_v55 = vld [vmem:[#allocation2 + $0x6c4] ss:$16 sps:$4 sm:$0xff]  }
  0xce   :  { %6583 = vmatprep.subr.bf16.mxu0 %v9904_v54  ;;  %v9983_v54 = vld [vmem:[#allocation2 + $0x2a8] ss:$16 sps:$4 sm:$0xff]  }
  0xd0   :  { %7158 = vmatpush1.bf16.msra.mxu1 %v9905_v57  ;;  %v9986_v57 = vld [vmem:[#allocation2 + $0x6c0] ss:$16 sps:$4 sm:$0xff]  }
  0xd1   :  { %6584 = vmatpush1.bf16.msra.mxu0 %v9902_v56  ;;  %7159 = vmatprep.subr.bf16.mxu1 %v9913_v59  ;;  %v9991_v56 = vld [vmem:[#allocation2 + $0x2cc] ss:$16 sps:$4 sm:$0xff]   ;;  %v9994_v59 = vld [vmem:[#allocation2 + $0x6e4] ss:$16 sps:$4 sm:$0xff]  }
  0xd2   :  { %6585 = vmatprep.subr.bf16.mxu0 %v9910_v58  ;;  %v9989_v58 = vld [vmem:[#allocation2 + $0x2c8] ss:$16 sps:$4 sm:$0xff]  }
  0xd4   :  { %7160 = vmatpush1.bf16.msra.mxu1 %v9911_v61  ;;  %v9992_v61 = vld [vmem:[#allocation2 + $0x6e0] ss:$16 sps:$4 sm:$0xff]  }
  0xd5   :  { %6586 = vmatpush1.bf16.msra.mxu0 %v9908_v60  ;;  %7161 = vmatprep.subr.bf16.mxu1 %v9919_v63  ;;  %v9997_v60 = vld [vmem:[#allocation2 + $0x2ec] ss:$16 sps:$4 sm:$0xff]   ;;  %v10000_v63 = vld [vmem:[#allocation2 + $0x704] ss:$16 sps:$4 sm:$0xff]  }
  0xd6   :  { %6587 = vmatprep.subr.bf16.mxu0 %v9916_v62  ;;  %v9995_v62 = vld [vmem:[#allocation2 + $0x2e8] ss:$16 sps:$4 sm:$0xff]  }
  0xd8   :  { %7162 = vmatpush1.bf16.msra.mxu1 %v9917_v1  ;;  %v9998_v1 = vld [vmem:[#allocation2 + $0x700] ss:$16 sps:$4 sm:$0xff]  }
  0xd9   :  { %6588 = vmatpush1.bf16.msra.mxu0 %v9914_v0  ;;  %7163 = vmatprep.subr.bf16.mxu1 %v9925_v4  ;;  %v10003_v0 = vld [vmem:[#allocation2 + $0x30c] ss:$16 sps:$4 sm:$0xff]   ;;  %v10006_v4 = vld [vmem:[#allocation2 + $0x724] ss:$16 sps:$4 sm:$0xff]  }
  0xda   :  { %6589 = vmatprep.subr.bf16.mxu0 %v9922_v2  ;;  %v10001_v2 = vld [vmem:[#allocation2 + $0x308] ss:$16 sps:$4 sm:$0xff]  }
  0xdc   :  { %7164 = vmatpush1.bf16.msra.mxu1 %v9923_v6  ;;  %v10004_v6 = vld [vmem:[#allocation2 + $0x720] ss:$16 sps:$4 sm:$0xff]  }
  0xdd   :  { %6590 = vmatpush1.bf16.msra.mxu0 %v9920_v5  ;;  %7165 = vmatprep.subr.bf16.mxu1 %v9931_v8  ;;  %v10009_v5 = vld [vmem:[#allocation2 + $0x32c] ss:$16 sps:$4 sm:$0xff]   ;;  %v10012_v8 = vld [vmem:[#allocation2 + $0x744] ss:$16 sps:$4 sm:$0xff]  }
  0xde   :  { %6591 = vmatprep.subr.bf16.mxu0 %v9928_v7  ;;  %v10007_v7 = vld [vmem:[#allocation2 + $0x328] ss:$16 sps:$4 sm:$0xff]  }
  0xe0   :  { %7166 = vmatpush1.bf16.msra.mxu1 %v9929_v10  ;;  %v10010_v10 = vld [vmem:[#allocation2 + $0x740] ss:$16 sps:$4 sm:$0xff]  }
  0xe1   :  { %6592 = vmatpush1.bf16.msra.mxu0 %v9926_v9  ;;  %7167 = vmatprep.subr.bf16.mxu1 %v9937_v12  ;;  %v10015_v9 = vld [vmem:[#allocation2 + $0x34c] ss:$16 sps:$4 sm:$0xff]   ;;  %v10018_v12 = vld [vmem:[#allocation2 + $0x764] ss:$16 sps:$4 sm:$0xff]  }
  0xe2   :  { %6593 = vmatprep.subr.bf16.mxu0 %v9934_v11  ;;  %v10013_v11 = vld [vmem:[#allocation2 + $0x348] ss:$16 sps:$4 sm:$0xff]  }
  0xe4   :  { %7168 = vmatpush1.bf16.msra.mxu1 %v9935_v14  ;;  %v10016_v14 = vld [vmem:[#allocation2 + $0x760] ss:$16 sps:$4 sm:$0xff]  }
  0xe5   :  { %6594 = vmatpush1.bf16.msra.mxu0 %v9932_v13  ;;  %7169 = vmatprep.subr.bf16.mxu1 %v9943_v17  ;;  %v10021_v13 = vld [vmem:[#allocation2 + $0x36c] ss:$16 sps:$4 sm:$0xff]   ;;  %v10024_v17 = vld [vmem:[#allocation2 + $0x784] ss:$16 sps:$4 sm:$0xff]  }
  0xe6   :  { %6595 = vmatprep.subr.bf16.mxu0 %v9940_v15  ;;  %v10019_v15 = vld [vmem:[#allocation2 + $0x368] ss:$16 sps:$4 sm:$0xff]  }
  0xe8   :  { %7170 = vmatpush1.bf16.msra.mxu1 %v9941_v21  ;;  %v10025_v21 = vld [vmem:[#allocation2 + $0x388] ss:$16 sps:$4 sm:$0xff]  }
  0xe9   :  { %6596 = vmatpush1.bf16.msra.mxu0 %v9938_v20  ;;  %7171 = vmatprep.subr.bf16.mxu1 %v9949_v23  ;;  %v10022_v20 = vld [vmem:[#allocation2 + $0x780] ss:$16 sps:$4 sm:$0xff]   ;;  %v10033_v23 = vld [vmem:[#allocation2 + $0x3ac] ss:$16 sps:$4 sm:$0xff]  }
  0xea   :  { %6597 = vmatprep.subr.bf16.mxu0 %v9946_v22  ;;  %v10030_v22 = vld [vmem:[#allocation2 + $0x7a4] ss:$16 sps:$4 sm:$0xff]  }
  0xec   :  { %7172 = vmatpush1.bf16.msra.mxu1 %v9947_v26  ;;  %v10031_v26 = vld [vmem:[#allocation2 + $0x3a8] ss:$16 sps:$4 sm:$0xff]  }
  0xed   :  { %6598 = vmatpush1.bf16.msra.mxu0 %v9944_v25  ;;  %7182 = vmatprep.subr.bf16.mxu1 %v9955_v28  ;;  %v10028_v25 = vld [vmem:[#allocation2 + $0x7a0] ss:$16 sps:$4 sm:$0xff]   ;;  %v10039_v28 = vld [vmem:[#allocation2 + $0x3cc] ss:$16 sps:$4 sm:$0xff]  }
  0xee   :  { %6608 = vmatprep.subr.bf16.mxu0 %v9952_v27  ;;  %v10036_v27 = vld [vmem:[#allocation2 + $0x7c4] ss:$16 sps:$4 sm:$0xff]  }
  0xef   :  { %7174 = vmatmul.mubr.bf16.vlgmr.msra.gmra.mrb[4].mxu1 %v11695_v16  ;;  %v9973_v16 = vld [vmem:[#allocation2 + $0x26c] ss:$16 sps:$4 sm:$0xff]  }
  0xf0   :  { %6600 = vmatmul.mubr.bf16.vlgmr.msra.gmra.mrb[0].mxu0 %v11724_v30  ;;  %7183 = vmatpush1.bf16.msra.mxu1 %v9953_v32  ;;  %v10037_v32 = vld [vmem:[#allocation2 + $0x3c8] ss:$16 sps:$4 sm:$0xff]  }
  0xf1   :  { %6609 = vmatpush1.bf16.msra.mxu0 %v9950_v31  ;;  %7184 = vmatprep.subr.bf16.mxu1 %v9961_v34  ;;  %v11735_v31 = vld [vmem:[%s11997_s0 + $0x10] sm:$0xff]  ;;  %v10045_v34 = vld [vmem:[#allocation2 + $0x3ec] ss:$16 sps:$4 sm:$0xff]  }
  0xf2   :  { %6610 = vmatprep.subr.bf16.mxu0 %v9958_v33  ;;  %6640 = vmatprep.mubr.bf16.mxu0 %v11726_v35  ;;  %v10042_v33 = vld [vmem:[#allocation2 + $0x7e4] ss:$16 sps:$4 sm:$0xff]  }
  0xf3   :  { %7214 = vmatprep.mubr.bf16.mxu1 %v11692_v3  ;;  %v9977_v3 = vld [vmem:[#allocation2 + $0x288] ss:$16 sps:$4 sm:$0xff]  }
  0xf4   :  { %7185 = vmatpush1.bf16.msra.mxu1 %v9959_v37  ;;  %v10040_v37 = vld [vmem:[#allocation2 + $0x7e0] ss:$16 sps:$4 sm:$0xff]  }
  0xf5   :  { %6611 = vmatpush1.bf16.msra.mxu0 %v9956_v36  ;;  %7186 = vmatprep.subr.bf16.mxu1 %v9967_v39  ;;  %v11739_v36 = vrot.slane %v11735_v31, %v11685_v49  ;;  %v10049_v39 = vld [vmem:[#allocation2 + $0x804] ss:$16 sps:$4 sm:$0xff]  }
  0xf6   :  { %6612 = vmatprep.subr.bf16.mxu0 %v9964_v38  ;;  %v10043_v38 = vld [vmem:[#allocation2 + $0x3e8] ss:$16 sps:$4 sm:$0xff]  }
  0xf8   :  { %7187 = vmatpush1.bf16.msra.mxu1 %v9965_v41  ;;  %v168_v41 = vcombine.high %v11739_v36, %v11739_v36 }
  0xf9   :  { %6613 = vmatpush1.bf16.msra.mxu0 %v9962_v40  ;;  %7188 = vmatprep.subr.bf16.mxu1 %v9973_v16  ;;  %v10052_v40 = vld [vmem:[#allocation2 + $0x40c] ss:$16 sps:$4 sm:$0xff]   ;;  %v10050_v16 = vld [vmem:[#allocation2 + $0x408] ss:$16 sps:$4 sm:$0xff]  }
  0xfa   :  { %6614 = vmatprep.subr.bf16.mxu0 %v9970_v42  ;;  %v10047_v42 = vld [vmem:[#allocation2 + $0x800] ss:$16 sps:$4 sm:$0xff]  }
  0xfc   :  { %7189 = vmatpush1.bf16.msra.mxu1 %v9971_v45  ;;  %v10055_v45 = vld [vmem:[#allocation2 + $0x824] ss:$16 sps:$4 sm:$0xff]  }
  0xfd   :  { %6615 = vmatpush1.bf16.msra.mxu0 %v9968_v44  ;;  %7190 = vmatprep.subr.bf16.mxu1 %v9979_v47  ;;  %v11745_v44 = vpack.c.bf16 %v11718_v24, %v11718_v24  ;;  %v11747_v47 = vpack.c.bf16 %v168_v41, %v168_v41  ;;  %v10064_v24 = vld [vmem:[#allocation2 + $0x44c] ss:$16 sps:$4 sm:$0xff]  }
  0xfe   :  { %6616 = vmatprep.subr.bf16.mxu0 %v9976_v46  ;;  %v10058_v46 = vld [vmem:[#allocation2 + $0x42c] ss:$16 sps:$4 sm:$0xff]  }
  0xff   :  { %v10136_v41 = vld [vmem:[#allocation2 + $0x5cc] ss:$16 sps:$4 sm:$0xff]  }
 0x100   :  { %7191 = vmatpush1.bf16.msra.mxu1 %v9977_v3  ;;  %v10056_v3 = vld [vmem:[#allocation2 + $0x428] ss:$16 sps:$4 sm:$0xff]  }
 0x101   :  { %6617 = vmatpush1.bf16.msra.mxu0 %v9974_v48  ;;  %7192 = vmatprep.subr.bf16.mxu1 %v9985_v52  ;;  %v10053_v48 = vld [vmem:[#allocation2 + $0x820] ss:$16 sps:$4 sm:$0xff]  }
 0x102   :  { %6618 = vmatprep.subr.bf16.mxu0 %v9982_v50  ;;  %v10061_v50 = vld [vmem:[#allocation2 + $0x844] ss:$16 sps:$4 sm:$0xff]   ;;  %v10059_v52 = vld [vmem:[#allocation2 + $0x840] ss:$16 sps:$4 sm:$0xff]  }
 0x104   :  { %7193 = vmatpush1.bf16.msra.mxu1 %v9983_v54  ;;  %v10067_v54 = vld [vmem:[#allocation2 + $0x864] ss:$16 sps:$4 sm:$0xff]  }
 0x105   :  { %6619 = vmatpush1.bf16.msra.mxu0 %v9980_v53  ;;  %7194 = vmatprep.subr.bf16.mxu1 %v9991_v56  ;;  %v10062_v53 = vld [vmem:[#allocation2 + $0x448] ss:$16 sps:$4 sm:$0xff]  }
 0x106   :  { %6620 = vmatprep.subr.bf16.mxu0 %v9988_v55  ;;  %v10065_v55 = vld [vmem:[#allocation2 + $0x860] ss:$16 sps:$4 sm:$0xff]   ;;  %v10068_v56 = vld [vmem:[#allocation2 + $0x468] ss:$16 sps:$4 sm:$0xff]  }
 0x108   :  { %7195 = vmatpush1.bf16.msra.mxu1 %v9989_v58  ;;  %v10076_v58 = vld [vmem:[#allocation2 + $0x48c] ss:$16 sps:$4 sm:$0xff]  }
 0x109   :  { %6621 = vmatpush1.bf16.msra.mxu0 %v9986_v57  ;;  %7196 = vmatprep.subr.bf16.mxu1 %v9997_v60  ;;  %v10073_v57 = vld [vmem:[#allocation2 + $0x884] ss:$16 sps:$4 sm:$0xff]   ;;  %v10074_v60 = vld [vmem:[#allocation2 + $0x488] ss:$16 sps:$4 sm:$0xff]  }
 0x10a   :  { %6622 = vmatprep.subr.bf16.mxu0 %v9994_v59  ;;  %v10071_v59 = vld [vmem:[#allocation2 + $0x880] ss:$16 sps:$4 sm:$0xff]  }
 0x10c   :  { %7197 = vmatpush1.bf16.msra.mxu1 %v9995_v62  ;;  %v10077_v62 = vld [vmem:[#allocation2 + $0x8a0] ss:$16 sps:$4 sm:$0xff]  }
 0x10d   :  { %6623 = vmatpush1.bf16.msra.mxu0 %v9992_v61  ;;  %7198 = vmatprep.subr.bf16.mxu1 %v10003_v0  ;;  %v10082_v61 = vld [vmem:[#allocation2 + $0x4ac] ss:$16 sps:$4 sm:$0xff]   ;;  %v10085_v0 = vld [vmem:[#allocation2 + $0x8c4] ss:$16 sps:$4 sm:$0xff]  }
 0x10e   :  { %6624 = vmatprep.subr.bf16.mxu0 %v10000_v63  ;;  %v10080_v63 = vld [vmem:[#allocation2 + $0x4a8] ss:$16 sps:$4 sm:$0xff]  }
 0x110   :  { %7199 = vmatpush1.bf16.msra.mxu1 %v10001_v2  ;;  %v10083_v2 = vld [vmem:[#allocation2 + $0x8c0] ss:$16 sps:$4 sm:$0xff]  }
 0x111   :  { %6625 = vmatpush1.bf16.msra.mxu0 %v9998_v1  ;;  %7200 = vmatprep.subr.bf16.mxu1 %v10009_v5  ;;  %v10088_v1 = vld [vmem:[#allocation2 + $0x4cc] ss:$16 sps:$4 sm:$0xff]   ;;  %v10091_v5 = vld [vmem:[#allocation2 + $0x8e4] ss:$16 sps:$4 sm:$0xff]  }
 0x112   :  { %6626 = vmatprep.subr.bf16.mxu0 %v10006_v4  ;;  %v10086_v4 = vld [vmem:[#allocation2 + $0x4c8] ss:$16 sps:$4 sm:$0xff]  }
 0x114   :  { %7201 = vmatpush1.bf16.msra.mxu1 %v10007_v7  ;;  %v10089_v7 = vld [vmem:[#allocation2 + $0x8e0] ss:$16 sps:$4 sm:$0xff]  }
 0x115   :  { %6627 = vmatpush1.bf16.msra.mxu0 %v10004_v6  ;;  %7202 = vmatprep.subr.bf16.mxu1 %v10015_v9  ;;  %v10094_v6 = vld [vmem:[#allocation2 + $0x4ec] ss:$16 sps:$4 sm:$0xff]   ;;  %v10097_v9 = vld [vmem:[#allocation2 + $0x904] ss:$16 sps:$4 sm:$0xff]  }
 0x116   :  { %6628 = vmatprep.subr.bf16.mxu0 %v10012_v8  ;;  %v10092_v8 = vld [vmem:[#allocation2 + $0x4e8] ss:$16 sps:$4 sm:$0xff]  }
 0x118   :  { %7203 = vmatpush1.bf16.msra.mxu1 %v10013_v11  ;;  %v10095_v11 = vld [vmem:[#allocation2 + $0x900] ss:$16 sps:$4 sm:$0xff]  }
 0x119   :  { %6629 = vmatpush1.bf16.msra.mxu0 %v10010_v10  ;;  %7204 = vmatprep.subr.bf16.mxu1 %v10021_v13  ;;  %v10100_v10 = vld [vmem:[#allocation2 + $0x50c] ss:$16 sps:$4 sm:$0xff]   ;;  %v10103_v13 = vld [vmem:[#allocation2 + $0x924] ss:$16 sps:$4 sm:$0xff]  }
 0x11a   :  { %6630 = vmatprep.subr.bf16.mxu0 %v10018_v12  ;;  %v10098_v12 = vld [vmem:[#allocation2 + $0x508] ss:$16 sps:$4 sm:$0xff]  }
 0x11c   :  { %7205 = vmatpush1.bf16.msra.mxu1 %v10019_v15  ;;  %v10101_v15 = vld [vmem:[#allocation2 + $0x920] ss:$16 sps:$4 sm:$0xff]  }
 0x11d   :  { %6631 = vmatpush1.bf16.msra.mxu0 %v10016_v14  ;;  %7206 = vmatprep.subr.bf16.mxu1 %v10027_v19  ;;  %v10106_v14 = vld [vmem:[#allocation2 + $0x52c] ss:$16 sps:$4 sm:$0xff]   ;;  %v10109_v19 = vld [vmem:[#allocation2 + $0x944] ss:$16 sps:$4 sm:$0xff]  }
 0x11e   :  { %6632 = vmatprep.subr.bf16.mxu0 %v10024_v17  ;;  %v10104_v17 = vld [vmem:[#allocation2 + $0x528] ss:$16 sps:$4 sm:$0xff]  }
 0x120   :  { %7207 = vmatpush1.bf16.msra.mxu1 %v10025_v21  ;;  %v10107_v21 = vld [vmem:[#allocation2 + $0x940] ss:$16 sps:$4 sm:$0xff]  }
 0x121   :  { %6633 = vmatpush1.bf16.msra.mxu0 %v10022_v20  ;;  %7208 = vmatprep.subr.bf16.mxu1 %v10033_v23  ;;  %v10112_v20 = vld [vmem:[#allocation2 + $0x54c] ss:$16 sps:$4 sm:$0xff]   ;;  %v10115_v23 = vld [vmem:[#allocation2 + $0x964] ss:$16 sps:$4 sm:$0xff]  }
 0x122   :  { %6634 = vmatprep.subr.bf16.mxu0 %v10030_v22  ;;  %v10110_v22 = vld [vmem:[#allocation2 + $0x548] ss:$16 sps:$4 sm:$0xff]  }
 0x124   :  { %7209 = vmatpush1.bf16.msra.mxu1 %v10031_v26  ;;  %v10113_v26 = vld [vmem:[#allocation2 + $0x960] ss:$16 sps:$4 sm:$0xff]  }
 0x125   :  { %6635 = vmatpush1.bf16.msra.mxu0 %v10028_v25  ;;  %7210 = vmatprep.subr.bf16.mxu1 %v10039_v28  ;;  %v10118_v25 = vld [vmem:[#allocation2 + $0x56c] ss:$16 sps:$4 sm:$0xff]   ;;  %v10121_v28 = vld [vmem:[#allocation2 + $0x984] ss:$16 sps:$4 sm:$0xff]  }
 0x126   :  { %6636 = vmatprep.subr.bf16.mxu0 %v10036_v27  ;;  %v10116_v27 = vld [vmem:[#allocation2 + $0x568] ss:$16 sps:$4 sm:$0xff]  }
 0x128   :  { %7211 = vmatpush1.bf16.msra.mxu1 %v10037_v32  ;;  %v10119_v32 = vld [vmem:[#allocation2 + $0x980] ss:$16 sps:$4 sm:$0xff]  }
 0x129   :  { %6637 = vmatpush1.bf16.msra.mxu0 %v10034_v29  ;;  %7212 = vmatprep.subr.bf16.mxu1 %v10045_v34  ;;  %v10124_v29 = vld [vmem:[#allocation2 + $0x58c] ss:$16 sps:$4 sm:$0xff]   ;;  %v10127_v34 = vld [vmem:[#allocation2 + $0x9a4] ss:$16 sps:$4 sm:$0xff]  }
 0x12a   :  { %6638 = vmatprep.subr.bf16.mxu0 %v10042_v33  ;;  %v10122_v33 = vld [vmem:[#allocation2 + $0x588] ss:$16 sps:$4 sm:$0xff]  }
 0x12c   :  { %7213 = vmatpush1.bf16.msra.mxu1 %v10043_v38  ;;  %v10125_v38 = vld [vmem:[#allocation2 + $0x9a0] ss:$16 sps:$4 sm:$0xff]  }
 0x12d   :  { %6639 = vmatpush1.bf16.msra.mxu0 %v10040_v37  ;;  %7223 = vmatprep.subr.bf16.mxu1 %v10052_v40  ;;  %v10130_v37 = vld [vmem:[#allocation2 + $0x5ac] ss:$16 sps:$4 sm:$0xff]   ;;  %v10133_v40 = vld [vmem:[#allocation2 + $0x9c4] ss:$16 sps:$4 sm:$0xff]  }
 0x12e   :  { %6649 = vmatprep.subr.bf16.mxu0 %v10049_v39  ;;  %v10128_v39 = vld [vmem:[#allocation2 + $0x5a8] ss:$16 sps:$4 sm:$0xff]  }
 0x12f   :  { %7215 = vmatmul.mubr.bf16.vlgmr.msra.gmra.mrb[4].mxu1 %v11697_v18  ;;  %v10070_v18 = vld [vmem:[#allocation2 + $0x46c] ss:$16 sps:$4 sm:$0xff]  }
 0x130   :  { %6641 = vmatmul.mubr.bf16.vlgmr.msra.gmra.mrb[0].mxu0 %v11745_v44  ;;  %7224 = vmatpush1.bf16.msra.mxu1 %v10050_v16  ;;  %v10131_v16 = vld [vmem:[#allocation2 + $0x9c0] ss:$16 sps:$4 sm:$0xff]  }
 0x131   :  { %6650 = vmatpush1.bf16.msra.mxu0 %v10047_v42  ;;  %7225 = vmatprep.subr.bf16.mxu1 %v10058_v46  ;;  %v153_v42 = vcombine.high %v11735_v31, %v11735_v31  ;;  %v10139_v46 = vld [vmem:[#allocation2 + $0x9e4] ss:$16 sps:$4 sm:$0xff]  }
 0x132   :  { %6651 = vmatprep.subr.bf16.mxu0 %v10055_v45  ;;  %6681 = vmatprep.mubr.bf16.mxu0 %v11747_v47  ;;  %v10134_v45 = vld [vmem:[#allocation2 + $0x5c8] ss:$16 sps:$4 sm:$0xff]  }
 0x133   :  { %7255 = vmatprep.mubr.bf16.mxu1 %v11712_v51  ;;  %v10079_v51 = vld [vmem:[#allocation2 + $0x8a4] ss:$16 sps:$4 sm:$0xff]  }
 0x134   :  { %7226 = vmatpush1.bf16.msra.mxu1 %v10056_v3  ;;  %v11756_v3 = vrot.slane %v153_v42, %v11685_v49  ;;  %v10214_v42 = vld [vmem:[#allocation2 + $0x76c] ss:$16 sps:$4 sm:$0xff]  }
 0x135   :  { %6652 = vmatpush1.bf16.msra.mxu0 %v10053_v48  ;;  %7227 = vmatprep.subr.bf16.mxu1 %v10064_v24  ;;  %v10142_v48 = vld [vmem:[#allocation2 + $0x5ec] ss:$16 sps:$4 sm:$0xff]   ;;  %v10140_v24 = vld [vmem:[#allocation2 + $0x5e8] ss:$16 sps:$4 sm:$0xff]  }
 0x136   :  { %6653 = vmatprep.subr.bf16.mxu0 %v10061_v50  ;;  %v10137_v50 = vld [vmem:[#allocation2 + $0x9e0] ss:$16 sps:$4 sm:$0xff]   ;;  %v169_v31 = vcombine.high %v11756_v3, %v11756_v3 }
 0x138   :  { %7228 = vmatpush1.bf16.msra.mxu1 %v10062_v53  ;;  %v10148_v53 = vld [vmem:[#allocation2 + $0x60c] ss:$16 sps:$4 sm:$0xff]  }
 0x139   :  { %6654 = vmatpush1.bf16.msra.mxu0 %v10059_v52  ;;  %7229 = vmatprep.subr.bf16.mxu1 %v10070_v18  ;;  %v10145_v52 = vld [vmem:[#allocation2 + $0xa04] ss:$16 sps:$4 sm:$0xff]   ;;  %v11762_v18 = vpack.c.bf16 %v11739_v36, %v11739_v36 }
 0x13a   :  { %6655 = vmatprep.subr.bf16.mxu0 %v10067_v54  ;;  %v10143_v54 = vld [vmem:[#allocation2 + $0xa00] ss:$16 sps:$4 sm:$0xff]   ;;  %v10157_v36 = vld [vmem:[#allocation2 + $0xa44] ss:$16 sps:$4 sm:$0xff]  }
 0x13c   :  { %7230 = vmatpush1.bf16.msra.mxu1 %v10068_v56  ;;  %v10151_v56 = vld [vmem:[#allocation2 + $0xa24] ss:$16 sps:$4 sm:$0xff]  }
 0x13d   :  { %6656 = vmatpush1.bf16.msra.mxu0 %v10065_v55  ;;  %7231 = vmatprep.subr.bf16.mxu1 %v10076_v58  ;;  %v10146_v55 = vld [vmem:[#allocation2 + $0x608] ss:$16 sps:$4 sm:$0xff]   ;;  %v11764_v58 = vpack.c.bf16 %v169_v31, %v169_v31  ;;  %v10221_v31 = vld [vmem:[#allocation2 + $0xba0] ss:$16 sps:$4 sm:$0xff]  }
 0x13e   :  { %6657 = vmatprep.subr.bf16.mxu0 %v10073_v57  ;;  %v10154_v57 = vld [vmem:[#allocation2 + $0x62c] ss:$16 sps:$4 sm:$0xff]  }
 0x140   :  { %7232 = vmatpush1.bf16.msra.mxu1 %v10074_v60  ;;  %v10152_v60 = vld [vmem:[#allocation2 + $0x628] ss:$16 sps:$4 sm:$0xff]  }
 0x141   :  { %6658 = vmatpush1.bf16.msra.mxu0 %v10071_v59  ;;  %7233 = vmatprep.subr.bf16.mxu1 %v10082_v61  ;;  %v10149_v59 = vld [vmem:[#allocation2 + $0xa20] ss:$16 sps:$4 sm:$0xff]  }
 0x142   :  { %6659 = vmatprep.subr.bf16.mxu0 %v10079_v51  ;;  %v10160_v51 = vld [vmem:[#allocation2 + $0x64c] ss:$16 sps:$4 sm:$0xff]   ;;  %v10155_v61 = vld [vmem:[#allocation2 + $0xa40] ss:$16 sps:$4 sm:$0xff]  }
 0x144   :  { %7234 = vmatpush1.bf16.msra.mxu1 %v10080_v63  ;;  %v10163_v63 = vld [vmem:[#allocation2 + $0xa64] ss:$16 sps:$4 sm:$0xff]  }
 0x145   :  { %6660 = vmatpush1.bf16.msra.mxu0 %v10077_v62  ;;  %7235 = vmatprep.subr.bf16.mxu1 %v10088_v1  ;;  %v10158_v62 = vld [vmem:[#allocation2 + $0x648] ss:$16 sps:$4 sm:$0xff]  }
 0x146   :  { %6661 = vmatprep.subr.bf16.mxu0 %v10085_v0  ;;  %v10161_v0 = vld [vmem:[#allocation2 + $0xa60] ss:$16 sps:$4 sm:$0xff]   ;;  %v10164_v1 = vld [vmem:[#allocation2 + $0x668] ss:$16 sps:$4 sm:$0xff]  }
 0x148   :  { %7236 = vmatpush1.bf16.msra.mxu1 %v10086_v4  ;;  %v10172_v4 = vld [vmem:[#allocation2 + $0x68c] ss:$16 sps:$4 sm:$0xff]  }
 0x149   :  { %6662 = vmatpush1.bf16.msra.mxu0 %v10083_v2  ;;  %7237 = vmatprep.subr.bf16.mxu1 %v10094_v6  ;;  %v10169_v2 = vld [vmem:[#allocation2 + $0xa84] ss:$16 sps:$4 sm:$0xff]  }
 0x14a   :  { %6663 = vmatprep.subr.bf16.mxu0 %v10091_v5  ;;  %v10167_v5 = vld [vmem:[#allocation2 + $0xa80] ss:$16 sps:$4 sm:$0xff]   ;;  %v10175_v6 = vld [vmem:[#allocation2 + $0xaa4] ss:$16 sps:$4 sm:$0xff]  }
 0x14c   :  { %7238 = vmatpush1.bf16.msra.mxu1 %v10092_v8  ;;  %v10173_v8 = vld [vmem:[#allocation2 + $0xaa0] ss:$16 sps:$4 sm:$0xff]  }
 0x14d   :  { %6664 = vmatpush1.bf16.msra.mxu0 %v10089_v7  ;;  %7239 = vmatprep.subr.bf16.mxu1 %v10100_v10  ;;  %v10178_v7 = vld [vmem:[#allocation2 + $0x6ac] ss:$16 sps:$4 sm:$0xff]   ;;  %v10181_v10 = vld [vmem:[#allocation2 + $0xac4] ss:$16 sps:$4 sm:$0xff]  }
 0x14e   :  { %6665 = vmatprep.subr.bf16.mxu0 %v10097_v9  ;;  %v10176_v9 = vld [vmem:[#allocation2 + $0x6a8] ss:$16 sps:$4 sm:$0xff]  }
 0x150   :  { %7240 = vmatpush1.bf16.msra.mxu1 %v10098_v12 }
 0x151   :  { %6666 = vmatpush1.bf16.msra.mxu0 %v10095_v11  ;;  %7241 = vmatprep.subr.bf16.mxu1 %v10106_v14  ;;  %v10184_v11 = vld [vmem:[#allocation2 + $0x6cc] ss:$16 sps:$4 sm:$0xff]  }
 0x152   :  { %6667 = vmatprep.subr.bf16.mxu0 %v10103_v13 }
 0x154   :  { %7242 = vmatpush1.bf16.msra.mxu1 %v10104_v17  ;;  %v10182_v17 = vld [vmem:[#allocation2 + $0x6c8] ss:$16 sps:$4 sm:$0xff]  }
 0x155   :  { %6668 = vmatpush1.bf16.msra.mxu0 %v10101_v15  ;;  %7243 = vmatprep.subr.bf16.mxu1 %v10112_v20  ;;  %v10179_v15 = vld [vmem:[#allocation2 + $0xac0] ss:$16 sps:$4 sm:$0xff]   ;;  %v10187_v20 = vld [vmem:[#allocation2 + $0xae4] ss:$16 sps:$4 sm:$0xff]  }
 0x156   :  { %6669 = vmatprep.subr.bf16.mxu0 %v10109_v19 }
 0x158   :  { %7244 = vmatpush1.bf16.msra.mxu1 %v10110_v22  ;;  %v10185_v22 = vld [vmem:[#allocation2 + $0xae0] ss:$16 sps:$4 sm:$0xff]  }
 0x159   :  { %6670 = vmatpush1.bf16.msra.mxu0 %v10107_v21  ;;  %7245 = vmatprep.subr.bf16.mxu1 %v10118_v25  ;;  %v10190_v21 = vld [vmem:[#allocation2 + $0x6ec] ss:$16 sps:$4 sm:$0xff]   ;;  %v10193_v25 = vld [vmem:[#allocation2 + $0xb04] ss:$16 sps:$4 sm:$0xff]  }
 0x15a   :  { %6671 = vmatprep.subr.bf16.mxu0 %v10115_v23  ;;  %v10188_v23 = vld [vmem:[#allocation2 + $0x6e8] ss:$16 sps:$4 sm:$0xff]  }
 0x15c   :  { %7246 = vmatpush1.bf16.msra.mxu1 %v10116_v27  ;;  %v10191_v27 = vld [vmem:[#allocation2 + $0xb00] ss:$16 sps:$4 sm:$0xff]  }
 0x15d   :  { %6672 = vmatpush1.bf16.msra.mxu0 %v10113_v26  ;;  %7247 = vmatprep.subr.bf16.mxu1 %v10124_v29  ;;  %v10196_v26 = vld [vmem:[#allocation2 + $0x70c] ss:$16 sps:$4 sm:$0xff]   ;;  %v10199_v29 = vld [vmem:[#allocation2 + $0xb24] ss:$16 sps:$4 sm:$0xff]  }
 0x15e   :  { %6673 = vmatprep.subr.bf16.mxu0 %v10121_v28  ;;  %v10194_v28 = vld [vmem:[#allocation2 + $0x708] ss:$16 sps:$4 sm:$0xff]  }
 0x160   :  { %7248 = vmatpush1.bf16.msra.mxu1 %v10122_v33  ;;  %v10197_v33 = vld [vmem:[#allocation2 + $0xb20] ss:$16 sps:$4 sm:$0xff]  }
 0x161   :  { %6674 = vmatpush1.bf16.msra.mxu0 %v10119_v32  ;;  %7249 = vmatprep.subr.bf16.mxu1 %v10130_v37  ;;  %v10202_v32 = vld [vmem:[#allocation2 + $0x72c] ss:$16 sps:$4 sm:$0xff]   ;;  %v10205_v37 = vld [vmem:[#allocation2 + $0xb44] ss:$16 sps:$4 sm:$0xff]  }
 0x162   :  { %6675 = vmatprep.subr.bf16.mxu0 %v10127_v34  ;;  %v10200_v34 = vld [vmem:[#allocation2 + $0x728] ss:$16 sps:$4 sm:$0xff]  }
 0x164   :  { %7250 = vmatpush1.bf16.msra.mxu1 %v10128_v39  ;;  %v10203_v39 = vld [vmem:[#allocation2 + $0xb40] ss:$16 sps:$4 sm:$0xff]  }
 0x165   :  { %6676 = vmatpush1.bf16.msra.mxu0 %v10125_v38  ;;  %7251 = vmatprep.subr.bf16.mxu1 %v10136_v41  ;;  %v10208_v38 = vld [vmem:[#allocation2 + $0x74c] ss:$16 sps:$4 sm:$0xff]   ;;  %v10211_v41 = vld [vmem:[#allocation2 + $0xb64] ss:$16 sps:$4 sm:$0xff]  }
 0x166   :  { %6677 = vmatprep.subr.bf16.mxu0 %v10133_v40  ;;  %v10206_v40 = vld [vmem:[#allocation2 + $0x748] ss:$16 sps:$4 sm:$0xff]  }
 0x168   :  { %7252 = vmatpush1.bf16.msra.mxu1 %v10134_v45  ;;  %v10212_v45 = vld [vmem:[#allocation2 + $0x768] ss:$16 sps:$4 sm:$0xff]  }
 0x169   :  { %6678 = vmatpush1.bf16.msra.mxu0 %v10131_v16  ;;  %7253 = vmatprep.subr.bf16.mxu1 %v10142_v48  ;;  %v10209_v16 = vld [vmem:[#allocation2 + $0xb60] ss:$16 sps:$4 sm:$0xff]   ;;  %v10220_v48 = vld [vmem:[#allocation2 + $0x78c] ss:$16 sps:$4 sm:$0xff]  }
 0x16a   :  { %6679 = vmatprep.subr.bf16.mxu0 %v10139_v46  ;;  %v10217_v46 = vld [vmem:[#allocation2 + $0xb84] ss:$16 sps:$4 sm:$0xff]  }
 0x16c   :  { %7254 = vmatpush1.bf16.msra.mxu1 %v10140_v24  ;;  %v10218_v24 = vld [vmem:[#allocation2 + $0x788] ss:$16 sps:$4 sm:$0xff]  }
 0x16d   :  { %6680 = vmatpush1.bf16.msra.mxu0 %v10137_v50  ;;  %7264 = vmatprep.subr.bf16.mxu1 %v10148_v53  ;;  %v10215_v50 = vld [vmem:[#allocation2 + $0xb80] ss:$16 sps:$4 sm:$0xff]   ;;  %v10226_v53 = vld [vmem:[#allocation2 + $0x7ac] ss:$16 sps:$4 sm:$0xff]  }
 0x16e   :  { %6690 = vmatprep.subr.bf16.mxu0 %v10145_v52  ;;  %v10223_v52 = vld [vmem:[#allocation2 + $0xba4] ss:$16 sps:$4 sm:$0xff]  }
 0x16f   :  { %7256 = vmatmul.mubr.bf16.vlgmr.msra.gmra.mrb[4].mxu1 %v11724_v30  ;;  %v10166_v30 = vld [vmem:[#allocation2 + $0x66c] ss:$16 sps:$4 sm:$0xff]  }
 0x170   :  { %6682 = vmatmul.mubr.bf16.vlgmr.msra.gmra.mrb[0].mxu0 %v11762_v18  ;;  %7265 = vmatpush1.bf16.msra.mxu1 %v10146_v55  ;;  %v10229_v55 = vld [vmem:[#allocation2 + $0xbc4] ss:$16 sps:$4 sm:$0xff]  }
 0x171   :  { %6691 = vmatpush1.bf16.msra.mxu0 %v10143_v54  ;;  %7266 = vmatprep.subr.bf16.mxu1 %v10154_v57  ;;  %v10224_v54 = vld [vmem:[#allocation2 + $0x7a8] ss:$16 sps:$4 sm:$0xff]  }
 0x172   :  { %6692 = vmatprep.subr.bf16.mxu0 %v10151_v56  ;;  %6722 = vmatprep.mubr.bf16.mxu0 %v11764_v58  ;;  %v10232_v56 = vld [vmem:[#allocation2 + $0x7cc] ss:$16 sps:$4 sm:$0xff]  }
 0x173   :  { %7296 = vmatprep.mubr.bf16.mxu1 %v11726_v35  ;;  %v10170_v35 = vld [vmem:[#allocation2 + $0x688] ss:$16 sps:$4 sm:$0xff]  }
 0x174   :  { %7267 = vmatpush1.bf16.msra.mxu1 %v10152_v60  ;;  %v11777_v57 = vld [vmem:[%s11997_s0 + $0x18] sm:$0xff] }
 0x175   :  { %6693 = vmatpush1.bf16.msra.mxu0 %v10149_v59  ;;  %7268 = vmatprep.subr.bf16.mxu1 %v10160_v51  ;;  %v10227_v59 = vld [vmem:[#allocation2 + $0xbc0] ss:$16 sps:$4 sm:$0xff]   ;;  %v10230_v60 = vld [vmem:[#allocation2 + $0x7c8] ss:$16 sps:$4 sm:$0xff]   ;;  %v10238_v51 = vld [vmem:[#allocation2 + $0x7ec] ss:$16 sps:$4 sm:$0xff]  }
 0x176   :  { %6694 = vmatprep.subr.bf16.mxu0 %v10157_v36  ;;  %v10235_v36 = vld [vmem:[#allocation2 + $0xbe4] ss:$16 sps:$4 sm:$0xff]  }
 0x178   :  { %7269 = vmatpush1.bf16.msra.mxu1 %v10158_v62  ;;  %v10233_v62 = vld [vmem:[#allocation2 + $0xbe0] ss:$16 sps:$4 sm:$0xff]  }
 0x179   :  { %6695 = vmatpush1.bf16.msra.mxu0 %v10155_v61  ;;  %7270 = vmatprep.subr.bf16.mxu1 %v10166_v30  ;;  %v11781_v61 = vrot.slane %v11777_v57, %v11685_v49  ;;  %v10242_v30 = vld [vmem:[#allocation2 + $0xc04] ss:$16 sps:$4 sm:$0xff]  }
 0x17a   :  { %6696 = vmatprep.subr.bf16.mxu0 %v10163_v63  ;;  %v10236_v63 = vld [vmem:[#allocation2 + $0x7e8] ss:$16 sps:$4 sm:$0xff]  }
 0x17c   :  { %7271 = vmatpush1.bf16.msra.mxu1 %v10164_v1  ;;  %v185_v1 = vcombine.high %v11781_v61, %v11781_v61 }
 0x17d   :  { %6697 = vmatpush1.bf16.msra.mxu0 %v10161_v0  ;;  %7272 = vmatprep.subr.bf16.mxu1 %v10172_v4  ;;  %v10245_v0 = vld [vmem:[#allocation2 + $0x80c] ss:$16 sps:$4 sm:$0xff]   ;;  %v10240_v4 = vld [vmem:[#allocation2 + $0xc00] ss:$16 sps:$4 sm:$0xff]  }
 0x17e   :  { %6698 = vmatprep.subr.bf16.mxu0 %v10169_v2  ;;  %v11787_v2 = vpack.c.bf16 %v11756_v3, %v11756_v3  ;;  %v10254_v3 = vld [vmem:[#allocation2 + $0xc44] ss:$16 sps:$4 sm:$0xff]  }
 0x180   :  { %7273 = vmatpush1.bf16.msra.mxu1 %v10170_v35  ;;  %v10248_v35 = vld [vmem:[#allocation2 + $0xc24] ss:$16 sps:$4 sm:$0xff]  }
 0x181   :  { %6699 = vmatpush1.bf16.msra.mxu0 %v10167_v5  ;;  %7274 = vmatprep.subr.bf16.mxu1 %v10178_v7  ;;  %v10243_v5 = vld [vmem:[#allocation2 + $0x808] ss:$16 sps:$4 sm:$0xff]   ;;  %v11789_v7 = vpack.c.bf16 %v185_v1, %v185_v1 }
 0x182   :  { %6700 = vmatprep.subr.bf16.mxu0 %v10175_v6  ;;  %v11770_v12 = vpop.f32.mrb[0].mxu1  ;;  %v10251_v6 = vld [vmem:[#allocation2 + $0x82c] ss:$16 sps:$4 sm:$0xff]   ;;  %v10321_v1 = vld [vmem:[#allocation2 + $0x9a8] ss:$16 sps:$4 sm:$0xff]  }
 0x183   :  { %v11772_v13 = vpop.f32.mrb[1].mxu1 }
 0x184   :  { %v6523_v14 = vpop.f32.mrb[2].mxu1  ;;  %7275 = vmatpush1.bf16.msra.mxu1 %v10176_v9  ;;  %v10249_v9 = vld [vmem:[#allocation2 + $0x828] ss:$16 sps:$4 sm:$0xff]  }
 0x185   :  { %6701 = vmatpush1.bf16.msra.mxu0 %v10173_v8  ;;  %v6524_v19 = vpop.f32.mrb[3].mxu1  ;;  %7276 = vmatprep.subr.bf16.mxu1 %v10184_v11  ;;  %v10246_v8 = vld [vmem:[#allocation2 + $0xc20] ss:$16 sps:$4 sm:$0xff]   ;;  %v10255_v14 = vld [vmem:[#allocation2 + $0x848] ss:$16 sps:$4 sm:$0xff]  }
 0x186   :  { %6702 = vmatprep.subr.bf16.mxu0 %v10181_v10  ;;  %v10257_v10 = vld [vmem:[#allocation2 + $0x84c] ss:$16 sps:$4 sm:$0xff]   ;;  %v10252_v11 = vld [vmem:[#allocation2 + $0xc40] ss:$16 sps:$4 sm:$0xff]   ;;  %v10261_v19 = vld [vmem:[#allocation2 + $0x868] ss:$16 sps:$4 sm:$0xff]  }
 0x188   :  { %7277 = vmatpush1.bf16.msra.mxu1 %v10182_v17  ;;  %v10258_v17 = vld [vmem:[#allocation2 + $0xc60] ss:$16 sps:$4 sm:$0xff]  }
 0x189   :  { %6703 = vmatpush1.bf16.msra.mxu0 %v10179_v15  ;;  %7278 = vmatprep.subr.bf16.mxu1 %v10190_v21  ;;  %v10260_v15 = vld [vmem:[#allocation2 + $0xc64] ss:$16 sps:$4 sm:$0xff]   ;;  %v10269_v21 = vld [vmem:[#allocation2 + $0x88c] ss:$16 sps:$4 sm:$0xff]  }
 0x18a   :  { %6704 = vmatprep.subr.bf16.mxu0 %v10187_v20  ;;  %v10266_v20 = vld [vmem:[#allocation2 + $0xc84] ss:$16 sps:$4 sm:$0xff]  }
 0x18c   :  { %7279 = vmatpush1.bf16.msra.mxu1 %v10188_v23  ;;  %v10272_v23 = vld [vmem:[#allocation2 + $0xca4] ss:$16 sps:$4 sm:$0xff]  }
 0x18d   :  { %6705 = vmatpush1.bf16.msra.mxu0 %v10185_v22  ;;  %7280 = vmatprep.subr.bf16.mxu1 %v10196_v26  ;;  %v10264_v22 = vld [vmem:[#allocation2 + $0xc80] ss:$16 sps:$4 sm:$0xff]  }
 0x18e   :  { %6706 = vmatprep.subr.bf16.mxu0 %v10193_v25  ;;  %v10275_v25 = vld [vmem:[#allocation2 + $0x8ac] ss:$16 sps:$4 sm:$0xff]   ;;  %v10270_v26 = vld [vmem:[#allocation2 + $0xca0] ss:$16 sps:$4 sm:$0xff]  }
 0x190   :  { %7281 = vmatpush1.bf16.msra.mxu1 %v10194_v28  ;;  %v10278_v28 = vld [vmem:[#allocation2 + $0xcc4] ss:$16 sps:$4 sm:$0xff]  }
 0x191   :  { %6707 = vmatpush1.bf16.msra.mxu0 %v10191_v27  ;;  %7282 = vmatprep.subr.bf16.mxu1 %v10202_v32  ;;  %v10273_v27 = vld [vmem:[#allocation2 + $0x8a8] ss:$16 sps:$4 sm:$0xff]   ;;  %v10276_v32 = vld [vmem:[#allocation2 + $0xcc0] ss:$16 sps:$4 sm:$0xff]  }
 0x192   :  { %6708 = vmatprep.subr.bf16.mxu0 %v10199_v29  ;;  %v10281_v29 = vld [vmem:[#allocation2 + $0x8cc] ss:$16 sps:$4 sm:$0xff]  }
 0x194   :  { %7283 = vmatpush1.bf16.msra.mxu1 %v10200_v34  ;;  %v10284_v34 = vld [vmem:[#allocation2 + $0xce4] ss:$16 sps:$4 sm:$0xff]  }
 0x195   :  { %6709 = vmatpush1.bf16.msra.mxu0 %v10197_v33  ;;  %7284 = vmatprep.subr.bf16.mxu1 %v10208_v38  ;;  %v10279_v33 = vld [vmem:[#allocation2 + $0x8c8] ss:$16 sps:$4 sm:$0xff]   ;;  %v10282_v38 = vld [vmem:[#allocation2 + $0xce0] ss:$16 sps:$4 sm:$0xff]  }
 0x196   :  { %6710 = vmatprep.subr.bf16.mxu0 %v10205_v37  ;;  %v10287_v37 = vld [vmem:[#allocation2 + $0x8ec] ss:$16 sps:$4 sm:$0xff]  }
 0x198   :  { %7285 = vmatpush1.bf16.msra.mxu1 %v10206_v40  ;;  %v10290_v40 = vld [vmem:[#allocation2 + $0xd04] ss:$16 sps:$4 sm:$0xff]  }
 0x199   :  { %6711 = vmatpush1.bf16.msra.mxu0 %v10203_v39  ;;  %7286 = vmatprep.subr.bf16.mxu1 %v10214_v42  ;;  %v10285_v39 = vld [vmem:[#allocation2 + $0x8e8] ss:$16 sps:$4 sm:$0xff]   ;;  %v10288_v42 = vld [vmem:[#allocation2 + $0xd00] ss:$16 sps:$4 sm:$0xff]  }
 0x19a   :  { %6712 = vmatprep.subr.bf16.mxu0 %v10211_v41  ;;  %v10293_v41 = vld [vmem:[#allocation2 + $0x90c] ss:$16 sps:$4 sm:$0xff]  }
 0x19c   :  { %7287 = vmatpush1.bf16.msra.mxu1 %v10212_v45  ;;  %v10296_v45 = vld [vmem:[#allocation2 + $0xd24] ss:$16 sps:$4 sm:$0xff]  }
 0x19d   :  { %6713 = vmatpush1.bf16.msra.mxu0 %v10209_v16  ;;  %7288 = vmatprep.subr.bf16.mxu1 %v10220_v48  ;;  %v10291_v16 = vld [vmem:[#allocation2 + $0x908] ss:$16 sps:$4 sm:$0xff]   ;;  %v10294_v48 = vld [vmem:[#allocation2 + $0xd20] ss:$16 sps:$4 sm:$0xff]  }
 0x19e   :  { %6714 = vmatprep.subr.bf16.mxu0 %v10217_v46  ;;  %v10299_v46 = vld [vmem:[#allocation2 + $0x92c] ss:$16 sps:$4 sm:$0xff]  }
 0x1a0   :  { %7289 = vmatpush1.bf16.msra.mxu1 %v10218_v24  ;;  %v10302_v24 = vld [vmem:[#allocation2 + $0xd44] ss:$16 sps:$4 sm:$0xff]  }
 0x1a1   :  { %6715 = vmatpush1.bf16.msra.mxu0 %v10215_v50  ;;  %7290 = vmatprep.subr.bf16.mxu1 %v10226_v53  ;;  %v10297_v50 = vld [vmem:[#allocation2 + $0x928] ss:$16 sps:$4 sm:$0xff]   ;;  %v10300_v53 = vld [vmem:[#allocation2 + $0xd40] ss:$16 sps:$4 sm:$0xff]  }
 0x1a2   :  { %6716 = vmatprep.subr.bf16.mxu0 %v10223_v52  ;;  %v10305_v52 = vld [vmem:[#allocation2 + $0x94c] ss:$16 sps:$4 sm:$0xff]  }
 0x1a4   :  { %7291 = vmatpush1.bf16.msra.mxu1 %v10224_v54  ;;  %v10308_v54 = vld [vmem:[#allocation2 + $0xd64] ss:$16 sps:$4 sm:$0xff]  }
 0x1a5   :  { %6717 = vmatpush1.bf16.msra.mxu0 %v10221_v31  ;;  %7292 = vmatprep.subr.bf16.mxu1 %v10232_v56  ;;  %v10303_v31 = vld [vmem:[#allocation2 + $0x948] ss:$16 sps:$4 sm:$0xff]   ;;  %v10306_v56 = vld [vmem:[#allocation2 + $0xd60] ss:$16 sps:$4 sm:$0xff]  }
 0x1a6   :  { %6718 = vmatprep.subr.bf16.mxu0 %v10229_v55  ;;  %v10311_v55 = vld [vmem:[#allocation2 + $0x96c] ss:$16 sps:$4 sm:$0xff]  }
 0x1a8   :  { %7293 = vmatpush1.bf16.msra.mxu1 %v10230_v60  ;;  %v10314_v60 = vld [vmem:[#allocation2 + $0xd84] ss:$16 sps:$4 sm:$0xff]  }
 0x1a9   :  { %6719 = vmatpush1.bf16.msra.mxu0 %v10227_v59  ;;  %7294 = vmatprep.subr.bf16.mxu1 %v10238_v51  ;;  %v10309_v59 = vld [vmem:[#allocation2 + $0x968] ss:$16 sps:$4 sm:$0xff]   ;;  %v10312_v51 = vld [vmem:[#allocation2 + $0xd80] ss:$16 sps:$4 sm:$0xff]  }
 0x1aa   :  { %6720 = vmatprep.subr.bf16.mxu0 %v10235_v36  ;;  %v10317_v36 = vld [vmem:[#allocation2 + $0x98c] ss:$16 sps:$4 sm:$0xff]  }
 0x1ac   :  { %7295 = vmatpush1.bf16.msra.mxu1 %v10236_v63  ;;  %v10320_v63 = vld [vmem:[#allocation2 + $0xda4] ss:$16 sps:$4 sm:$0xff]  }
 0x1ad   :  { %6721 = vmatpush1.bf16.msra.mxu0 %v10233_v62  ;;  %7305 = vmatprep.subr.bf16.mxu1 %v10245_v0  ;;  %v10315_v62 = vld [vmem:[#allocation2 + $0x988] ss:$16 sps:$4 sm:$0xff]   ;;  %v10318_v0 = vld [vmem:[#allocation2 + $0xda0] ss:$16 sps:$4 sm:$0xff]  }
 0x1ae   :  { %6731 = vmatprep.subr.bf16.mxu0 %v10242_v30  ;;  %v10323_v30 = vld [vmem:[#allocation2 + $0x9ac] ss:$16 sps:$4 sm:$0xff]  }
 0x1af   :  { %7297 = vmatmul.mubr.bf16.vlgmr.msra.gmra.mrb[4].mxu1 %v11745_v44  ;;  %v10263_v44 = vld [vmem:[#allocation2 + $0x86c] ss:$16 sps:$4 sm:$0xff]  }
 0x1b0   :  { %6723 = vmatmul.mubr.bf16.vlgmr.msra.gmra.mrb[0].mxu0 %v11787_v2  ;;  %7306 = vmatpush1.bf16.msra.mxu1 %v10243_v5  ;;  %v10329_v5 = vld [vmem:[#allocation2 + $0x9cc] ss:$16 sps:$4 sm:$0xff]  }
 0x1b1   :  { %6732 = vmatpush1.bf16.msra.mxu0 %v10240_v4  ;;  %7307 = vmatprep.subr.bf16.mxu1 %v10251_v6  ;;  %v10326_v4 = vld [vmem:[#allocation2 + $0xdc4] ss:$16 sps:$4 sm:$0xff]   ;;  %v10324_v6 = vld [vmem:[#allocation2 + $0xdc0] ss:$16 sps:$4 sm:$0xff]  }
 0x1b2   :  { %6733 = vmatprep.subr.bf16.mxu0 %v10248_v35  ;;  %6763 = vmatprep.mubr.bf16.mxu0 %v11789_v7  ;;  %v170_v35 = vcombine.high %v11777_v57, %v11777_v57 }
 0x1b3   :  { %7337 = vmatprep.mubr.bf16.mxu1 %v11747_v47  ;;  %v10267_v47 = vld [vmem:[#allocation2 + $0x888] ss:$16 sps:$4 sm:$0xff]  }
 0x1b4   :  { %7308 = vmatpush1.bf16.msra.mxu1 %v10249_v9  ;;  %v10332_v9 = vld [vmem:[#allocation2 + $0xde4] ss:$16 sps:$4 sm:$0xff]  }
 0x1b5   :  { %6734 = vmatpush1.bf16.msra.mxu0 %v10246_v8  ;;  %7309 = vmatprep.subr.bf16.mxu1 %v10257_v10  ;;  %v10327_v8 = vld [vmem:[#allocation2 + $0x9c8] ss:$16 sps:$4 sm:$0xff]   ;;  %v11798_v10 = vrot.slane %v170_v35, %v11685_v49 }
 0x1b6   :  { %6735 = vmatprep.subr.bf16.mxu0 %v10254_v3  ;;  %v10335_v3 = vld [vmem:[#allocation2 + $0x9ec] ss:$16 sps:$4 sm:$0xff]   ;;  %v10405_v35 = vld [vmem:[#allocation2 + $0xb68] ss:$16 sps:$4 sm:$0xff]  }
 0x1b7   :  { %v186_v57 = vcombine.high %v11798_v10, %v11798_v10 }
 0x1b8   :  { %7310 = vmatpush1.bf16.msra.mxu1 %v10255_v14  ;;  %v10333_v14 = vld [vmem:[#allocation2 + $0x9e8] ss:$16 sps:$4 sm:$0xff]  }
 0x1b9   :  { %6736 = vmatpush1.bf16.msra.mxu0 %v10252_v11  ;;  %7311 = vmatprep.subr.bf16.mxu1 %v10263_v44  ;;  %v10330_v11 = vld [vmem:[#allocation2 + $0xde0] ss:$16 sps:$4 sm:$0xff]   ;;  %v10341_v44 = vld [vmem:[#allocation2 + $0xa0c] ss:$16 sps:$4 sm:$0xff]  }
 0x1ba   :  { %6737 = vmatprep.subr.bf16.mxu0 %v10260_v15  ;;  %v10338_v15 = vld [vmem:[#allocation2 + $0xe04] ss:$16 sps:$4 sm:$0xff]  }
 0x1bc   :  { %7312 = vmatpush1.bf16.msra.mxu1 %v10261_v19  ;;  %v10336_v19 = vld [vmem:[#allocation2 + $0xe00] ss:$16 sps:$4 sm:$0xff]  }
 0x1bd   :  { %6738 = vmatpush1.bf16.msra.mxu0 %v10258_v17  ;;  %7313 = vmatprep.subr.bf16.mxu1 %v10269_v21  ;;  %v11804_v17 = vpack.c.bf16 %v11781_v61, %v11781_v61  ;;  %v10344_v21 = vld [vmem:[#allocation2 + $0xe24] ss:$16 sps:$4 sm:$0xff]  }
 0x1be   :  { %6739 = vmatprep.subr.bf16.mxu0 %v10266_v20  ;;  %v10339_v20 = vld [vmem:[#allocation2 + $0xa08] ss:$16 sps:$4 sm:$0xff]   ;;  %v10350_v61 = vld [vmem:[#allocation2 + $0xe44] ss:$16 sps:$4 sm:$0xff]  }
 0x1c0   :  { %7314 = vmatpush1.bf16.msra.mxu1 %v10267_v47  ;;  %v11806_v47 = vpack.c.bf16 %v186_v57, %v186_v57  ;;  %v10422_v57 = vld [vmem:[#allocation2 + $0xfc4] ss:$16 sps:$4 sm:$0xff]  }
 0x1c1   :  { %6740 = vmatpush1.bf16.msra.mxu0 %v10264_v22  ;;  %7315 = vmatprep.subr.bf16.mxu1 %v10275_v25  ;;  %v10347_v22 = vld [vmem:[#allocation2 + $0xa2c] ss:$16 sps:$4 sm:$0xff]   ;;  %v10345_v25 = vld [vmem:[#allocation2 + $0xa28] ss:$16 sps:$4 sm:$0xff]  }
 0x1c2   :  { %6741 = vmatprep.subr.bf16.mxu0 %v10272_v23  ;;  %v10342_v23 = vld [vmem:[#allocation2 + $0xe20] ss:$16 sps:$4 sm:$0xff]  }
 0x1c4   :  { %7316 = vmatpush1.bf16.msra.mxu1 %v10273_v27  ;;  %v10348_v27 = vld [vmem:[#allocation2 + $0xe40] ss:$16 sps:$4 sm:$0xff]  }
 0x1c5   :  { %6742 = vmatpush1.bf16.msra.mxu0 %v10270_v26  ;;  %7317 = vmatprep.subr.bf16.mxu1 %v10281_v29  ;;  %v10353_v26 = vld [vmem:[#allocation2 + $0xa4c] ss:$16 sps:$4 sm:$0xff]   ;;  %v10356_v29 = vld [vmem:[#allocation2 + $0xe64] ss:$16 sps:$4 sm:$0xff]  }
 0x1c6   :  { %6743 = vmatprep.subr.bf16.mxu0 %v10278_v28  ;;  %v10351_v28 = vld [vmem:[#allocation2 + $0xa48] ss:$16 sps:$4 sm:$0xff]  }
 0x1c8   :  { %7318 = vmatpush1.bf16.msra.mxu1 %v10279_v33  ;;  %v10357_v33 = vld [vmem:[#allocation2 + $0xa68] ss:$16 sps:$4 sm:$0xff]  }
 0x1c9   :  { %6744 = vmatpush1.bf16.msra.mxu0 %v10276_v32  ;;  %7319 = vmatprep.subr.bf16.mxu1 %v10287_v37  ;;  %v10354_v32 = vld [vmem:[#allocation2 + $0xe60] ss:$16 sps:$4 sm:$0xff]   ;;  %v10365_v37 = vld [vmem:[#allocation2 + $0xa8c] ss:$16 sps:$4 sm:$0xff]  }
 0x1ca   :  { %6745 = vmatprep.subr.bf16.mxu0 %v10284_v34  ;;  %v10362_v34 = vld [vmem:[#allocation2 + $0xe84] ss:$16 sps:$4 sm:$0xff]  }
 0x1cc   :  { %7320 = vmatpush1.bf16.msra.mxu1 %v10285_v39  ;;  %v10368_v39 = vld [vmem:[#allocation2 + $0xea4] ss:$16 sps:$4 sm:$0xff]  }
 0x1cd   :  { %6746 = vmatpush1.bf16.msra.mxu0 %v10282_v38  ;;  %7321 = vmatprep.subr.bf16.mxu1 %v10293_v41  ;;  %v10360_v38 = vld [vmem:[#allocation2 + $0xe80] ss:$16 sps:$4 sm:$0xff]  }
 0x1ce   :  { %6747 = vmatprep.subr.bf16.mxu0 %v10290_v40  ;;  %v10371_v40 = vld [vmem:[#allocation2 + $0xaac] ss:$16 sps:$4 sm:$0xff]   ;;  %v10366_v41 = vld [vmem:[#allocation2 + $0xea0] ss:$16 sps:$4 sm:$0xff]  }
 0x1d0   :  { %7322 = vmatpush1.bf16.msra.mxu1 %v10291_v16  ;;  %v10374_v16 = vld [vmem:[#allocation2 + $0xec4] ss:$16 sps:$4 sm:$0xff]  }
 0x1d1   :  { %6748 = vmatpush1.bf16.msra.mxu0 %v10288_v42  ;;  %7323 = vmatprep.subr.bf16.mxu1 %v10299_v46  ;;  %v10369_v42 = vld [vmem:[#allocation2 + $0xaa8] ss:$16 sps:$4 sm:$0xff]   ;;  %v10372_v46 = vld [vmem:[#allocation2 + $0xec0] ss:$16 sps:$4 sm:$0xff]  }
 0x1d2   :  { %6749 = vmatprep.subr.bf16.mxu0 %v10296_v45  ;;  %v10377_v45 = vld [vmem:[#allocation2 + $0xacc] ss:$16 sps:$4 sm:$0xff]  }
 0x1d4   :  { %7324 = vmatpush1.bf16.msra.mxu1 %v10297_v50  ;;  %v10380_v50 = vld [vmem:[#allocation2 + $0xee4] ss:$16 sps:$4 sm:$0xff]  }
 0x1d5   :  { %6750 = vmatpush1.bf16.msra.mxu0 %v10294_v48  ;;  %7325 = vmatprep.subr.bf16.mxu1 %v10305_v52  ;;  %v10375_v48 = vld [vmem:[#allocation2 + $0xac8] ss:$16 sps:$4 sm:$0xff]   ;;  %v10378_v52 = vld [vmem:[#allocation2 + $0xee0] ss:$16 sps:$4 sm:$0xff]  }
 0x1d6   :  { %6751 = vmatprep.subr.bf16.mxu0 %v10302_v24  ;;  %v10383_v24 = vld [vmem:[#allocation2 + $0xaec] ss:$16 sps:$4 sm:$0xff]  }
 0x1d8   :  { %7326 = vmatpush1.bf16.msra.mxu1 %v10303_v31  ;;  %v10386_v31 = vld [vmem:[#allocation2 + $0xf04] ss:$16 sps:$4 sm:$0xff]  }
 0x1d9   :  { %6752 = vmatpush1.bf16.msra.mxu0 %v10300_v53  ;;  %7327 = vmatprep.subr.bf16.mxu1 %v10311_v55  ;;  %v10381_v53 = vld [vmem:[#allocation2 + $0xae8] ss:$16 sps:$4 sm:$0xff]   ;;  %v10384_v55 = vld [vmem:[#allocation2 + $0xf00] ss:$16 sps:$4 sm:$0xff]  }
 0x1da   :  { %6753 = vmatprep.subr.bf16.mxu0 %v10308_v54  ;;  %v10389_v54 = vld [vmem:[#allocation2 + $0xb0c] ss:$16 sps:$4 sm:$0xff]  }
 0x1dc   :  { %7328 = vmatpush1.bf16.msra.mxu1 %v10309_v59  ;;  %v10392_v59 = vld [vmem:[#allocation2 + $0xf24] ss:$16 sps:$4 sm:$0xff]  }
 0x1dd   :  { %6754 = vmatpush1.bf16.msra.mxu0 %v10306_v56  ;;  %7329 = vmatprep.subr.bf16.mxu1 %v10317_v36  ;;  %v10387_v56 = vld [vmem:[#allocation2 + $0xb08] ss:$16 sps:$4 sm:$0xff]   ;;  %v10390_v36 = vld [vmem:[#allocation2 + $0xf20] ss:$16 sps:$4 sm:$0xff]  }
 0x1de   :  { %6755 = vmatprep.subr.bf16.mxu0 %v10314_v60  ;;  %v10395_v60 = vld [vmem:[#allocation2 + $0xb2c] ss:$16 sps:$4 sm:$0xff]  }
 0x1e0   :  { %7330 = vmatpush1.bf16.msra.mxu1 %v10315_v62  ;;  %v10398_v62 = vld [vmem:[#allocation2 + $0xf44] ss:$16 sps:$4 sm:$0xff]  }
 0x1e1   :  { %6756 = vmatpush1.bf16.msra.mxu0 %v10312_v51  ;;  %7331 = vmatprep.subr.bf16.mxu1 %v10323_v30  ;;  %v10393_v51 = vld [vmem:[#allocation2 + $0xb28] ss:$16 sps:$4 sm:$0xff]   ;;  %v10396_v30 = vld [vmem:[#allocation2 + $0xf40] ss:$16 sps:$4 sm:$0xff]  }
 0x1e2   :  { %6757 = vmatprep.subr.bf16.mxu0 %v10320_v63  ;;  %v10401_v63 = vld [vmem:[#allocation2 + $0xb4c] ss:$16 sps:$4 sm:$0xff]  }
 0x1e4   :  { %7332 = vmatpush1.bf16.msra.mxu1 %v10321_v1  ;;  %v10404_v1 = vld [vmem:[#allocation2 + $0xf64] ss:$16 sps:$4 sm:$0xff]  }
 0x1e5   :  { %6758 = vmatpush1.bf16.msra.mxu0 %v10318_v0  ;;  %7333 = vmatprep.subr.bf16.mxu1 %v10329_v5  ;;  %v10399_v0 = vld [vmem:[#allocation2 + $0xb48] ss:$16 sps:$4 sm:$0xff]   ;;  %v10402_v5 = vld [vmem:[#allocation2 + $0xf60] ss:$16 sps:$4 sm:$0xff]  }
 0x1e6   :  { %6759 = vmatprep.subr.bf16.mxu0 %v10326_v4  ;;  %v10407_v4 = vld [vmem:[#allocation2 + $0xb6c] ss:$16 sps:$4 sm:$0xff]  }
 0x1e8   :  { %7334 = vmatpush1.bf16.msra.mxu1 %v10327_v8  ;;  %v10413_v8 = vld [vmem:[#allocation2 + $0xb8c] ss:$16 sps:$4 sm:$0xff]  }
 0x1e9   :  { %6760 = vmatpush1.bf16.msra.mxu0 %v10324_v6  ;;  %7335 = vmatprep.subr.bf16.mxu1 %v10335_v3  ;;  %v10410_v6 = vld [vmem:[#allocation2 + $0xf84] ss:$16 sps:$4 sm:$0xff]   ;;  %v10411_v3 = vld [vmem:[#allocation2 + $0xb88] ss:$16 sps:$4 sm:$0xff]  }
 0x1ea   :  { %6761 = vmatprep.subr.bf16.mxu0 %v10332_v9  ;;  %v10408_v9 = vld [vmem:[#allocation2 + $0xf80] ss:$16 sps:$4 sm:$0xff]  }
 0x1ec   :  { %7336 = vmatpush1.bf16.msra.mxu1 %v10333_v14  ;;  %v10419_v14 = vld [vmem:[#allocation2 + $0xbac] ss:$16 sps:$4 sm:$0xff]  }
 0x1ed   :  { %6762 = vmatpush1.bf16.msra.mxu0 %v10330_v11  ;;  %7346 = vmatprep.subr.bf16.mxu1 %v10341_v44  ;;  %v10416_v11 = vld [vmem:[#allocation2 + $0xfa4] ss:$16 sps:$4 sm:$0xff]   ;;  %v10417_v44 = vld [vmem:[#allocation2 + $0xba8] ss:$16 sps:$4 sm:$0xff]  }
 0x1ee   :  { %6772 = vmatprep.subr.bf16.mxu0 %v10338_v15  ;;  %v10414_v15 = vld [vmem:[#allocation2 + $0xfa0] ss:$16 sps:$4 sm:$0xff]  }
 0x1ef   :  { %7338 = vmatmul.mubr.bf16.vlgmr.msra.gmra.mrb[4].mxu1 %v11762_v18  ;;  %v10359_v18 = vld [vmem:[#allocation2 + $0xa6c] ss:$16 sps:$4 sm:$0xff]  }
 0x1f0   :  { %6764 = vmatmul.mubr.bf16.vlgmr.msra.gmra.mrb[0].mxu0 %v11804_v17  ;;  %7347 = vmatpush1.bf16.msra.mxu1 %v10339_v20  ;;  %v11815_v20 = vld [vmem:[%s11997_s0 + $0x20] sm:$0xff] }
 0x1f1   :  { %6773 = vmatpush1.bf16.msra.mxu0 %v10336_v19  ;;  %7348 = vmatprep.subr.bf16.mxu1 %v10347_v22  ;;  %v10425_v19 = vld [vmem:[#allocation2 + $0xbcc] ss:$16 sps:$4 sm:$0xff]   ;;  %v10423_v22 = vld [vmem:[#allocation2 + $0xbc8] ss:$16 sps:$4 sm:$0xff]  }
 0x1f2   :  { %6774 = vmatprep.subr.bf16.mxu0 %v10344_v21  ;;  %6804 = vmatprep.mubr.bf16.mxu0 %v11806_v47  ;;  %v10420_v21 = vld [vmem:[#allocation2 + $0xfc0] ss:$16 sps:$4 sm:$0xff]  }
 0x1f3   :  { %7378 = vmatprep.mubr.bf16.mxu1 %v11764_v58  ;;  %v10363_v58 = vld [vmem:[#allocation2 + $0xa88] ss:$16 sps:$4 sm:$0xff]  }
 0x1f4   :  { %7349 = vmatpush1.bf16.msra.mxu1 %v10345_v25  ;;  %v10431_v25 = vld [vmem:[#allocation2 + $0xbec] ss:$16 sps:$4 sm:$0xff]  }
 0x1f5   :  { %6775 = vmatpush1.bf16.msra.mxu0 %v10342_v23  ;;  %7350 = vmatprep.subr.bf16.mxu1 %v10353_v26  ;;  %v10428_v23 = vld [vmem:[#allocation2 + $0xfe4] ss:$16 sps:$4 sm:$0xff]   ;;  %v10426_v26 = vld [vmem:[#allocation2 + $0xfe0] ss:$16 sps:$4 sm:$0xff]  }
 0x1f6   :  { %6776 = vmatprep.subr.bf16.mxu0 %v10350_v61  ;;  %v11819_v61 = vrot.slane %v11815_v20, %v11685_v49 }
 0x1f8   :  { %7351 = vmatpush1.bf16.msra.mxu1 %v10351_v28  ;;  %v10435_v28 = vld [vmem:[#allocation2 + $0x1004] ss:$16 sps:$4 sm:$0xff]  }
 0x1f9   :  { %6777 = vmatpush1.bf16.msra.mxu0 %v10348_v27  ;;  %7352 = vmatprep.subr.bf16.mxu1 %v10359_v18  ;;  %v10429_v27 = vld [vmem:[#allocation2 + $0xbe8] ss:$16 sps:$4 sm:$0xff]   ;;  %v202_v18 = vcombine.high %v11819_v61, %v11819_v61 }
 0x1fa   :  { %6778 = vmatprep.subr.bf16.mxu0 %v10356_v29  ;;  %v10438_v29 = vld [vmem:[#allocation2 + $0xc0c] ss:$16 sps:$4 sm:$0xff]  }
 0x1fc   :  { %7353 = vmatpush1.bf16.msra.mxu1 %v10357_v33  ;;  %v10433_v33 = vld [vmem:[#allocation2 + $0x1000] ss:$16 sps:$4 sm:$0xff]  }
 0x1fd   :  { %6779 = vmatpush1.bf16.msra.mxu0 %v10354_v32  ;;  %7354 = vmatprep.subr.bf16.mxu1 %v10365_v37  ;;  %v11825_v32 = vpack.c.bf16 %v11798_v10, %v11798_v10  ;;  %v10441_v37 = vld [vmem:[#allocation2 + $0x1024] ss:$16 sps:$4 sm:$0xff]  }
 0x1fe   :  { %6780 = vmatprep.subr.bf16.mxu0 %v10362_v34  ;;  %v10436_v34 = vld [vmem:[#allocation2 + $0xc08] ss:$16 sps:$4 sm:$0xff]   ;;  %v10447_v10 = vld [vmem:[#allocation2 + $0x1044] ss:$16 sps:$4 sm:$0xff]  }
 0x200   :  { %7355 = vmatpush1.bf16.msra.mxu1 %v10363_v58  ;;  %v11827_v58 = vpack.c.bf16 %v202_v18, %v202_v18  ;;  %v10514_v18 = vld [vmem:[#allocation2 + $0xda8] ss:$16 sps:$4 sm:$0xff]  }
 0x201   :  { %6781 = vmatpush1.bf16.msra.mxu0 %v10360_v38  ;;  %7356 = vmatprep.subr.bf16.mxu1 %v10371_v40  ;;  %v10444_v38 = vld [vmem:[#allocation2 + $0xc2c] ss:$16 sps:$4 sm:$0xff]   ;;  %v10442_v40 = vld [vmem:[#allocation2 + $0xc28] ss:$16 sps:$4 sm:$0xff]  }
 0x202   :  { %6782 = vmatprep.subr.bf16.mxu0 %v10368_v39  ;;  %v10439_v39 = vld [vmem:[#allocation2 + $0x1020] ss:$16 sps:$4 sm:$0xff]  }
 0x204   :  { %7357 = vmatpush1.bf16.msra.mxu1 %v10369_v42  ;;  %v10445_v42 = vld [vmem:[#allocation2 + $0x1040] ss:$16 sps:$4 sm:$0xff]  }
 0x205   :  { %6783 = vmatpush1.bf16.msra.mxu0 %v10366_v41  ;;  %7358 = vmatprep.subr.bf16.mxu1 %v10377_v45  ;;  %v10450_v41 = vld [vmem:[#allocation2 + $0xc4c] ss:$16 sps:$4 sm:$0xff]   ;;  %v10453_v45 = vld [vmem:[#allocation2 + $0x1064] ss:$16 sps:$4 sm:$0xff]  }
 0x206   :  { %6784 = vmatprep.subr.bf16.mxu0 %v10374_v16  ;;  %v10448_v16 = vld [vmem:[#allocation2 + $0xc48] ss:$16 sps:$4 sm:$0xff]  }
 0x208   :  { %7359 = vmatpush1.bf16.msra.mxu1 %v10375_v48  ;;  %v10454_v48 = vld [vmem:[#allocation2 + $0xc68] ss:$16 sps:$4 sm:$0xff]  }
 0x209   :  { %6785 = vmatpush1.bf16.msra.mxu0 %v10372_v46  ;;  %7360 = vmatprep.subr.bf16.mxu1 %v10383_v24  ;;  %v10451_v46 = vld [vmem:[#allocation2 + $0x1060] ss:$16 sps:$4 sm:$0xff]   ;;  %v10462_v24 = vld [vmem:[#allocation2 + $0xc8c] ss:$16 sps:$4 sm:$0xff]  }
 0x20a   :  { %6786 = vmatprep.subr.bf16.mxu0 %v10380_v50  ;;  %v10459_v50 = vld [vmem:[#allocation2 + $0x1084] ss:$16 sps:$4 sm:$0xff]  }
 0x20c   :  { %7361 = vmatpush1.bf16.msra.mxu1 %v10381_v53  ;;  %v10465_v53 = vld [vmem:[#allocation2 + $0x10a4] ss:$16 sps:$4 sm:$0xff]  }
 0x20d   :  { %6787 = vmatpush1.bf16.msra.mxu0 %v10378_v52  ;;  %7362 = vmatprep.subr.bf16.mxu1 %v10389_v54  ;;  %v10457_v52 = vld [vmem:[#allocation2 + $0x1080] ss:$16 sps:$4 sm:$0xff]  }
 0x20e   :  { %6788 = vmatprep.subr.bf16.mxu0 %v10386_v31  ;;  %v10468_v31 = vld [vmem:[#allocation2 + $0xcac] ss:$16 sps:$4 sm:$0xff]   ;;  %v10463_v54 = vld [vmem:[#allocation2 + $0x10a0] ss:$16 sps:$4 sm:$0xff]  }
 0x210   :  { %7363 = vmatpush1.bf16.msra.mxu1 %v10387_v56  ;;  %v10471_v56 = vld [vmem:[#allocation2 + $0x10c4] ss:$16 sps:$4 sm:$0xff]  }
 0x211   :  { %6789 = vmatpush1.bf16.msra.mxu0 %v10384_v55  ;;  %7364 = vmatprep.subr.bf16.mxu1 %v10395_v60  ;;  %v10466_v55 = vld [vmem:[#allocation2 + $0xca8] ss:$16 sps:$4 sm:$0xff]   ;;  %v10469_v60 = vld [vmem:[#allocation2 + $0x10c0] ss:$16 sps:$4 sm:$0xff]  }
 0x212   :  { %6790 = vmatprep.subr.bf16.mxu0 %v10392_v59  ;;  %v10474_v59 = vld [vmem:[#allocation2 + $0xccc] ss:$16 sps:$4 sm:$0xff]  }
 0x214   :  { %7365 = vmatpush1.bf16.msra.mxu1 %v10393_v51  ;;  %v10477_v51 = vld [vmem:[#allocation2 + $0x10e4] ss:$16 sps:$4 sm:$0xff]  }
 0x215   :  { %6791 = vmatpush1.bf16.msra.mxu0 %v10390_v36  ;;  %7366 = vmatprep.subr.bf16.mxu1 %v10401_v63  ;;  %v10472_v36 = vld [vmem:[#allocation2 + $0xcc8] ss:$16 sps:$4 sm:$0xff]   ;;  %v10475_v63 = vld [vmem:[#allocation2 + $0x10e0] ss:$16 sps:$4 sm:$0xff]  }
 0x216   :  { %6792 = vmatprep.subr.bf16.mxu0 %v10398_v62  ;;  %v10480_v62 = vld [vmem:[#allocation2 + $0xcec] ss:$16 sps:$4 sm:$0xff]  }
 0x218   :  { %7367 = vmatpush1.bf16.msra.mxu1 %v10399_v0  ;;  %v10483_v0 = vld [vmem:[#allocation2 + $0x1104] ss:$16 sps:$4 sm:$0xff]  }
 0x219   :  { %6793 = vmatpush1.bf16.msra.mxu0 %v10396_v30  ;;  %7368 = vmatprep.subr.bf16.mxu1 %v10407_v4  ;;  %v10478_v30 = vld [vmem:[#allocation2 + $0xce8] ss:$16 sps:$4 sm:$0xff]   ;;  %v10481_v4 = vld [vmem:[#allocation2 + $0x1100] ss:$16 sps:$4 sm:$0xff]  }
 0x21a   :  { %6794 = vmatprep.subr.bf16.mxu0 %v10404_v1  ;;  %v10486_v1 = vld [vmem:[#allocation2 + $0xd0c] ss:$16 sps:$4 sm:$0xff]  }
 0x21c   :  { %7369 = vmatpush1.bf16.msra.mxu1 %v10405_v35  ;;  %v10489_v35 = vld [vmem:[#allocation2 + $0x1124] ss:$16 sps:$4 sm:$0xff]  }
 0x21d   :  { %6795 = vmatpush1.bf16.msra.mxu0 %v10402_v5  ;;  %7370 = vmatprep.subr.bf16.mxu1 %v10413_v8  ;;  %v10484_v5 = vld [vmem:[#allocation2 + $0xd08] ss:$16 sps:$4 sm:$0xff]   ;;  %v10487_v8 = vld [vmem:[#allocation2 + $0x1120] ss:$16 sps:$4 sm:$0xff]  }
 0x21e   :  { %6796 = vmatprep.subr.bf16.mxu0 %v10410_v6  ;;  %v10492_v6 = vld [vmem:[#allocation2 + $0xd2c] ss:$16 sps:$4 sm:$0xff]  }
 0x220   :  { %7371 = vmatpush1.bf16.msra.mxu1 %v10411_v3  ;;  %v10495_v3 = vld [vmem:[#allocation2 + $0x1144] ss:$16 sps:$4 sm:$0xff]  }
 0x221   :  { %6797 = vmatpush1.bf16.msra.mxu0 %v10408_v9  ;;  %7372 = vmatprep.subr.bf16.mxu1 %v10419_v14  ;;  %v10490_v9 = vld [vmem:[#allocation2 + $0xd28] ss:$16 sps:$4 sm:$0xff]   ;;  %v10493_v14 = vld [vmem:[#allocation2 + $0x1140] ss:$16 sps:$4 sm:$0xff]  }
 0x222   :  { %6798 = vmatprep.subr.bf16.mxu0 %v10416_v11  ;;  %v10498_v11 = vld [vmem:[#allocation2 + $0xd4c] ss:$16 sps:$4 sm:$0xff]  }
 0x224   :  { %7373 = vmatpush1.bf16.msra.mxu1 %v10417_v44  ;;  %v10501_v44 = vld [vmem:[#allocation2 + $0x1164] ss:$16 sps:$4 sm:$0xff]  }
 0x225   :  { %6799 = vmatpush1.bf16.msra.mxu0 %v10414_v15  ;;  %7374 = vmatprep.subr.bf16.mxu1 %v10425_v19  ;;  %v10496_v15 = vld [vmem:[#allocation2 + $0xd48] ss:$16 sps:$4 sm:$0xff]   ;;  %v10499_v19 = vld [vmem:[#allocation2 + $0x1160] ss:$16 sps:$4 sm:$0xff]  }
 0x226   :  { %6800 = vmatprep.subr.bf16.mxu0 %v10422_v57  ;;  %v10504_v57 = vld [vmem:[#allocation2 + $0xd6c] ss:$16 sps:$4 sm:$0xff]  }
 0x228   :  { %7375 = vmatpush1.bf16.msra.mxu1 %v10423_v22  ;;  %v10507_v22 = vld [vmem:[#allocation2 + $0x1184] ss:$16 sps:$4 sm:$0xff]  }
 0x229   :  { %6801 = vmatpush1.bf16.msra.mxu0 %v10420_v21  ;;  %7376 = vmatprep.subr.bf16.mxu1 %v10431_v25  ;;  %v10502_v21 = vld [vmem:[#allocation2 + $0xd68] ss:$16 sps:$4 sm:$0xff]   ;;  %v10505_v25 = vld [vmem:[#allocation2 + $0x1180] ss:$16 sps:$4 sm:$0xff]  }
 0x22a   :  { %6802 = vmatprep.subr.bf16.mxu0 %v10428_v23  ;;  %v10510_v23 = vld [vmem:[#allocation2 + $0xd8c] ss:$16 sps:$4 sm:$0xff]  }
 0x22c   :  { %7377 = vmatpush1.bf16.msra.mxu1 %v10429_v27  ;;  %v10513_v27 = vld [vmem:[#allocation2 + $0x11a4] ss:$16 sps:$4 sm:$0xff]  }
 0x22d   :  { %6803 = vmatpush1.bf16.msra.mxu0 %v10426_v26  ;;  %7387 = vmatprep.subr.bf16.mxu1 %v10438_v29  ;;  %v10508_v26 = vld [vmem:[#allocation2 + $0xd88] ss:$16 sps:$4 sm:$0xff]   ;;  %v10511_v29 = vld [vmem:[#allocation2 + $0x11a0] ss:$16 sps:$4 sm:$0xff]  }
 0x22e   :  { %6813 = vmatprep.subr.bf16.mxu0 %v10435_v28  ;;  %v10516_v28 = vld [vmem:[#allocation2 + $0xdac] ss:$16 sps:$4 sm:$0xff]  }
 0x22f   :  { %7379 = vmatmul.mubr.bf16.vlgmr.msra.gmra.mrb[4].mxu1 %v11787_v2  ;;  %v10456_v2 = vld [vmem:[#allocation2 + $0xc6c] ss:$16 sps:$4 sm:$0xff]  }
 0x230   :  { %6805 = vmatmul.mubr.bf16.vlgmr.msra.gmra.mrb[0].mxu0 %v11825_v32  ;;  %7388 = vmatpush1.bf16.msra.mxu1 %v10436_v34  ;;  %v10522_v34 = vld [vmem:[#allocation2 + $0xdcc] ss:$16 sps:$4 sm:$0xff]  }
 0x231   :  { %6814 = vmatpush1.bf16.msra.mxu0 %v10433_v33  ;;  %7389 = vmatprep.subr.bf16.mxu1 %v10444_v38  ;;  %v10519_v33 = vld [vmem:[#allocation2 + $0x11c4] ss:$16 sps:$4 sm:$0xff]   ;;  %v10517_v38 = vld [vmem:[#allocation2 + $0x11c0] ss:$16 sps:$4 sm:$0xff]  }
 0x232   :  { %6815 = vmatprep.subr.bf16.mxu0 %v10441_v37  ;;  %6845 = vmatprep.mubr.bf16.mxu0 %v11827_v58  ;;  %v187_v37 = vcombine.high %v11815_v20, %v11815_v20 }
 0x233   :  { %7419 = vmatprep.mubr.bf16.mxu1 %v11789_v7  ;;  %v10460_v7 = vld [vmem:[#allocation2 + $0xc88] ss:$16 sps:$4 sm:$0xff]  }
 0x234   :  { %7390 = vmatpush1.bf16.msra.mxu1 %v10442_v40  ;;  %v10525_v40 = vld [vmem:[#allocation2 + $0x11e4] ss:$16 sps:$4 sm:$0xff]  }
 0x235   :  { %6816 = vmatpush1.bf16.msra.mxu0 %v10439_v39  ;;  %7391 = vmatprep.subr.bf16.mxu1 %v10450_v41  ;;  %v10520_v39 = vld [vmem:[#allocation2 + $0xdc8] ss:$16 sps:$4 sm:$0xff]   ;;  %v11836_v41 = vrot.slane %v187_v37, %v11685_v49 }
 0x236   :  { %6817 = vmatprep.subr.bf16.mxu0 %v10447_v10  ;;  %v10528_v10 = vld [vmem:[#allocation2 + $0xdec] ss:$16 sps:$4 sm:$0xff]   ;;  %v10598_v37 = vld [vmem:[#allocation2 + $0xf68] ss:$16 sps:$4 sm:$0xff]  }
 0x237   :  { %v203_v20 = vcombine.high %v11836_v41, %v11836_v41 }
 0x238   :  { %7392 = vmatpush1.bf16.msra.mxu1 %v10448_v16  ;;  %v10526_v16 = vld [vmem:[#allocation2 + $0xde8] ss:$16 sps:$4 sm:$0xff]  }
 0x239   :  { %6818 = vmatpush1.bf16.msra.mxu0 %v10445_v42  ;;  %7393 = vmatprep.subr.bf16.mxu1 %v10456_v2  ;;  %v10523_v42 = vld [vmem:[#allocation2 + $0x11e0] ss:$16 sps:$4 sm:$0xff]   ;;  %v10534_v2 = vld [vmem:[#allocation2 + $0xe0c] ss:$16 sps:$4 sm:$0xff]  }
 0x23a   :  { %6819 = vmatprep.subr.bf16.mxu0 %v10453_v45  ;;  %v10531_v45 = vld [vmem:[#allocation2 + $0x1204] ss:$16 sps:$4 sm:$0xff]  }
 0x23c   :  { %7394 = vmatpush1.bf16.msra.mxu1 %v10454_v48  ;;  %v10529_v48 = vld [vmem:[#allocation2 + $0x1200] ss:$16 sps:$4 sm:$0xff]  }
 0x23d   :  { %6820 = vmatpush1.bf16.msra.mxu0 %v10451_v46  ;;  %7395 = vmatprep.subr.bf16.mxu1 %v10462_v24  ;;  %v11842_v46 = vpack.c.bf16 %v11819_v61, %v11819_v61  ;;  %v10537_v24 = vld [vmem:[#allocation2 + $0x1224] ss:$16 sps:$4 sm:$0xff]  }
 0x23e   :  { %6821 = vmatprep.subr.bf16.mxu0 %v10459_v50  ;;  %v10532_v50 = vld [vmem:[#allocation2 + $0xe08] ss:$16 sps:$4 sm:$0xff]   ;;  %v10543_v61 = vld [vmem:[#allocation2 + $0x1244] ss:$16 sps:$4 sm:$0xff]  }
 0x240   :  { %7396 = vmatpush1.bf16.msra.mxu1 %v10460_v7  ;;  %v11844_v7 = vpack.c.bf16 %v203_v20, %v203_v20  ;;  %v10615_v20 = vld [vmem:[#allocation2 + $0x13c4] ss:$16 sps:$4 sm:$0xff]  }
 0x241   :  { %6822 = vmatpush1.bf16.msra.mxu0 %v10457_v52  ;;  %7397 = vmatprep.subr.bf16.mxu1 %v10468_v31  ;;  %v10540_v52 = vld [vmem:[#allocation2 + $0xe2c] ss:$16 sps:$4 sm:$0xff]   ;;  %v10538_v31 = vld [vmem:[#allocation2 + $0xe28] ss:$16 sps:$4 sm:$0xff]  }
 0x242   :  { %6823 = vmatprep.subr.bf16.mxu0 %v10465_v53  ;;  %v10535_v53 = vld [vmem:[#allocation2 + $0x1220] ss:$16 sps:$4 sm:$0xff]  }
 0x244   :  { %7398 = vmatpush1.bf16.msra.mxu1 %v10466_v55  ;;  %v10541_v55 = vld [vmem:[#allocation2 + $0x1240] ss:$16 sps:$4 sm:$0xff]  }
 0x245   :  { %6824 = vmatpush1.bf16.msra.mxu0 %v10463_v54  ;;  %7399 = vmatprep.subr.bf16.mxu1 %v10474_v59  ;;  %v10546_v54 = vld [vmem:[#allocation2 + $0xe4c] ss:$16 sps:$4 sm:$0xff]   ;;  %v10549_v59 = vld [vmem:[#allocation2 + $0x1264] ss:$16 sps:$4 sm:$0xff]  }
 0x246   :  { %6825 = vmatprep.subr.bf16.mxu0 %v10471_v56  ;;  %v10544_v56 = vld [vmem:[#allocation2 + $0xe48] ss:$16 sps:$4 sm:$0xff]  }
 0x248   :  { %7400 = vmatpush1.bf16.msra.mxu1 %v10472_v36  ;;  %v10550_v36 = vld [vmem:[#allocation2 + $0xe68] ss:$16 sps:$4 sm:$0xff]  }
 0x249   :  { %6826 = vmatpush1.bf16.msra.mxu0 %v10469_v60  ;;  %7401 = vmatprep.subr.bf16.mxu1 %v10480_v62  ;;  %v10547_v60 = vld [vmem:[#allocation2 + $0x1260] ss:$16 sps:$4 sm:$0xff]   ;;  %v10558_v62 = vld [vmem:[#allocation2 + $0xe8c] ss:$16 sps:$4 sm:$0xff]  }
 0x24a   :  { %6827 = vmatprep.subr.bf16.mxu0 %v10477_v51  ;;  %v10555_v51 = vld [vmem:[#allocation2 + $0x1284] ss:$16 sps:$4 sm:$0xff]  }
 0x24c   :  { %7402 = vmatpush1.bf16.msra.mxu1 %v10478_v30  ;;  %v10561_v30 = vld [vmem:[#allocation2 + $0x12a4] ss:$16 sps:$4 sm:$0xff]  }
 0x24d   :  { %6828 = vmatpush1.bf16.msra.mxu0 %v10475_v63  ;;  %7403 = vmatprep.subr.bf16.mxu1 %v10486_v1  ;;  %v10553_v63 = vld [vmem:[#allocation2 + $0x1280] ss:$16 sps:$4 sm:$0xff]  }
 0x24e   :  { %6829 = vmatprep.subr.bf16.mxu0 %v10483_v0  ;;  %v10564_v0 = vld [vmem:[#allocation2 + $0xeac] ss:$16 sps:$4 sm:$0xff]   ;;  %v10559_v1 = vld [vmem:[#allocation2 + $0x12a0] ss:$16 sps:$4 sm:$0xff]  }
 0x250   :  { %7404 = vmatpush1.bf16.msra.mxu1 %v10484_v5  ;;  %v10567_v5 = vld [vmem:[#allocation2 + $0x12c4] ss:$16 sps:$4 sm:$0xff]  }
 0x251   :  { %6830 = vmatpush1.bf16.msra.mxu0 %v10481_v4  ;;  %7405 = vmatprep.subr.bf16.mxu1 %v10492_v6  ;;  %v10562_v4 = vld [vmem:[#allocation2 + $0xea8] ss:$16 sps:$4 sm:$0xff]   ;;  %v10565_v6 = vld [vmem:[#allocation2 + $0x12c0] ss:$16 sps:$4 sm:$0xff]  }
 0x252   :  { %6831 = vmatprep.subr.bf16.mxu0 %v10489_v35  ;;  %v10570_v35 = vld [vmem:[#allocation2 + $0xecc] ss:$16 sps:$4 sm:$0xff]  }
 0x254   :  { %7406 = vmatpush1.bf16.msra.mxu1 %v10490_v9  ;;  %v10573_v9 = vld [vmem:[#allocation2 + $0x12e4] ss:$16 sps:$4 sm:$0xff]  }
 0x255   :  { %6832 = vmatpush1.bf16.msra.mxu0 %v10487_v8  ;;  %7407 = vmatprep.subr.bf16.mxu1 %v10498_v11  ;;  %v10568_v8 = vld [vmem:[#allocation2 + $0xec8] ss:$16 sps:$4 sm:$0xff]   ;;  %v10571_v11 = vld [vmem:[#allocation2 + $0x12e0] ss:$16 sps:$4 sm:$0xff]  }
 0x256   :  { %6833 = vmatprep.subr.bf16.mxu0 %v10495_v3  ;;  %v10576_v3 = vld [vmem:[#allocation2 + $0xeec] ss:$16 sps:$4 sm:$0xff]  }
 0x258   :  { %7408 = vmatpush1.bf16.msra.mxu1 %v10496_v15  ;;  %v10579_v15 = vld [vmem:[#allocation2 + $0x1304] ss:$16 sps:$4 sm:$0xff]  }
 0x259   :  { %6834 = vmatpush1.bf16.msra.mxu0 %v10493_v14  ;;  %7409 = vmatprep.subr.bf16.mxu1 %v10504_v57  ;;  %v10574_v14 = vld [vmem:[#allocation2 + $0xee8] ss:$16 sps:$4 sm:$0xff]   ;;  %v10577_v57 = vld [vmem:[#allocation2 + $0x1300] ss:$16 sps:$4 sm:$0xff]  }
 0x25a   :  { %6835 = vmatprep.subr.bf16.mxu0 %v10501_v44  ;;  %v10582_v44 = vld [vmem:[#allocation2 + $0xf0c] ss:$16 sps:$4 sm:$0xff]  }
 0x25c   :  { %7410 = vmatpush1.bf16.msra.mxu1 %v10502_v21  ;;  %v10585_v21 = vld [vmem:[#allocation2 + $0x1324] ss:$16 sps:$4 sm:$0xff]  }
 0x25d   :  { %6836 = vmatpush1.bf16.msra.mxu0 %v10499_v19  ;;  %7411 = vmatprep.subr.bf16.mxu1 %v10510_v23  ;;  %v10580_v19 = vld [vmem:[#allocation2 + $0xf08] ss:$16 sps:$4 sm:$0xff]   ;;  %v10583_v23 = vld [vmem:[#allocation2 + $0x1320] ss:$16 sps:$4 sm:$0xff]  }
 0x25e   :  { %6837 = vmatprep.subr.bf16.mxu0 %v10507_v22  ;;  %v10588_v22 = vld [vmem:[#allocation2 + $0xf2c] ss:$16 sps:$4 sm:$0xff]  }
 0x260   :  { %7412 = vmatpush1.bf16.msra.mxu1 %v10508_v26  ;;  %v10591_v26 = vld [vmem:[#allocation2 + $0x1344] ss:$16 sps:$4 sm:$0xff]  }
 0x261   :  { %6838 = vmatpush1.bf16.msra.mxu0 %v10505_v25  ;;  %7413 = vmatprep.subr.bf16.mxu1 %v10516_v28  ;;  %v10586_v25 = vld [vmem:[#allocation2 + $0xf28] ss:$16 sps:$4 sm:$0xff]   ;;  %v10589_v28 = vld [vmem:[#allocation2 + $0x1340] ss:$16 sps:$4 sm:$0xff]  }
 0x262   :  { %6839 = vmatprep.subr.bf16.mxu0 %v10513_v27  ;;  %v10594_v27 = vld [vmem:[#allocation2 + $0xf4c] ss:$16 sps:$4 sm:$0xff]  }
 0x264   :  { %7414 = vmatpush1.bf16.msra.mxu1 %v10514_v18  ;;  %v10597_v18 = vld [vmem:[#allocation2 + $0x1364] ss:$16 sps:$4 sm:$0xff]  }
 0x265   :  { %6840 = vmatpush1.bf16.msra.mxu0 %v10511_v29  ;;  %7415 = vmatprep.subr.bf16.mxu1 %v10522_v34  ;;  %v10592_v29 = vld [vmem:[#allocation2 + $0xf48] ss:$16 sps:$4 sm:$0xff]   ;;  %v10595_v34 = vld [vmem:[#allocation2 + $0x1360] ss:$16 sps:$4 sm:$0xff]  }
 0x266   :  { %6841 = vmatprep.subr.bf16.mxu0 %v10519_v33  ;;  %v10600_v33 = vld [vmem:[#allocation2 + $0xf6c] ss:$16 sps:$4 sm:$0xff]  }
 0x268   :  { %7416 = vmatpush1.bf16.msra.mxu1 %v10520_v39  ;;  %v10606_v39 = vld [vmem:[#allocation2 + $0xf8c] ss:$16 sps:$4 sm:$0xff]  }
 0x269   :  { %6842 = vmatpush1.bf16.msra.mxu0 %v10517_v38  ;;  %7417 = vmatprep.subr.bf16.mxu1 %v10528_v10  ;;  %v10603_v38 = vld [vmem:[#allocation2 + $0x1384] ss:$16 sps:$4 sm:$0xff]   ;;  %v10604_v10 = vld [vmem:[#allocation2 + $0xf88] ss:$16 sps:$4 sm:$0xff]  }
 0x26a   :  { %6843 = vmatprep.subr.bf16.mxu0 %v10525_v40  ;;  %v10601_v40 = vld [vmem:[#allocation2 + $0x1380] ss:$16 sps:$4 sm:$0xff]  }
 0x26c   :  { %7418 = vmatpush1.bf16.msra.mxu1 %v10526_v16  ;;  %v10612_v16 = vld [vmem:[#allocation2 + $0xfac] ss:$16 sps:$4 sm:$0xff]  }
 0x26d   :  { %6844 = vmatpush1.bf16.msra.mxu0 %v10523_v42  ;;  %7428 = vmatprep.subr.bf16.mxu1 %v10534_v2  ;;  %v10609_v42 = vld [vmem:[#allocation2 + $0x13a4] ss:$16 sps:$4 sm:$0xff]   ;;  %v10610_v2 = vld [vmem:[#allocation2 + $0xfa8] ss:$16 sps:$4 sm:$0xff]  }
 0x26e   :  { %6854 = vmatprep.subr.bf16.mxu0 %v10531_v45  ;;  %v10607_v45 = vld [vmem:[#allocation2 + $0x13a0] ss:$16 sps:$4 sm:$0xff]  }
 0x26f   :  { %7420 = vmatmul.mubr.bf16.vlgmr.msra.gmra.mrb[4].mxu1 %v11804_v17  ;;  %v10552_v17 = vld [vmem:[#allocation2 + $0xe6c] ss:$16 sps:$4 sm:$0xff]  }
 0x270   :  { %6846 = vmatmul.mubr.bf16.vlgmr.msra.gmra.mrb[0].mxu0 %v11842_v46  ;;  %7429 = vmatpush1.bf16.msra.mxu1 %v10532_v50  ;;  %v11853_v50 = vld [vmem:[%s11997_s0 + $0x28] sm:$0xff] }
 0x271   :  { %6855 = vmatpush1.bf16.msra.mxu0 %v10529_v48  ;;  %7430 = vmatprep.subr.bf16.mxu1 %v10540_v52  ;;  %v10618_v48 = vld [vmem:[#allocation2 + $0xfcc] ss:$16 sps:$4 sm:$0xff]   ;;  %v10616_v52 = vld [vmem:[#allocation2 + $0xfc8] ss:$16 sps:$4 sm:$0xff]  }
 0x272   :  { %6856 = vmatprep.subr.bf16.mxu0 %v10537_v24  ;;  %6886 = vmatprep.mubr.bf16.mxu0 %v11844_v7  ;;  %v10613_v24 = vld [vmem:[#allocation2 + $0x13c0] ss:$16 sps:$4 sm:$0xff]  }
 0x273   :  { %7460 = vmatprep.mubr.bf16.mxu1 %v11806_v47  ;;  %v10556_v47 = vld [vmem:[#allocation2 + $0xe88] ss:$16 sps:$4 sm:$0xff]  }
 0x274   :  { %7431 = vmatpush1.bf16.msra.mxu1 %v10538_v31  ;;  %v10624_v31 = vld [vmem:[#allocation2 + $0xfec] ss:$16 sps:$4 sm:$0xff]  }
 0x275   :  { %6857 = vmatpush1.bf16.msra.mxu0 %v10535_v53  ;;  %7432 = vmatprep.subr.bf16.mxu1 %v10546_v54  ;;  %v10621_v53 = vld [vmem:[#allocation2 + $0x13e4] ss:$16 sps:$4 sm:$0xff]   ;;  %v10619_v54 = vld [vmem:[#allocation2 + $0x13e0] ss:$16 sps:$4 sm:$0xff]  }
 0x276   :  { %6858 = vmatprep.subr.bf16.mxu0 %v10543_v61  ;;  %v11857_v61 = vrot.slane %v11853_v50, %v11685_v49 }
 0x278   :  { %7433 = vmatpush1.bf16.msra.mxu1 %v10544_v56  ;;  %v10628_v56 = vld [vmem:[#allocation2 + $0x1404] ss:$16 sps:$4 sm:$0xff]  }
 0x279   :  { %6859 = vmatpush1.bf16.msra.mxu0 %v10541_v55  ;;  %7434 = vmatprep.subr.bf16.mxu1 %v10552_v17  ;;  %v10622_v55 = vld [vmem:[#allocation2 + $0xfe8] ss:$16 sps:$4 sm:$0xff]   ;;  %v219_v17 = vcombine.high %v11857_v61, %v11857_v61 }
 0x27a   :  { %6860 = vmatprep.subr.bf16.mxu0 %v10549_v59  ;;  %v10631_v59 = vld [vmem:[#allocation2 + $0x100c] ss:$16 sps:$4 sm:$0xff]  }
 0x27c   :  { %7435 = vmatpush1.bf16.msra.mxu1 %v10550_v36  ;;  %v10626_v36 = vld [vmem:[#allocation2 + $0x1400] ss:$16 sps:$4 sm:$0xff]  }
 0x27d   :  { %6861 = vmatpush1.bf16.msra.mxu0 %v10547_v60  ;;  %7436 = vmatprep.subr.bf16.mxu1 %v10558_v62  ;;  %v11863_v60 = vpack.c.bf16 %v11836_v41, %v11836_v41  ;;  %v10634_v62 = vld [vmem:[#allocation2 + $0x1424] ss:$16 sps:$4 sm:$0xff]  }
 0x27e   :  { %6862 = vmatprep.subr.bf16.mxu0 %v10555_v51  ;;  %v10629_v51 = vld [vmem:[#allocation2 + $0x1008] ss:$16 sps:$4 sm:$0xff]   ;;  %v10640_v41 = vld [vmem:[#allocation2 + $0x1444] ss:$16 sps:$4 sm:$0xff]  }
 0x280   :  { %7437 = vmatpush1.bf16.msra.mxu1 %v10556_v47  ;;  %v11865_v47 = vpack.c.bf16 %v219_v17, %v219_v17  ;;  %v10707_v17 = vld [vmem:[#allocation2 + $0x11a8] ss:$16 sps:$4 sm:$0xff]  }
 0x281   :  { %6863 = vmatpush1.bf16.msra.mxu0 %v10553_v63  ;;  %7438 = vmatprep.subr.bf16.mxu1 %v10564_v0  ;;  %v10637_v63 = vld [vmem:[#allocation2 + $0x102c] ss:$16 sps:$4 sm:$0xff]   ;;  %v10635_v0 = vld [vmem:[#allocation2 + $0x1028] ss:$16 sps:$4 sm:$0xff]  }
 0x282   :  { %6864 = vmatprep.subr.bf16.mxu0 %v10561_v30  ;;  %v10632_v30 = vld [vmem:[#allocation2 + $0x1420] ss:$16 sps:$4 sm:$0xff]  }
 0x284   :  { %7439 = vmatpush1.bf16.msra.mxu1 %v10562_v4  ;;  %v10638_v4 = vld [vmem:[#allocation2 + $0x1440] ss:$16 sps:$4 sm:$0xff]  }
 0x285   :  { %6865 = vmatpush1.bf16.msra.mxu0 %v10559_v1  ;;  %7440 = vmatprep.subr.bf16.mxu1 %v10570_v35  ;;  %v10643_v1 = vld [vmem:[#allocation2 + $0x104c] ss:$16 sps:$4 sm:$0xff]   ;;  %v10646_v35 = vld [vmem:[#allocation2 + $0x1464] ss:$16 sps:$4 sm:$0xff]  }
 0x286   :  { %6866 = vmatprep.subr.bf16.mxu0 %v10567_v5  ;;  %v10641_v5 = vld [vmem:[#allocation2 + $0x1048] ss:$16 sps:$4 sm:$0xff]  }
 0x288   :  { %7441 = vmatpush1.bf16.msra.mxu1 %v10568_v8  ;;  %v10647_v8 = vld [vmem:[#allocation2 + $0x1068] ss:$16 sps:$4 sm:$0xff]  }
 0x289   :  { %6867 = vmatpush1.bf16.msra.mxu0 %v10565_v6  ;;  %7442 = vmatprep.subr.bf16.mxu1 %v10576_v3  ;;  %v10644_v6 = vld [vmem:[#allocation2 + $0x1460] ss:$16 sps:$4 sm:$0xff]   ;;  %v10655_v3 = vld [vmem:[#allocation2 + $0x108c] ss:$16 sps:$4 sm:$0xff]  }
 0x28a   :  { %6868 = vmatprep.subr.bf16.mxu0 %v10573_v9  ;;  %v10652_v9 = vld [vmem:[#allocation2 + $0x1484] ss:$16 sps:$4 sm:$0xff]  }
 0x28c   :  { %7443 = vmatpush1.bf16.msra.mxu1 %v10574_v14  ;;  %v10658_v14 = vld [vmem:[#allocation2 + $0x14a4] ss:$16 sps:$4 sm:$0xff]  }
 0x28d   :  { %6869 = vmatpush1.bf16.msra.mxu0 %v10571_v11  ;;  %7444 = vmatprep.subr.bf16.mxu1 %v10582_v44  ;;  %v10650_v11 = vld [vmem:[#allocation2 + $0x1480] ss:$16 sps:$4 sm:$0xff]  }
 0x28e   :  { %6870 = vmatprep.subr.bf16.mxu0 %v10579_v15  ;;  %v10661_v15 = vld [vmem:[#allocation2 + $0x10ac] ss:$16 sps:$4 sm:$0xff]   ;;  %v10656_v44 = vld [vmem:[#allocation2 + $0x14a0] ss:$16 sps:$4 sm:$0xff]  }
 0x290   :  { %7445 = vmatpush1.bf16.msra.mxu1 %v10580_v19  ;;  %v10664_v19 = vld [vmem:[#allocation2 + $0x14c4] ss:$16 sps:$4 sm:$0xff]  }
 0x291   :  { %6871 = vmatpush1.bf16.msra.mxu0 %v10577_v57  ;;  %7446 = vmatprep.subr.bf16.mxu1 %v10588_v22  ;;  %v10659_v57 = vld [vmem:[#allocation2 + $0x10a8] ss:$16 sps:$4 sm:$0xff]   ;;  %v10662_v22 = vld [vmem:[#allocation2 + $0x14c0] ss:$16 sps:$4 sm:$0xff]  }
 0x292   :  { %6872 = vmatprep.subr.bf16.mxu0 %v10585_v21  ;;  %v10667_v21 = vld [vmem:[#allocation2 + $0x10cc] ss:$16 sps:$4 sm:$0xff]  }
 0x294   :  { %7447 = vmatpush1.bf16.msra.mxu1 %v10586_v25  ;;  %v10670_v25 = vld [vmem:[#allocation2 + $0x14e4] ss:$16 sps:$4 sm:$0xff]  }
 0x295   :  { %6873 = vmatpush1.bf16.msra.mxu0 %v10583_v23  ;;  %7448 = vmatprep.subr.bf16.mxu1 %v10594_v27  ;;  %v10665_v23 = vld [vmem:[#allocation2 + $0x10c8] ss:$16 sps:$4 sm:$0xff]   ;;  %v10668_v27 = vld [vmem:[#allocation2 + $0x14e0] ss:$16 sps:$4 sm:$0xff]  }
 0x296   :  { %6874 = vmatprep.subr.bf16.mxu0 %v10591_v26  ;;  %v10673_v26 = vld [vmem:[#allocation2 + $0x10ec] ss:$16 sps:$4 sm:$0xff]  }
 0x298   :  { %7449 = vmatpush1.bf16.msra.mxu1 %v10592_v29  ;;  %v10676_v29 = vld [vmem:[#allocation2 + $0x1504] ss:$16 sps:$4 sm:$0xff]  }
 0x299   :  { %6875 = vmatpush1.bf16.msra.mxu0 %v10589_v28  ;;  %7450 = vmatprep.subr.bf16.mxu1 %v10600_v33  ;;  %v10671_v28 = vld [vmem:[#allocation2 + $0x10e8] ss:$16 sps:$4 sm:$0xff]   ;;  %v10674_v33 = vld [vmem:[#allocation2 + $0x1500] ss:$16 sps:$4 sm:$0xff]  }
 0x29a   :  { %6876 = vmatprep.subr.bf16.mxu0 %v10597_v18  ;;  %v10679_v18 = vld [vmem:[#allocation2 + $0x110c] ss:$16 sps:$4 sm:$0xff]  }
 0x29c   :  { %7451 = vmatpush1.bf16.msra.mxu1 %v10598_v37  ;;  %v10682_v37 = vld [vmem:[#allocation2 + $0x1524] ss:$16 sps:$4 sm:$0xff]  }
 0x29d   :  { %6877 = vmatpush1.bf16.msra.mxu0 %v10595_v34  ;;  %7452 = vmatprep.subr.bf16.mxu1 %v10606_v39  ;;  %v10677_v34 = vld [vmem:[#allocation2 + $0x1108] ss:$16 sps:$4 sm:$0xff]   ;;  %v10680_v39 = vld [vmem:[#allocation2 + $0x1520] ss:$16 sps:$4 sm:$0xff]  }
 0x29e   :  { %6878 = vmatprep.subr.bf16.mxu0 %v10603_v38  ;;  %v10685_v38 = vld [vmem:[#allocation2 + $0x112c] ss:$16 sps:$4 sm:$0xff]  }
 0x2a0   :  { %7453 = vmatpush1.bf16.msra.mxu1 %v10604_v10  ;;  %v10688_v10 = vld [vmem:[#allocation2 + $0x1544] ss:$16 sps:$4 sm:$0xff]  }
 0x2a1   :  { %6879 = vmatpush1.bf16.msra.mxu0 %v10601_v40  ;;  %7454 = vmatprep.subr.bf16.mxu1 %v10612_v16  ;;  %v10683_v40 = vld [vmem:[#allocation2 + $0x1128] ss:$16 sps:$4 sm:$0xff]   ;;  %v10686_v16 = vld [vmem:[#allocation2 + $0x1540] ss:$16 sps:$4 sm:$0xff]  }
 0x2a2   :  { %6880 = vmatprep.subr.bf16.mxu0 %v10609_v42  ;;  %v10691_v42 = vld [vmem:[#allocation2 + $0x114c] ss:$16 sps:$4 sm:$0xff]  }
 0x2a4   :  { %7455 = vmatpush1.bf16.msra.mxu1 %v10610_v2  ;;  %v10694_v2 = vld [vmem:[#allocation2 + $0x1564] ss:$16 sps:$4 sm:$0xff]  }
 0x2a5   :  { %6881 = vmatpush1.bf16.msra.mxu0 %v10607_v45  ;;  %7456 = vmatprep.subr.bf16.mxu1 %v10618_v48  ;;  %v10689_v45 = vld [vmem:[#allocation2 + $0x1148] ss:$16 sps:$4 sm:$0xff]   ;;  %v10692_v48 = vld [vmem:[#allocation2 + $0x1560] ss:$16 sps:$4 sm:$0xff]  }
 0x2a6   :  { %6882 = vmatprep.subr.bf16.mxu0 %v10615_v20  ;;  %v10697_v20 = vld [vmem:[#allocation2 + $0x116c] ss:$16 sps:$4 sm:$0xff]  }
 0x2a8   :  { %7457 = vmatpush1.bf16.msra.mxu1 %v10616_v52  ;;  %v10700_v52 = vld [vmem:[#allocation2 + $0x1584] ss:$16 sps:$4 sm:$0xff]  }
 0x2a9   :  { %6883 = vmatpush1.bf16.msra.mxu0 %v10613_v24  ;;  %7458 = vmatprep.subr.bf16.mxu1 %v10624_v31  ;;  %v10695_v24 = vld [vmem:[#allocation2 + $0x1168] ss:$16 sps:$4 sm:$0xff]   ;;  %v10698_v31 = vld [vmem:[#allocation2 + $0x1580] ss:$16 sps:$4 sm:$0xff]  }
 0x2aa   :  { %6884 = vmatprep.subr.bf16.mxu0 %v10621_v53  ;;  %v10703_v53 = vld [vmem:[#allocation2 + $0x118c] ss:$16 sps:$4 sm:$0xff]  }
 0x2ac   :  { %7459 = vmatpush1.bf16.msra.mxu1 %v10622_v55  ;;  %v10706_v55 = vld [vmem:[#allocation2 + $0x15a4] ss:$16 sps:$4 sm:$0xff]  }
 0x2ad   :  { %6885 = vmatpush1.bf16.msra.mxu0 %v10619_v54  ;;  %7469 = vmatprep.subr.bf16.mxu1 %v10631_v59  ;;  %v10701_v54 = vld [vmem:[#allocation2 + $0x1188] ss:$16 sps:$4 sm:$0xff]   ;;  %v10704_v59 = vld [vmem:[#allocation2 + $0x15a0] ss:$16 sps:$4 sm:$0xff]  }
 0x2ae   :  { %6895 = vmatprep.subr.bf16.mxu0 %v10628_v56  ;;  %v10709_v56 = vld [vmem:[#allocation2 + $0x11ac] ss:$16 sps:$4 sm:$0xff]  }
 0x2af   :  { %7461 = vmatmul.mubr.bf16.vlgmr.msra.gmra.mrb[4].mxu1 %v11825_v32  ;;  %v10649_v32 = vld [vmem:[#allocation2 + $0x106c] ss:$16 sps:$4 sm:$0xff]  }
 0x2b0   :  { %6887 = vmatmul.mubr.bf16.vlgmr.msra.gmra.mrb[0].mxu0 %v11863_v60  ;;  %7470 = vmatpush1.bf16.msra.mxu1 %v10629_v51  ;;  %v10715_v51 = vld [vmem:[#allocation2 + $0x11cc] ss:$16 sps:$4 sm:$0xff]  }
 0x2b1   :  { %6896 = vmatpush1.bf16.msra.mxu0 %v10626_v36  ;;  %7471 = vmatprep.subr.bf16.mxu1 %v10637_v63  ;;  %v10712_v36 = vld [vmem:[#allocation2 + $0x15c4] ss:$16 sps:$4 sm:$0xff]   ;;  %v10710_v63 = vld [vmem:[#allocation2 + $0x15c0] ss:$16 sps:$4 sm:$0xff]  }
 0x2b2   :  { %6897 = vmatprep.subr.bf16.mxu0 %v10634_v62  ;;  %6927 = vmatprep.mubr.bf16.mxu0 %v11865_v47  ;;  %v204_v62 = vcombine.high %v11853_v50, %v11853_v50 }
 0x2b3   :  { %7501 = vmatprep.mubr.bf16.mxu1 %v11827_v58  ;;  %v10653_v58 = vld [vmem:[#allocation2 + $0x1088] ss:$16 sps:$4 sm:$0xff]  }
 0x2b4   :  { %7472 = vmatpush1.bf16.msra.mxu1 %v10635_v0  ;;  %v10718_v0 = vld [vmem:[#allocation2 + $0x15e4] ss:$16 sps:$4 sm:$0xff]  }
 0x2b5   :  { %6898 = vmatpush1.bf16.msra.mxu0 %v10632_v30  ;;  %7473 = vmatprep.subr.bf16.mxu1 %v10643_v1  ;;  %v10713_v30 = vld [vmem:[#allocation2 + $0x11c8] ss:$16 sps:$4 sm:$0xff]   ;;  %v11874_v1 = vrot.slane %v204_v62, %v11685_v49 }
 0x2b6   :  { %6899 = vmatprep.subr.bf16.mxu0 %v10640_v41  ;;  %v10721_v41 = vld [vmem:[#allocation2 + $0x11ec] ss:$16 sps:$4 sm:$0xff]   ;;  %v10791_v62 = vld [vmem:[#allocation2 + $0x1368] ss:$16 sps:$4 sm:$0xff]  }
 0x2b7   :  { %v220_v50 = vcombine.high %v11874_v1, %v11874_v1 }
 0x2b8   :  { %7474 = vmatpush1.bf16.msra.mxu1 %v10641_v5  ;;  %v10719_v5 = vld [vmem:[#allocation2 + $0x11e8] ss:$16 sps:$4 sm:$0xff]  }
 0x2b9   :  { %6900 = vmatpush1.bf16.msra.mxu0 %v10638_v4  ;;  %7475 = vmatprep.subr.bf16.mxu1 %v10649_v32  ;;  %v10716_v4 = vld [vmem:[#allocation2 + $0x15e0] ss:$16 sps:$4 sm:$0xff]   ;;  %v10727_v32 = vld [vmem:[#allocation2 + $0x120c] ss:$16 sps:$4 sm:$0xff]  }
 0x2ba   :  { %6901 = vmatprep.subr.bf16.mxu0 %v10646_v35  ;;  %v10724_v35 = vld [vmem:[#allocation2 + $0x1604] ss:$16 sps:$4 sm:$0xff]  }
 0x2bc   :  { %7476 = vmatpush1.bf16.msra.mxu1 %v10647_v8  ;;  %v10722_v8 = vld [vmem:[#allocation2 + $0x1600] ss:$16 sps:$4 sm:$0xff]  }
 0x2bd   :  { %6902 = vmatpush1.bf16.msra.mxu0 %v10644_v6  ;;  %7477 = vmatprep.subr.bf16.mxu1 %v10655_v3  ;;  %v11880_v6 = vpack.c.bf16 %v11857_v61, %v11857_v61  ;;  %v10730_v3 = vld [vmem:[#allocation2 + $0x1624] ss:$16 sps:$4 sm:$0xff]  }
 0x2be   :  { %6903 = vmatprep.subr.bf16.mxu0 %v10652_v9  ;;  %v10725_v9 = vld [vmem:[#allocation2 + $0x1208] ss:$16 sps:$4 sm:$0xff]   ;;  %v10736_v61 = vld [vmem:[#allocation2 + $0x1644] ss:$16 sps:$4 sm:$0xff]  }
 0x2c0   :  { %7478 = vmatpush1.bf16.msra.mxu1 %v10653_v58  ;;  %v11882_v58 = vpack.c.bf16 %v220_v50, %v220_v50  ;;  %v10808_v50 = vld [vmem:[#allocation2 + $0x17c4] ss:$16 sps:$4 sm:$0xff]  }
 0x2c1   :  { %6904 = vmatpush1.bf16.msra.mxu0 %v10650_v11  ;;  %7479 = vmatprep.subr.bf16.mxu1 %v10661_v15  ;;  %v10733_v11 = vld [vmem:[#allocation2 + $0x122c] ss:$16 sps:$4 sm:$0xff]   ;;  %v10731_v15 = vld [vmem:[#allocation2 + $0x1228] ss:$16 sps:$4 sm:$0xff]  }
 0x2c2   :  { %6905 = vmatprep.subr.bf16.mxu0 %v10658_v14  ;;  %v10728_v14 = vld [vmem:[#allocation2 + $0x1620] ss:$16 sps:$4 sm:$0xff]  }
 0x2c4   :  { %7480 = vmatpush1.bf16.msra.mxu1 %v10659_v57  ;;  %v10734_v57 = vld [vmem:[#allocation2 + $0x1640] ss:$16 sps:$4 sm:$0xff]  }
 0x2c5   :  { %6906 = vmatpush1.bf16.msra.mxu0 %v10656_v44  ;;  %7481 = vmatprep.subr.bf16.mxu1 %v10667_v21  ;;  %v10739_v44 = vld [vmem:[#allocation2 + $0x124c] ss:$16 sps:$4 sm:$0xff]   ;;  %v10742_v21 = vld [vmem:[#allocation2 + $0x1664] ss:$16 sps:$4 sm:$0xff]  }
 0x2c6   :  { %6907 = vmatprep.subr.bf16.mxu0 %v10664_v19  ;;  %v10737_v19 = vld [vmem:[#allocation2 + $0x1248] ss:$16 sps:$4 sm:$0xff]  }
 0x2c8   :  { %7482 = vmatpush1.bf16.msra.mxu1 %v10665_v23  ;;  %v10743_v23 = vld [vmem:[#allocation2 + $0x1268] ss:$16 sps:$4 sm:$0xff]  }
 0x2c9   :  { %6908 = vmatpush1.bf16.msra.mxu0 %v10662_v22  ;;  %7483 = vmatprep.subr.bf16.mxu1 %v10673_v26  ;;  %v10740_v22 = vld [vmem:[#allocation2 + $0x1660] ss:$16 sps:$4 sm:$0xff]   ;;  %v10751_v26 = vld [vmem:[#allocation2 + $0x128c] ss:$16 sps:$4 sm:$0xff]  }
 0x2ca   :  { %6909 = vmatprep.subr.bf16.mxu0 %v10670_v25  ;;  %v10748_v25 = vld [vmem:[#allocation2 + $0x1684] ss:$16 sps:$4 sm:$0xff]  }
 0x2cc   :  { %7484 = vmatpush1.bf16.msra.mxu1 %v10671_v28  ;;  %v10754_v28 = vld [vmem:[#allocation2 + $0x16a4] ss:$16 sps:$4 sm:$0xff]  }
 0x2cd   :  { %6910 = vmatpush1.bf16.msra.mxu0 %v10668_v27  ;;  %7485 = vmatprep.subr.bf16.mxu1 %v10679_v18  ;;  %v10746_v27 = vld [vmem:[#allocation2 + $0x1680] ss:$16 sps:$4 sm:$0xff]  }
 0x2ce   :  { %6911 = vmatprep.subr.bf16.mxu0 %v10676_v29  ;;  %v10757_v29 = vld [vmem:[#allocation2 + $0x12ac] ss:$16 sps:$4 sm:$0xff]   ;;  %v10752_v18 = vld [vmem:[#allocation2 + $0x16a0] ss:$16 sps:$4 sm:$0xff]  }
 0x2d0   :  { %7486 = vmatpush1.bf16.msra.mxu1 %v10677_v34  ;;  %v10760_v34 = vld [vmem:[#allocation2 + $0x16c4] ss:$16 sps:$4 sm:$0xff]  }
 0x2d1   :  { %6912 = vmatpush1.bf16.msra.mxu0 %v10674_v33  ;;  %7487 = vmatprep.subr.bf16.mxu1 %v10685_v38  ;;  %v10755_v33 = vld [vmem:[#allocation2 + $0x12a8] ss:$16 sps:$4 sm:$0xff]   ;;  %v10758_v38 = vld [vmem:[#allocation2 + $0x16c0] ss:$16 sps:$4 sm:$0xff]  }
 0x2d2   :  { %6913 = vmatprep.subr.bf16.mxu0 %v10682_v37  ;;  %v10763_v37 = vld [vmem:[#allocation2 + $0x12cc] ss:$16 sps:$4 sm:$0xff]  }
 0x2d4   :  { %7488 = vmatpush1.bf16.msra.mxu1 %v10683_v40  ;;  %v10766_v40 = vld [vmem:[#allocation2 + $0x16e4] ss:$16 sps:$4 sm:$0xff]  }
 0x2d5   :  { %6914 = vmatpush1.bf16.msra.mxu0 %v10680_v39  ;;  %7489 = vmatprep.subr.bf16.mxu1 %v10691_v42  ;;  %v10761_v39 = vld [vmem:[#allocation2 + $0x12c8] ss:$16 sps:$4 sm:$0xff]   ;;  %v10764_v42 = vld [vmem:[#allocation2 + $0x16e0] ss:$16 sps:$4 sm:$0xff]  }
 0x2d6   :  { %6915 = vmatprep.subr.bf16.mxu0 %v10688_v10  ;;  %v10769_v10 = vld [vmem:[#allocation2 + $0x12ec] ss:$16 sps:$4 sm:$0xff]  }
 0x2d8   :  { %7490 = vmatpush1.bf16.msra.mxu1 %v10689_v45  ;;  %v10772_v45 = vld [vmem:[#allocation2 + $0x1704] ss:$16 sps:$4 sm:$0xff]  }
 0x2d9   :  { %6916 = vmatpush1.bf16.msra.mxu0 %v10686_v16  ;;  %7491 = vmatprep.subr.bf16.mxu1 %v10697_v20  ;;  %v10767_v16 = vld [vmem:[#allocation2 + $0x12e8] ss:$16 sps:$4 sm:$0xff]   ;;  %v10770_v20 = vld [vmem:[#allocation2 + $0x1700] ss:$16 sps:$4 sm:$0xff]  }
 0x2da   :  { %6917 = vmatprep.subr.bf16.mxu0 %v10694_v2  ;;  %v10775_v2 = vld [vmem:[#allocation2 + $0x130c] ss:$16 sps:$4 sm:$0xff]  }
 0x2dc   :  { %7492 = vmatpush1.bf16.msra.mxu1 %v10695_v24  ;;  %v10778_v24 = vld [vmem:[#allocation2 + $0x1724] ss:$16 sps:$4 sm:$0xff]  }
 0x2dd   :  { %6918 = vmatpush1.bf16.msra.mxu0 %v10692_v48  ;;  %7493 = vmatprep.subr.bf16.mxu1 %v10703_v53  ;;  %v10773_v48 = vld [vmem:[#allocation2 + $0x1308] ss:$16 sps:$4 sm:$0xff]   ;;  %v10776_v53 = vld [vmem:[#allocation2 + $0x1720] ss:$16 sps:$4 sm:$0xff]  }
 0x2de   :  { %6919 = vmatprep.subr.bf16.mxu0 %v10700_v52  ;;  %v10781_v52 = vld [vmem:[#allocation2 + $0x132c] ss:$16 sps:$4 sm:$0xff]  }
 0x2e0   :  { %7494 = vmatpush1.bf16.msra.mxu1 %v10701_v54  ;;  %v10784_v54 = vld [vmem:[#allocation2 + $0x1744] ss:$16 sps:$4 sm:$0xff]  }
 0x2e1   :  { %6920 = vmatpush1.bf16.msra.mxu0 %v10698_v31  ;;  %7495 = vmatprep.subr.bf16.mxu1 %v10709_v56  ;;  %v10779_v31 = vld [vmem:[#allocation2 + $0x1328] ss:$16 sps:$4 sm:$0xff]   ;;  %v10782_v56 = vld [vmem:[#allocation2 + $0x1740] ss:$16 sps:$4 sm:$0xff]  }
 0x2e2   :  { %6921 = vmatprep.subr.bf16.mxu0 %v10706_v55  ;;  %v10787_v55 = vld [vmem:[#allocation2 + $0x134c] ss:$16 sps:$4 sm:$0xff]  }
 0x2e4   :  { %7496 = vmatpush1.bf16.msra.mxu1 %v10707_v17  ;;  %v10790_v17 = vld [vmem:[#allocation2 + $0x1764] ss:$16 sps:$4 sm:$0xff]  }
 0x2e5   :  { %6922 = vmatpush1.bf16.msra.mxu0 %v10704_v59  ;;  %7497 = vmatprep.subr.bf16.mxu1 %v10715_v51  ;;  %v10785_v59 = vld [vmem:[#allocation2 + $0x1348] ss:$16 sps:$4 sm:$0xff]   ;;  %v10788_v51 = vld [vmem:[#allocation2 + $0x1760] ss:$16 sps:$4 sm:$0xff]  }
 0x2e6   :  { %6923 = vmatprep.subr.bf16.mxu0 %v10712_v36  ;;  %v10793_v36 = vld [vmem:[#allocation2 + $0x136c] ss:$16 sps:$4 sm:$0xff]  }
 0x2e8   :  { %7498 = vmatpush1.bf16.msra.mxu1 %v10713_v30  ;;  %v10799_v30 = vld [vmem:[#allocation2 + $0x138c] ss:$16 sps:$4 sm:$0xff]  }
 0x2e9   :  { %6924 = vmatpush1.bf16.msra.mxu0 %v10710_v63  ;;  %7499 = vmatprep.subr.bf16.mxu1 %v10721_v41  ;;  %v10796_v63 = vld [vmem:[#allocation2 + $0x1784] ss:$16 sps:$4 sm:$0xff]   ;;  %v10797_v41 = vld [vmem:[#allocation2 + $0x1388] ss:$16 sps:$4 sm:$0xff]  }
 0x2ea   :  { %6925 = vmatprep.subr.bf16.mxu0 %v10718_v0  ;;  %v10794_v0 = vld [vmem:[#allocation2 + $0x1780] ss:$16 sps:$4 sm:$0xff]  }
 0x2ec   :  { %7500 = vmatpush1.bf16.msra.mxu1 %v10719_v5  ;;  %v10805_v5 = vld [vmem:[#allocation2 + $0x13ac] ss:$16 sps:$4 sm:$0xff]  }
 0x2ed   :  { %6926 = vmatpush1.bf16.msra.mxu0 %v10716_v4  ;;  %7510 = vmatprep.subr.bf16.mxu1 %v10727_v32  ;;  %v10802_v4 = vld [vmem:[#allocation2 + $0x17a4] ss:$16 sps:$4 sm:$0xff]   ;;  %v10803_v32 = vld [vmem:[#allocation2 + $0x13a8] ss:$16 sps:$4 sm:$0xff]  }
 0x2ee   :  { %6936 = vmatprep.subr.bf16.mxu0 %v10724_v35  ;;  %v10800_v35 = vld [vmem:[#allocation2 + $0x17a0] ss:$16 sps:$4 sm:$0xff]  }
 0x2ef   :  { %7502 = vmatmul.mubr.bf16.vlgmr.msra.gmra.mrb[4].mxu1 %v11842_v46  ;;  %v10745_v46 = vld [vmem:[#allocation2 + $0x126c] ss:$16 sps:$4 sm:$0xff]  }
 0x2f0   :  { %6928 = vmatmul.mubr.bf16.vlgmr.msra.gmra.mrb[0].mxu0 %v11880_v6  ;;  %7511 = vmatpush1.bf16.msra.mxu1 %v10725_v9  ;;  %v11891_v9 = vld [vmem:[%s11997_s0 + $0x30] sm:$0xff] }
 0x2f1   :  { %6937 = vmatpush1.bf16.msra.mxu0 %v10722_v8  ;;  %7512 = vmatprep.subr.bf16.mxu1 %v10733_v11  ;;  %v10811_v8 = vld [vmem:[#allocation2 + $0x13cc] ss:$16 sps:$4 sm:$0xff]   ;;  %v10809_v11 = vld [vmem:[#allocation2 + $0x13c8] ss:$16 sps:$4 sm:$0xff]  }
 0x2f2   :  { %6938 = vmatprep.subr.bf16.mxu0 %v10730_v3  ;;  %6968 = vmatprep.mubr.bf16.mxu0 %v11882_v58  ;;  %v10806_v3 = vld [vmem:[#allocation2 + $0x17c0] ss:$16 sps:$4 sm:$0xff]  }
 0x2f3   :  { %7542 = vmatprep.mubr.bf16.mxu1 %v11844_v7  ;;  %v10749_v7 = vld [vmem:[#allocation2 + $0x1288] ss:$16 sps:$4 sm:$0xff]  }
 0x2f4   :  { %7513 = vmatpush1.bf16.msra.mxu1 %v10731_v15  ;;  %v10817_v15 = vld [vmem:[#allocation2 + $0x13ec] ss:$16 sps:$4 sm:$0xff]  }
 0x2f5   :  { %6939 = vmatpush1.bf16.msra.mxu0 %v10728_v14  ;;  %7514 = vmatprep.subr.bf16.mxu1 %v10739_v44  ;;  %v10814_v14 = vld [vmem:[#allocation2 + $0x17e4] ss:$16 sps:$4 sm:$0xff]   ;;  %v10812_v44 = vld [vmem:[#allocation2 + $0x17e0] ss:$16 sps:$4 sm:$0xff]  }
 0x2f6   :  { %6940 = vmatprep.subr.bf16.mxu0 %v10736_v61  ;;  %v11895_v61 = vrot.slane %v11891_v9, %v11685_v49 }
 0x2f8   :  { %7515 = vmatpush1.bf16.msra.mxu1 %v10737_v19  ;;  %v10821_v19 = vld [vmem:[#allocation2 + $0x1804] ss:$16 sps:$4 sm:$0xff]  }
 0x2f9   :  { %6941 = vmatpush1.bf16.msra.mxu0 %v10734_v57  ;;  %7516 = vmatprep.subr.bf16.mxu1 %v10745_v46  ;;  %v10815_v57 = vld [vmem:[#allocation2 + $0x13e8] ss:$16 sps:$4 sm:$0xff]   ;;  %v236_v46 = vcombine.high %v11895_v61, %v11895_v61 }
 0x2fa   :  { %6942 = vmatprep.subr.bf16.mxu0 %v10742_v21  ;;  %v10824_v21 = vld [vmem:[#allocation2 + $0x140c] ss:$16 sps:$4 sm:$0xff]  }
 0x2fc   :  { %7517 = vmatpush1.bf16.msra.mxu1 %v10743_v23  ;;  %v10819_v23 = vld [vmem:[#allocation2 + $0x1800] ss:$16 sps:$4 sm:$0xff]  }
 0x2fd   :  { %6943 = vmatpush1.bf16.msra.mxu0 %v10740_v22  ;;  %7518 = vmatprep.subr.bf16.mxu1 %v10751_v26  ;;  %v11901_v22 = vpack.c.bf16 %v11874_v1, %v11874_v1  ;;  %v10827_v26 = vld [vmem:[#allocation2 + $0x1824] ss:$16 sps:$4 sm:$0xff]  }
 0x2fe   :  { %6944 = vmatprep.subr.bf16.mxu0 %v10748_v25  ;;  %v10822_v25 = vld [vmem:[#allocation2 + $0x1408] ss:$16 sps:$4 sm:$0xff]   ;;  %v10833_v1 = vld [vmem:[#allocation2 + $0x1844] ss:$16 sps:$4 sm:$0xff]  }
 0x300   :  { %7519 = vmatpush1.bf16.msra.mxu1 %v10749_v7  ;;  %v11903_v7 = vpack.c.bf16 %v236_v46, %v236_v46  ;;  %v10900_v46 = vld [vmem:[#allocation2 + $0x15a8] ss:$16 sps:$4 sm:$0xff]  }
 0x301   :  { %6945 = vmatpush1.bf16.msra.mxu0 %v10746_v27  ;;  %7520 = vmatprep.subr.bf16.mxu1 %v10757_v29  ;;  %v10830_v27 = vld [vmem:[#allocation2 + $0x142c] ss:$16 sps:$4 sm:$0xff]   ;;  %v10828_v29 = vld [vmem:[#allocation2 + $0x1428] ss:$16 sps:$4 sm:$0xff]  }
 0x302   :  { %6946 = vmatprep.subr.bf16.mxu0 %v10754_v28  ;;  %v10825_v28 = vld [vmem:[#allocation2 + $0x1820] ss:$16 sps:$4 sm:$0xff]  }
 0x304   :  { %7521 = vmatpush1.bf16.msra.mxu1 %v10755_v33  ;;  %v10831_v33 = vld [vmem:[#allocation2 + $0x1840] ss:$16 sps:$4 sm:$0xff]  }
 0x305   :  { %6947 = vmatpush1.bf16.msra.mxu0 %v10752_v18  ;;  %7522 = vmatprep.subr.bf16.mxu1 %v10763_v37  ;;  %v10836_v18 = vld [vmem:[#allocation2 + $0x144c] ss:$16 sps:$4 sm:$0xff]   ;;  %v10839_v37 = vld [vmem:[#allocation2 + $0x1864] ss:$16 sps:$4 sm:$0xff]  }
 0x306   :  { %6948 = vmatprep.subr.bf16.mxu0 %v10760_v34  ;;  %v10834_v34 = vld [vmem:[#allocation2 + $0x1448] ss:$16 sps:$4 sm:$0xff]  }
 0x308   :  { %7523 = vmatpush1.bf16.msra.mxu1 %v10761_v39  ;;  %v10840_v39 = vld [vmem:[#allocation2 + $0x1468] ss:$16 sps:$4 sm:$0xff]  }
 0x309   :  { %6949 = vmatpush1.bf16.msra.mxu0 %v10758_v38  ;;  %7524 = vmatprep.subr.bf16.mxu1 %v10769_v10  ;;  %v10837_v38 = vld [vmem:[#allocation2 + $0x1860] ss:$16 sps:$4 sm:$0xff]   ;;  %v10848_v10 = vld [vmem:[#allocation2 + $0x148c] ss:$16 sps:$4 sm:$0xff]  }
 0x30a   :  { %6950 = vmatprep.subr.bf16.mxu0 %v10766_v40  ;;  %v10845_v40 = vld [vmem:[#allocation2 + $0x1884] ss:$16 sps:$4 sm:$0xff]  }
 0x30c   :  { %7525 = vmatpush1.bf16.msra.mxu1 %v10767_v16  ;;  %v10851_v16 = vld [vmem:[#allocation2 + $0x18a4] ss:$16 sps:$4 sm:$0xff]  }
 0x30d   :  { %6951 = vmatpush1.bf16.msra.mxu0 %v10764_v42  ;;  %7526 = vmatprep.subr.bf16.mxu1 %v10775_v2  ;;  %v10843_v42 = vld [vmem:[#allocation2 + $0x1880] ss:$16 sps:$4 sm:$0xff]  }
 0x30e   :  { %6952 = vmatprep.subr.bf16.mxu0 %v10772_v45  ;;  %v10854_v45 = vld [vmem:[#allocation2 + $0x14ac] ss:$16 sps:$4 sm:$0xff]   ;;  %v10849_v2 = vld [vmem:[#allocation2 + $0x18a0] ss:$16 sps:$4 sm:$0xff]  }
 0x310   :  { %7527 = vmatpush1.bf16.msra.mxu1 %v10773_v48  ;;  %v10857_v48 = vld [vmem:[#allocation2 + $0x18c4] ss:$16 sps:$4 sm:$0xff]  }
 0x311   :  { %6953 = vmatpush1.bf16.msra.mxu0 %v10770_v20  ;;  %7528 = vmatprep.subr.bf16.mxu1 %v10781_v52  ;;  %v10852_v20 = vld [vmem:[#allocation2 + $0x14a8] ss:$16 sps:$4 sm:$0xff]   ;;  %v10855_v52 = vld [vmem:[#allocation2 + $0x18c0] ss:$16 sps:$4 sm:$0xff]  }
 0x312   :  { %6954 = vmatprep.subr.bf16.mxu0 %v10778_v24  ;;  %v10860_v24 = vld [vmem:[#allocation2 + $0x14cc] ss:$16 sps:$4 sm:$0xff]  }
 0x314   :  { %7529 = vmatpush1.bf16.msra.mxu1 %v10779_v31  ;;  %v10863_v31 = vld [vmem:[#allocation2 + $0x18e4] ss:$16 sps:$4 sm:$0xff]  }
 0x315   :  { %6955 = vmatpush1.bf16.msra.mxu0 %v10776_v53  ;;  %7530 = vmatprep.subr.bf16.mxu1 %v10787_v55  ;;  %v10858_v53 = vld [vmem:[#allocation2 + $0x14c8] ss:$16 sps:$4 sm:$0xff]   ;;  %v10861_v55 = vld [vmem:[#allocation2 + $0x18e0] ss:$16 sps:$4 sm:$0xff]  }
 0x316   :  { %6956 = vmatprep.subr.bf16.mxu0 %v10784_v54  ;;  %v10866_v54 = vld [vmem:[#allocation2 + $0x14ec] ss:$16 sps:$4 sm:$0xff]  }
 0x318   :  { %7531 = vmatpush1.bf16.msra.mxu1 %v10785_v59  ;;  %v10869_v59 = vld [vmem:[#allocation2 + $0x1904] ss:$16 sps:$4 sm:$0xff]  }
 0x319   :  { %6957 = vmatpush1.bf16.msra.mxu0 %v10782_v56  ;;  %7532 = vmatprep.subr.bf16.mxu1 %v10793_v36  ;;  %v10864_v56 = vld [vmem:[#allocation2 + $0x14e8] ss:$16 sps:$4 sm:$0xff]   ;;  %v10867_v36 = vld [vmem:[#allocation2 + $0x1900] ss:$16 sps:$4 sm:$0xff]  }
 0x31a   :  { %6958 = vmatprep.subr.bf16.mxu0 %v10790_v17  ;;  %v10872_v17 = vld [vmem:[#allocation2 + $0x150c] ss:$16 sps:$4 sm:$0xff]  }
 0x31c   :  { %7533 = vmatpush1.bf16.msra.mxu1 %v10791_v62  ;;  %v10875_v62 = vld [vmem:[#allocation2 + $0x1924] ss:$16 sps:$4 sm:$0xff]  }
 0x31d   :  { %6959 = vmatpush1.bf16.msra.mxu0 %v10788_v51  ;;  %7534 = vmatprep.subr.bf16.mxu1 %v10799_v30  ;;  %v10870_v51 = vld [vmem:[#allocation2 + $0x1508] ss:$16 sps:$4 sm:$0xff]   ;;  %v10873_v30 = vld [vmem:[#allocation2 + $0x1920] ss:$16 sps:$4 sm:$0xff]  }
 0x31e   :  { %6960 = vmatprep.subr.bf16.mxu0 %v10796_v63  ;;  %v10878_v63 = vld [vmem:[#allocation2 + $0x152c] ss:$16 sps:$4 sm:$0xff]  }
 0x320   :  { %7535 = vmatpush1.bf16.msra.mxu1 %v10797_v41  ;;  %v10881_v41 = vld [vmem:[#allocation2 + $0x1944] ss:$16 sps:$4 sm:$0xff]  }
 0x321   :  { %6961 = vmatpush1.bf16.msra.mxu0 %v10794_v0  ;;  %7536 = vmatprep.subr.bf16.mxu1 %v10805_v5  ;;  %v10876_v0 = vld [vmem:[#allocation2 + $0x1528] ss:$16 sps:$4 sm:$0xff]   ;;  %v10879_v5 = vld [vmem:[#allocation2 + $0x1940] ss:$16 sps:$4 sm:$0xff]  }
 0x322   :  { %6962 = vmatprep.subr.bf16.mxu0 %v10802_v4  ;;  %v10884_v4 = vld [vmem:[#allocation2 + $0x154c] ss:$16 sps:$4 sm:$0xff]  }
 0x324   :  { %7537 = vmatpush1.bf16.msra.mxu1 %v10803_v32  ;;  %v10887_v32 = vld [vmem:[#allocation2 + $0x1964] ss:$16 sps:$4 sm:$0xff]  }
 0x325   :  { %6963 = vmatpush1.bf16.msra.mxu0 %v10800_v35  ;;  %7538 = vmatprep.subr.bf16.mxu1 %v10811_v8  ;;  %v10882_v35 = vld [vmem:[#allocation2 + $0x1548] ss:$16 sps:$4 sm:$0xff]   ;;  %v10885_v8 = vld [vmem:[#allocation2 + $0x1960] ss:$16 sps:$4 sm:$0xff]  }
 0x326   :  { %6964 = vmatprep.subr.bf16.mxu0 %v10808_v50  ;;  %v10890_v50 = vld [vmem:[#allocation2 + $0x156c] ss:$16 sps:$4 sm:$0xff]  }
 0x328   :  { %7539 = vmatpush1.bf16.msra.mxu1 %v10809_v11  ;;  %v10893_v11 = vld [vmem:[#allocation2 + $0x1984] ss:$16 sps:$4 sm:$0xff]  }
 0x329   :  { %6965 = vmatpush1.bf16.msra.mxu0 %v10806_v3  ;;  %7540 = vmatprep.subr.bf16.mxu1 %v10817_v15  ;;  %v10888_v3 = vld [vmem:[#allocation2 + $0x1568] ss:$16 sps:$4 sm:$0xff]   ;;  %v10891_v15 = vld [vmem:[#allocation2 + $0x1980] ss:$16 sps:$4 sm:$0xff]  }
 0x32a   :  { %6966 = vmatprep.subr.bf16.mxu0 %v10814_v14  ;;  %v10896_v14 = vld [vmem:[#allocation2 + $0x158c] ss:$16 sps:$4 sm:$0xff]  }
 0x32c   :  { %7541 = vmatpush1.bf16.msra.mxu1 %v10815_v57  ;;  %v10899_v57 = vld [vmem:[#allocation2 + $0x19a4] ss:$16 sps:$4 sm:$0xff]  }
 0x32d   :  { %6967 = vmatpush1.bf16.msra.mxu0 %v10812_v44  ;;  %7551 = vmatprep.subr.bf16.mxu1 %v10824_v21  ;;  %v10894_v44 = vld [vmem:[#allocation2 + $0x1588] ss:$16 sps:$4 sm:$0xff]   ;;  %v10897_v21 = vld [vmem:[#allocation2 + $0x19a0] ss:$16 sps:$4 sm:$0xff]  }
 0x32e   :  { %6977 = vmatprep.subr.bf16.mxu0 %v10821_v19  ;;  %v10902_v19 = vld [vmem:[#allocation2 + $0x15ac] ss:$16 sps:$4 sm:$0xff]  }
 0x32f   :  { %7543 = vmatmul.mubr.bf16.vlgmr.msra.gmra.mrb[4].mxu1 %v11863_v60  ;;  %v10842_v60 = vld [vmem:[#allocation2 + $0x146c] ss:$16 sps:$4 sm:$0xff]  }
 0x330   :  { %6969 = vmatmul.mubr.bf16.vlgmr.msra.gmra.mrb[0].mxu0 %v11901_v22  ;;  %7552 = vmatpush1.bf16.msra.mxu1 %v10822_v25  ;;  %v10908_v25 = vld [vmem:[#allocation2 + $0x15cc] ss:$16 sps:$4 sm:$0xff]  }
 0x331   :  { %6978 = vmatpush1.bf16.msra.mxu0 %v10819_v23  ;;  %7553 = vmatprep.subr.bf16.mxu1 %v10830_v27  ;;  %v10905_v23 = vld [vmem:[#allocation2 + $0x19c4] ss:$16 sps:$4 sm:$0xff]   ;;  %v10903_v27 = vld [vmem:[#allocation2 + $0x19c0] ss:$16 sps:$4 sm:$0xff]  }
 0x332   :  { %6979 = vmatprep.subr.bf16.mxu0 %v10827_v26  ;;  %7009 = vmatprep.mubr.bf16.mxu0 %v11903_v7  ;;  %v221_v26 = vcombine.high %v11891_v9, %v11891_v9 }
 0x333   :  { %7583 = vmatprep.mubr.bf16.mxu1 %v11865_v47  ;;  %v10846_v47 = vld [vmem:[#allocation2 + $0x1488] ss:$16 sps:$4 sm:$0xff]  }
 0x334   :  { %7554 = vmatpush1.bf16.msra.mxu1 %v10828_v29  ;;  %v10911_v29 = vld [vmem:[#allocation2 + $0x19e4] ss:$16 sps:$4 sm:$0xff]  }
 0x335   :  { %6980 = vmatpush1.bf16.msra.mxu0 %v10825_v28  ;;  %7555 = vmatprep.subr.bf16.mxu1 %v10836_v18  ;;  %v10906_v28 = vld [vmem:[#allocation2 + $0x15c8] ss:$16 sps:$4 sm:$0xff]   ;;  %v11912_v18 = vrot.slane %v221_v26, %v11685_v49 }
 0x336   :  { %6981 = vmatprep.subr.bf16.mxu0 %v10833_v1  ;;  %v10914_v1 = vld [vmem:[#allocation2 + $0x15ec] ss:$16 sps:$4 sm:$0xff]   ;;  %v10984_v26 = vld [vmem:[#allocation2 + $0x1768] ss:$16 sps:$4 sm:$0xff]  }
 0x337   :  { %v237_v9 = vcombine.high %v11912_v18, %v11912_v18 }
 0x338   :  { %7556 = vmatpush1.bf16.msra.mxu1 %v10834_v34  ;;  %v10912_v34 = vld [vmem:[#allocation2 + $0x15e8] ss:$16 sps:$4 sm:$0xff]  }
 0x339   :  { %6982 = vmatpush1.bf16.msra.mxu0 %v10831_v33  ;;  %7557 = vmatprep.subr.bf16.mxu1 %v10842_v60  ;;  %v10909_v33 = vld [vmem:[#allocation2 + $0x19e0] ss:$16 sps:$4 sm:$0xff]   ;;  %v10920_v60 = vld [vmem:[#allocation2 + $0x160c] ss:$16 sps:$4 sm:$0xff]  }
 0x33a   :  { %6983 = vmatprep.subr.bf16.mxu0 %v10839_v37  ;;  %v10917_v37 = vld [vmem:[#allocation2 + $0x1a04] ss:$16 sps:$4 sm:$0xff]  }
 0x33c   :  { %7558 = vmatpush1.bf16.msra.mxu1 %v10840_v39  ;;  %v10915_v39 = vld [vmem:[#allocation2 + $0x1a00] ss:$16 sps:$4 sm:$0xff]  }
 0x33d   :  { %6984 = vmatpush1.bf16.msra.mxu0 %v10837_v38  ;;  %7559 = vmatprep.subr.bf16.mxu1 %v10848_v10  ;;  %v11918_v38 = vpack.c.bf16 %v11895_v61, %v11895_v61  ;;  %v10923_v10 = vld [vmem:[#allocation2 + $0x1a24] ss:$16 sps:$4 sm:$0xff]  }
 0x33e   :  { %6985 = vmatprep.subr.bf16.mxu0 %v10845_v40  ;;  %v10918_v40 = vld [vmem:[#allocation2 + $0x1608] ss:$16 sps:$4 sm:$0xff]   ;;  %v10929_v61 = vld [vmem:[#allocation2 + $0x1a44] ss:$16 sps:$4 sm:$0xff]  }
 0x340   :  { %7560 = vmatpush1.bf16.msra.mxu1 %v10846_v47  ;;  %v11920_v47 = vpack.c.bf16 %v237_v9, %v237_v9  ;;  %v11001_v9 = vld [vmem:[#allocation2 + $0x1bc4] ss:$16 sps:$4 sm:$0xff]  }
 0x341   :  { %6986 = vmatpush1.bf16.msra.mxu0 %v10843_v42  ;;  %7561 = vmatprep.subr.bf16.mxu1 %v10854_v45  ;;  %v10926_v42 = vld [vmem:[#allocation2 + $0x162c] ss:$16 sps:$4 sm:$0xff]   ;;  %v10924_v45 = vld [vmem:[#allocation2 + $0x1628] ss:$16 sps:$4 sm:$0xff]  }
 0x342   :  { %6987 = vmatprep.subr.bf16.mxu0 %v10851_v16  ;;  %v10921_v16 = vld [vmem:[#allocation2 + $0x1a20] ss:$16 sps:$4 sm:$0xff]  }
 0x344   :  { %7562 = vmatpush1.bf16.msra.mxu1 %v10852_v20  ;;  %v10927_v20 = vld [vmem:[#allocation2 + $0x1a40] ss:$16 sps:$4 sm:$0xff]  }
 0x345   :  { %6988 = vmatpush1.bf16.msra.mxu0 %v10849_v2  ;;  %7563 = vmatprep.subr.bf16.mxu1 %v10860_v24  ;;  %v10932_v2 = vld [vmem:[#allocation2 + $0x164c] ss:$16 sps:$4 sm:$0xff]   ;;  %v10935_v24 = vld [vmem:[#allocation2 + $0x1a64] ss:$16 sps:$4 sm:$0xff]  }
 0x346   :  { %6989 = vmatprep.subr.bf16.mxu0 %v10857_v48  ;;  %v10930_v48 = vld [vmem:[#allocation2 + $0x1648] ss:$16 sps:$4 sm:$0xff]  }
 0x348   :  { %7564 = vmatpush1.bf16.msra.mxu1 %v10858_v53  ;;  %v10936_v53 = vld [vmem:[#allocation2 + $0x1668] ss:$16 sps:$4 sm:$0xff]  }
 0x349   :  { %6990 = vmatpush1.bf16.msra.mxu0 %v10855_v52  ;;  %7565 = vmatprep.subr.bf16.mxu1 %v10866_v54  ;;  %v10933_v52 = vld [vmem:[#allocation2 + $0x1a60] ss:$16 sps:$4 sm:$0xff]   ;;  %v10944_v54 = vld [vmem:[#allocation2 + $0x168c] ss:$16 sps:$4 sm:$0xff]  }
 0x34a   :  { %6991 = vmatprep.subr.bf16.mxu0 %v10863_v31  ;;  %v10941_v31 = vld [vmem:[#allocation2 + $0x1a84] ss:$16 sps:$4 sm:$0xff]  }
 0x34c   :  { %7566 = vmatpush1.bf16.msra.mxu1 %v10864_v56  ;;  %v10947_v56 = vld [vmem:[#allocation2 + $0x1aa4] ss:$16 sps:$4 sm:$0xff]  }
 0x34d   :  { %6992 = vmatpush1.bf16.msra.mxu0 %v10861_v55  ;;  %7567 = vmatprep.subr.bf16.mxu1 %v10872_v17  ;;  %v10939_v55 = vld [vmem:[#allocation2 + $0x1a80] ss:$16 sps:$4 sm:$0xff]  }
 0x34e   :  { %6993 = vmatprep.subr.bf16.mxu0 %v10869_v59  ;;  %v10950_v59 = vld [vmem:[#allocation2 + $0x16ac] ss:$16 sps:$4 sm:$0xff]   ;;  %v10945_v17 = vld [vmem:[#allocation2 + $0x1aa0] ss:$16 sps:$4 sm:$0xff]  }
 0x350   :  { %7568 = vmatpush1.bf16.msra.mxu1 %v10870_v51  ;;  %v10953_v51 = vld [vmem:[#allocation2 + $0x1ac4] ss:$16 sps:$4 sm:$0xff]  }
 0x351   :  { %6994 = vmatpush1.bf16.msra.mxu0 %v10867_v36  ;;  %7569 = vmatprep.subr.bf16.mxu1 %v10878_v63  ;;  %v10948_v36 = vld [vmem:[#allocation2 + $0x16a8] ss:$16 sps:$4 sm:$0xff]   ;;  %v10951_v63 = vld [vmem:[#allocation2 + $0x1ac0] ss:$16 sps:$4 sm:$0xff]  }
 0x352   :  { %6995 = vmatprep.subr.bf16.mxu0 %v10875_v62  ;;  %v10956_v62 = vld [vmem:[#allocation2 + $0x16cc] ss:$16 sps:$4 sm:$0xff]  }
 0x354   :  { %7570 = vmatpush1.bf16.msra.mxu1 %v10876_v0  ;;  %v10959_v0 = vld [vmem:[#allocation2 + $0x1ae4] ss:$16 sps:$4 sm:$0xff]  }
 0x355   :  { %6996 = vmatpush1.bf16.msra.mxu0 %v10873_v30  ;;  %7571 = vmatprep.subr.bf16.mxu1 %v10884_v4  ;;  %v10954_v30 = vld [vmem:[#allocation2 + $0x16c8] ss:$16 sps:$4 sm:$0xff]   ;;  %v10957_v4 = vld [vmem:[#allocation2 + $0x1ae0] ss:$16 sps:$4 sm:$0xff]  }
 0x356   :  { %6997 = vmatprep.subr.bf16.mxu0 %v10881_v41  ;;  %v10962_v41 = vld [vmem:[#allocation2 + $0x16ec] ss:$16 sps:$4 sm:$0xff]  }
 0x358   :  { %7572 = vmatpush1.bf16.msra.mxu1 %v10882_v35  ;;  %v10965_v35 = vld [vmem:[#allocation2 + $0x1b04] ss:$16 sps:$4 sm:$0xff]  }
 0x359   :  { %6998 = vmatpush1.bf16.msra.mxu0 %v10879_v5  ;;  %7573 = vmatprep.subr.bf16.mxu1 %v10890_v50  ;;  %v10960_v5 = vld [vmem:[#allocation2 + $0x16e8] ss:$16 sps:$4 sm:$0xff]   ;;  %v10963_v50 = vld [vmem:[#allocation2 + $0x1b00] ss:$16 sps:$4 sm:$0xff]  }
 0x35a   :  { %6999 = vmatprep.subr.bf16.mxu0 %v10887_v32  ;;  %v10968_v32 = vld [vmem:[#allocation2 + $0x170c] ss:$16 sps:$4 sm:$0xff]  }
 0x35c   :  { %7574 = vmatpush1.bf16.msra.mxu1 %v10888_v3  ;;  %v10971_v3 = vld [vmem:[#allocation2 + $0x1b24] ss:$16 sps:$4 sm:$0xff]  }
 0x35d   :  { %7000 = vmatpush1.bf16.msra.mxu0 %v10885_v8  ;;  %7575 = vmatprep.subr.bf16.mxu1 %v10896_v14  ;;  %v10966_v8 = vld [vmem:[#allocation2 + $0x1708] ss:$16 sps:$4 sm:$0xff]   ;;  %v10969_v14 = vld [vmem:[#allocation2 + $0x1b20] ss:$16 sps:$4 sm:$0xff]  }
 0x35e   :  { %7001 = vmatprep.subr.bf16.mxu0 %v10893_v11  ;;  %v10974_v11 = vld [vmem:[#allocation2 + $0x172c] ss:$16 sps:$4 sm:$0xff]  }
 0x360   :  { %7576 = vmatpush1.bf16.msra.mxu1 %v10894_v44  ;;  %v10977_v44 = vld [vmem:[#allocation2 + $0x1b44] ss:$16 sps:$4 sm:$0xff]  }
 0x361   :  { %7002 = vmatpush1.bf16.msra.mxu0 %v10891_v15  ;;  %7577 = vmatprep.subr.bf16.mxu1 %v10902_v19  ;;  %v10972_v15 = vld [vmem:[#allocation2 + $0x1728] ss:$16 sps:$4 sm:$0xff]   ;;  %v10975_v19 = vld [vmem:[#allocation2 + $0x1b40] ss:$16 sps:$4 sm:$0xff]  }
 0x362   :  { %7003 = vmatprep.subr.bf16.mxu0 %v10899_v57  ;;  %v10980_v57 = vld [vmem:[#allocation2 + $0x174c] ss:$16 sps:$4 sm:$0xff]  }
 0x364   :  { %7578 = vmatpush1.bf16.msra.mxu1 %v10900_v46  ;;  %v10983_v46 = vld [vmem:[#allocation2 + $0x1b64] ss:$16 sps:$4 sm:$0xff]  }
 0x365   :  { %7004 = vmatpush1.bf16.msra.mxu0 %v10897_v21  ;;  %7579 = vmatprep.subr.bf16.mxu1 %v10908_v25  ;;  %v10978_v21 = vld [vmem:[#allocation2 + $0x1748] ss:$16 sps:$4 sm:$0xff]   ;;  %v10981_v25 = vld [vmem:[#allocation2 + $0x1b60] ss:$16 sps:$4 sm:$0xff]  }
 0x366   :  { %7005 = vmatprep.subr.bf16.mxu0 %v10905_v23  ;;  %v10986_v23 = vld [vmem:[#allocation2 + $0x176c] ss:$16 sps:$4 sm:$0xff]  }
 0x368   :  { %7580 = vmatpush1.bf16.msra.mxu1 %v10906_v28  ;;  %v10992_v28 = vld [vmem:[#allocation2 + $0x178c] ss:$16 sps:$4 sm:$0xff]  }
 0x369   :  { %7006 = vmatpush1.bf16.msra.mxu0 %v10903_v27  ;;  %7581 = vmatprep.subr.bf16.mxu1 %v10914_v1  ;;  %v10989_v27 = vld [vmem:[#allocation2 + $0x1b84] ss:$16 sps:$4 sm:$0xff]   ;;  %v10990_v1 = vld [vmem:[#allocation2 + $0x1788] ss:$16 sps:$4 sm:$0xff]  }
 0x36a   :  { %7007 = vmatprep.subr.bf16.mxu0 %v10911_v29  ;;  %v10987_v29 = vld [vmem:[#allocation2 + $0x1b80] ss:$16 sps:$4 sm:$0xff]  }
 0x36c   :  { %7582 = vmatpush1.bf16.msra.mxu1 %v10912_v34  ;;  %v10998_v34 = vld [vmem:[#allocation2 + $0x17ac] ss:$16 sps:$4 sm:$0xff]  }
 0x36d   :  { %7008 = vmatpush1.bf16.msra.mxu0 %v10909_v33  ;;  %7592 = vmatprep.subr.bf16.mxu1 %v10920_v60  ;;  %v10995_v33 = vld [vmem:[#allocation2 + $0x1ba4] ss:$16 sps:$4 sm:$0xff]   ;;  %v10996_v60 = vld [vmem:[#allocation2 + $0x17a8] ss:$16 sps:$4 sm:$0xff]  }
 0x36e   :  { %7018 = vmatprep.subr.bf16.mxu0 %v10917_v37  ;;  %v10993_v37 = vld [vmem:[#allocation2 + $0x1ba0] ss:$16 sps:$4 sm:$0xff]  }
 0x36f   :  { %7584 = vmatmul.mubr.bf16.vlgmr.msra.gmra.mrb[4].mxu1 %v11880_v6  ;;  %v10938_v6 = vld [vmem:[#allocation2 + $0x166c] ss:$16 sps:$4 sm:$0xff]  }
 0x370   :  { %7010 = vmatmul.mubr.bf16.vlgmr.msra.gmra.mrb[0].mxu0 %v11918_v38  ;;  %7593 = vmatpush1.bf16.msra.mxu1 %v10918_v40  ;;  %v11929_v40 = vld [vmem:[%s11997_s0 + $0x38] sm:$0xff] }
 0x371   :  { %7019 = vmatpush1.bf16.msra.mxu0 %v10915_v39  ;;  %7594 = vmatprep.subr.bf16.mxu1 %v10926_v42  ;;  %v11004_v39 = vld [vmem:[#allocation2 + $0x17cc] ss:$16 sps:$4 sm:$0xff]   ;;  %v11002_v42 = vld [vmem:[#allocation2 + $0x17c8] ss:$16 sps:$4 sm:$0xff]  }
 0x372   :  { %7020 = vmatprep.subr.bf16.mxu0 %v10923_v10  ;;  %7050 = vmatprep.mubr.bf16.mxu0 %v11920_v47  ;;  %v10999_v10 = vld [vmem:[#allocation2 + $0x1bc0] ss:$16 sps:$4 sm:$0xff]  }
 0x373   :  { %7624 = vmatprep.mubr.bf16.mxu1 %v11882_v58  ;;  %v10942_v58 = vld [vmem:[#allocation2 + $0x1688] ss:$16 sps:$4 sm:$0xff]  }
 0x374   :  { %7595 = vmatpush1.bf16.msra.mxu1 %v10924_v45  ;;  %v11010_v45 = vld [vmem:[#allocation2 + $0x17ec] ss:$16 sps:$4 sm:$0xff]  }
 0x375   :  { %7021 = vmatpush1.bf16.msra.mxu0 %v10921_v16  ;;  %7596 = vmatprep.subr.bf16.mxu1 %v10932_v2  ;;  %v11007_v16 = vld [vmem:[#allocation2 + $0x1be4] ss:$16 sps:$4 sm:$0xff]   ;;  %v11005_v2 = vld [vmem:[#allocation2 + $0x1be0] ss:$16 sps:$4 sm:$0xff]  }
 0x376   :  { %7022 = vmatprep.subr.bf16.mxu0 %v10929_v61  ;;  %v11933_v61 = vrot.slane %v11929_v40, %v11685_v49 }
 0x378   :  { %7597 = vmatpush1.bf16.msra.mxu1 %v10930_v48  ;;  %v11014_v48 = vld [vmem:[#allocation2 + $0x1c04] ss:$16 sps:$4 sm:$0xff]  }
 0x379   :  { %7023 = vmatpush1.bf16.msra.mxu0 %v10927_v20  ;;  %7598 = vmatprep.subr.bf16.mxu1 %v10938_v6  ;;  %v11008_v20 = vld [vmem:[#allocation2 + $0x17e8] ss:$16 sps:$4 sm:$0xff]   ;;  %v253_v6 = vcombine.high %v11933_v61, %v11933_v61 }
 0x37a   :  { %7024 = vmatprep.subr.bf16.mxu0 %v10935_v24  ;;  %v11017_v24 = vld [vmem:[#allocation2 + $0x180c] ss:$16 sps:$4 sm:$0xff]  }
 0x37c   :  { %7599 = vmatpush1.bf16.msra.mxu1 %v10936_v53  ;;  %v11012_v53 = vld [vmem:[#allocation2 + $0x1c00] ss:$16 sps:$4 sm:$0xff]  }
 0x37d   :  { %7025 = vmatpush1.bf16.msra.mxu0 %v10933_v52  ;;  %7600 = vmatprep.subr.bf16.mxu1 %v10944_v54  ;;  %v11939_v52 = vpack.c.bf16 %v11912_v18, %v11912_v18  ;;  %v11020_v54 = vld [vmem:[#allocation2 + $0x1c24] ss:$16 sps:$4 sm:$0xff]  }
 0x37e   :  { %7026 = vmatprep.subr.bf16.mxu0 %v10941_v31  ;;  %v11015_v31 = vld [vmem:[#allocation2 + $0x1808] ss:$16 sps:$4 sm:$0xff]   ;;  %v11026_v18 = vld [vmem:[#allocation2 + $0x1c44] ss:$16 sps:$4 sm:$0xff]  }
 0x380   :  { %7601 = vmatpush1.bf16.msra.mxu1 %v10942_v58  ;;  %v11941_v58 = vpack.c.bf16 %v253_v6, %v253_v6  ;;  %v11093_v6 = vld [vmem:[#allocation2 + $0x19a8] ss:$16 sps:$4 sm:$0xff]  }
 0x381   :  { %7027 = vmatpush1.bf16.msra.mxu0 %v10939_v55  ;;  %7602 = vmatprep.subr.bf16.mxu1 %v10950_v59  ;;  %v11023_v55 = vld [vmem:[#allocation2 + $0x182c] ss:$16 sps:$4 sm:$0xff]   ;;  %v11021_v59 = vld [vmem:[#allocation2 + $0x1828] ss:$16 sps:$4 sm:$0xff]  }
 0x382   :  { %7028 = vmatprep.subr.bf16.mxu0 %v10947_v56  ;;  %v11018_v56 = vld [vmem:[#allocation2 + $0x1c20] ss:$16 sps:$4 sm:$0xff]  }
 0x384   :  { %7603 = vmatpush1.bf16.msra.mxu1 %v10948_v36  ;;  %v11024_v36 = vld [vmem:[#allocation2 + $0x1c40] ss:$16 sps:$4 sm:$0xff]  }
 0x385   :  { %7029 = vmatpush1.bf16.msra.mxu0 %v10945_v17  ;;  %7604 = vmatprep.subr.bf16.mxu1 %v10956_v62  ;;  %v11029_v17 = vld [vmem:[#allocation2 + $0x184c] ss:$16 sps:$4 sm:$0xff]   ;;  %v11032_v62 = vld [vmem:[#allocation2 + $0x1c64] ss:$16 sps:$4 sm:$0xff]  }
 0x386   :  { %7030 = vmatprep.subr.bf16.mxu0 %v10953_v51  ;;  %v11027_v51 = vld [vmem:[#allocation2 + $0x1848] ss:$16 sps:$4 sm:$0xff]  }
 0x388   :  { %7605 = vmatpush1.bf16.msra.mxu1 %v10954_v30  ;;  %v11033_v30 = vld [vmem:[#allocation2 + $0x1868] ss:$16 sps:$4 sm:$0xff]  }
 0x389   :  { %7031 = vmatpush1.bf16.msra.mxu0 %v10951_v63  ;;  %7606 = vmatprep.subr.bf16.mxu1 %v10962_v41  ;;  %v11030_v63 = vld [vmem:[#allocation2 + $0x1c60] ss:$16 sps:$4 sm:$0xff]   ;;  %v11041_v41 = vld [vmem:[#allocation2 + $0x188c] ss:$16 sps:$4 sm:$0xff]  }
 0x38a   :  { %7032 = vmatprep.subr.bf16.mxu0 %v10959_v0  ;;  %v11038_v0 = vld [vmem:[#allocation2 + $0x1c84] ss:$16 sps:$4 sm:$0xff]  }
 0x38c   :  { %7607 = vmatpush1.bf16.msra.mxu1 %v10960_v5  ;;  %v11044_v5 = vld [vmem:[#allocation2 + $0x1ca4] ss:$16 sps:$4 sm:$0xff]  }
 0x38d   :  { %7033 = vmatpush1.bf16.msra.mxu0 %v10957_v4  ;;  %7608 = vmatprep.subr.bf16.mxu1 %v10968_v32  ;;  %v11036_v4 = vld [vmem:[#allocation2 + $0x1c80] ss:$16 sps:$4 sm:$0xff]  }
 0x38e   :  { %7034 = vmatprep.subr.bf16.mxu0 %v10965_v35  ;;  %v11047_v35 = vld [vmem:[#allocation2 + $0x18ac] ss:$16 sps:$4 sm:$0xff]   ;;  %v11042_v32 = vld [vmem:[#allocation2 + $0x1ca0] ss:$16 sps:$4 sm:$0xff]  }
 0x390   :  { %7609 = vmatpush1.bf16.msra.mxu1 %v10966_v8  ;;  %v11050_v8 = vld [vmem:[#allocation2 + $0x1cc4] ss:$16 sps:$4 sm:$0xff]  }
 0x391   :  { %7035 = vmatpush1.bf16.msra.mxu0 %v10963_v50  ;;  %7610 = vmatprep.subr.bf16.mxu1 %v10974_v11  ;;  %v11045_v50 = vld [vmem:[#allocation2 + $0x18a8] ss:$16 sps:$4 sm:$0xff]   ;;  %v11048_v11 = vld [vmem:[#allocation2 + $0x1cc0] ss:$16 sps:$4 sm:$0xff]  }
 0x392   :  { %7036 = vmatprep.subr.bf16.mxu0 %v10971_v3  ;;  %v11053_v3 = vld [vmem:[#allocation2 + $0x18cc] ss:$16 sps:$4 sm:$0xff]  }
 0x394   :  { %7611 = vmatpush1.bf16.msra.mxu1 %v10972_v15  ;;  %v11056_v15 = vld [vmem:[#allocation2 + $0x1ce4] ss:$16 sps:$4 sm:$0xff]  }
 0x395   :  { %7037 = vmatpush1.bf16.msra.mxu0 %v10969_v14  ;;  %7612 = vmatprep.subr.bf16.mxu1 %v10980_v57  ;;  %v11051_v14 = vld [vmem:[#allocation2 + $0x18c8] ss:$16 sps:$4 sm:$0xff]   ;;  %v11054_v57 = vld [vmem:[#allocation2 + $0x1ce0] ss:$16 sps:$4 sm:$0xff]  }
 0x396   :  { %7038 = vmatprep.subr.bf16.mxu0 %v10977_v44  ;;  %v11059_v44 = vld [vmem:[#allocation2 + $0x18ec] ss:$16 sps:$4 sm:$0xff]  }
 0x398   :  { %7613 = vmatpush1.bf16.msra.mxu1 %v10978_v21  ;;  %v11062_v21 = vld [vmem:[#allocation2 + $0x1d04] ss:$16 sps:$4 sm:$0xff]  }
 0x399   :  { %7039 = vmatpush1.bf16.msra.mxu0 %v10975_v19  ;;  %7614 = vmatprep.subr.bf16.mxu1 %v10986_v23  ;;  %v11057_v19 = vld [vmem:[#allocation2 + $0x18e8] ss:$16 sps:$4 sm:$0xff]   ;;  %v11060_v23 = vld [vmem:[#allocation2 + $0x1d00] ss:$16 sps:$4 sm:$0xff]  }
 0x39a   :  { %7040 = vmatprep.subr.bf16.mxu0 %v10983_v46  ;;  %v11065_v46 = vld [vmem:[#allocation2 + $0x190c] ss:$16 sps:$4 sm:$0xff]  }
 0x39c   :  { %7615 = vmatpush1.bf16.msra.mxu1 %v10984_v26  ;;  %v11068_v26 = vld [vmem:[#allocation2 + $0x1d24] ss:$16 sps:$4 sm:$0xff]  }
 0x39d   :  { %7041 = vmatpush1.bf16.msra.mxu0 %v10981_v25  ;;  %7616 = vmatprep.subr.bf16.mxu1 %v10992_v28  ;;  %v11063_v25 = vld [vmem:[#allocation2 + $0x1908] ss:$16 sps:$4 sm:$0xff]   ;;  %v11066_v28 = vld [vmem:[#allocation2 + $0x1d20] ss:$16 sps:$4 sm:$0xff]  }
 0x39e   :  { %7042 = vmatprep.subr.bf16.mxu0 %v10989_v27  ;;  %v11071_v27 = vld [vmem:[#allocation2 + $0x192c] ss:$16 sps:$4 sm:$0xff]  }
 0x3a0   :  { %7617 = vmatpush1.bf16.msra.mxu1 %v10990_v1  ;;  %v11074_v1 = vld [vmem:[#allocation2 + $0x1d44] ss:$16 sps:$4 sm:$0xff]  }
 0x3a1   :  { %7043 = vmatpush1.bf16.msra.mxu0 %v10987_v29  ;;  %7618 = vmatprep.subr.bf16.mxu1 %v10998_v34  ;;  %v11069_v29 = vld [vmem:[#allocation2 + $0x1928] ss:$16 sps:$4 sm:$0xff]   ;;  %v11072_v34 = vld [vmem:[#allocation2 + $0x1d40] ss:$16 sps:$4 sm:$0xff]  }
 0x3a2   :  { %7044 = vmatprep.subr.bf16.mxu0 %v10995_v33  ;;  %v11077_v33 = vld [vmem:[#allocation2 + $0x194c] ss:$16 sps:$4 sm:$0xff]  }
 0x3a4   :  { %7619 = vmatpush1.bf16.msra.mxu1 %v10996_v60  ;;  %v11080_v60 = vld [vmem:[#allocation2 + $0x1d64] ss:$16 sps:$4 sm:$0xff]  }
 0x3a5   :  { %7045 = vmatpush1.bf16.msra.mxu0 %v10993_v37  ;;  %7620 = vmatprep.subr.bf16.mxu1 %v11004_v39  ;;  %v11075_v37 = vld [vmem:[#allocation2 + $0x1948] ss:$16 sps:$4 sm:$0xff]   ;;  %v11078_v39 = vld [vmem:[#allocation2 + $0x1d60] ss:$16 sps:$4 sm:$0xff]  }
 0x3a6   :  { %7046 = vmatprep.subr.bf16.mxu0 %v11001_v9  ;;  %v11083_v9 = vld [vmem:[#allocation2 + $0x196c] ss:$16 sps:$4 sm:$0xff]  }
 0x3a8   :  { %7621 = vmatpush1.bf16.msra.mxu1 %v11002_v42  ;;  %v11086_v42 = vld [vmem:[#allocation2 + $0x1d84] ss:$16 sps:$4 sm:$0xff]  }
 0x3a9   :  { %7047 = vmatpush1.bf16.msra.mxu0 %v10999_v10  ;;  %7622 = vmatprep.subr.bf16.mxu1 %v11010_v45  ;;  %v11081_v10 = vld [vmem:[#allocation2 + $0x1968] ss:$16 sps:$4 sm:$0xff]   ;;  %v11084_v45 = vld [vmem:[#allocation2 + $0x1d80] ss:$16 sps:$4 sm:$0xff]  }
 0x3aa   :  { %7048 = vmatprep.subr.bf16.mxu0 %v11007_v16  ;;  %v11089_v16 = vld [vmem:[#allocation2 + $0x198c] ss:$16 sps:$4 sm:$0xff]  }
 0x3ac   :  { %7623 = vmatpush1.bf16.msra.mxu1 %v11008_v20  ;;  %v11092_v20 = vld [vmem:[#allocation2 + $0x1da4] ss:$16 sps:$4 sm:$0xff]  }
 0x3ad   :  { %7049 = vmatpush1.bf16.msra.mxu0 %v11005_v2  ;;  %7633 = vmatprep.subr.bf16.mxu1 %v11017_v24  ;;  %v11087_v2 = vld [vmem:[#allocation2 + $0x1988] ss:$16 sps:$4 sm:$0xff]   ;;  %v11090_v24 = vld [vmem:[#allocation2 + $0x1da0] ss:$16 sps:$4 sm:$0xff]  }
 0x3ae   :  { %7059 = vmatprep.subr.bf16.mxu0 %v11014_v48  ;;  %v11095_v48 = vld [vmem:[#allocation2 + $0x19ac] ss:$16 sps:$4 sm:$0xff]  }
 0x3af   :  { %7625 = vmatmul.mubr.bf16.vlgmr.msra.gmra.mrb[4].mxu1 %v11901_v22  ;;  %v11035_v22 = vld [vmem:[#allocation2 + $0x186c] ss:$16 sps:$4 sm:$0xff]  }
 0x3b0   :  { %7051 = vmatmul.mubr.bf16.vlgmr.msra.gmra.mrb[0].mxu0 %v11939_v52  ;;  %7634 = vmatpush1.bf16.msra.mxu1 %v11015_v31  ;;  %v11101_v31 = vld [vmem:[#allocation2 + $0x19cc] ss:$16 sps:$4 sm:$0xff]  }
 0x3b1   :  { %7060 = vmatpush1.bf16.msra.mxu0 %v11012_v53  ;;  %7635 = vmatprep.subr.bf16.mxu1 %v11023_v55  ;;  %v11098_v53 = vld [vmem:[#allocation2 + $0x1dc4] ss:$16 sps:$4 sm:$0xff]   ;;  %v11096_v55 = vld [vmem:[#allocation2 + $0x1dc0] ss:$16 sps:$4 sm:$0xff]  }
 0x3b2   :  { %7061 = vmatprep.subr.bf16.mxu0 %v11020_v54  ;;  %7091 = vmatprep.mubr.bf16.mxu0 %v11941_v58  ;;  %v238_v54 = vcombine.high %v11929_v40, %v11929_v40 }
 0x3b3   :  { %7665 = vmatprep.mubr.bf16.mxu1 %v11903_v7  ;;  %v11039_v7 = vld [vmem:[#allocation2 + $0x1888] ss:$16 sps:$4 sm:$0xff]  }
 0x3b4   :  { %7636 = vmatpush1.bf16.msra.mxu1 %v11021_v59  ;;  %v11104_v59 = vld [vmem:[#allocation2 + $0x1de4] ss:$16 sps:$4 sm:$0xff]  }
 0x3b5   :  { %7062 = vmatpush1.bf16.msra.mxu0 %v11018_v56  ;;  %7637 = vmatprep.subr.bf16.mxu1 %v11029_v17  ;;  %v11099_v56 = vld [vmem:[#allocation2 + $0x19c8] ss:$16 sps:$4 sm:$0xff]   ;;  %v11950_v17 = vrot.slane %v238_v54, %v11685_v49  ;;  %v11182_v54 = vld [vmem:[#allocation2 + $0x1f84] ss:$16 sps:$4 sm:$0xff]  }
 0x3b6   :  { %7063 = vmatprep.subr.bf16.mxu0 %v11026_v18  ;;  %v11107_v18 = vld [vmem:[#allocation2 + $0x19ec] ss:$16 sps:$4 sm:$0xff]   ;;  %v11111_v49 = vld [vmem:[#allocation2 + $0x1a08] ss:$16 sps:$4 sm:$0xff]  }
 0x3b7   :  { %v254_v40 = vcombine.high %v11950_v17, %v11950_v17 }
 0x3b8   :  { %7638 = vmatpush1.bf16.msra.mxu1 %v11027_v51  ;;  %v11105_v51 = vld [vmem:[#allocation2 + $0x19e8] ss:$16 sps:$4 sm:$0xff]  }
 0x3b9   :  { %7064 = vmatpush1.bf16.msra.mxu0 %v11024_v36  ;;  %7639 = vmatprep.subr.bf16.mxu1 %v11035_v22  ;;  %v11102_v36 = vld [vmem:[#allocation2 + $0x1de0] ss:$16 sps:$4 sm:$0xff]   ;;  %v11113_v22 = vld [vmem:[#allocation2 + $0x1a0c] ss:$16 sps:$4 sm:$0xff]  }
 0x3ba   :  { %7065 = vmatprep.subr.bf16.mxu0 %v11032_v62  ;;  %v11110_v62 = vld [vmem:[#allocation2 + $0x1e04] ss:$16 sps:$4 sm:$0xff]  }
 0x3bc   :  { %7640 = vmatpush1.bf16.msra.mxu1 %v11033_v30  ;;  %v11108_v30 = vld [vmem:[#allocation2 + $0x1e00] ss:$16 sps:$4 sm:$0xff]  }
 0x3bd   :  { %7066 = vmatpush1.bf16.msra.mxu0 %v11030_v63  ;;  %7641 = vmatprep.subr.bf16.mxu1 %v11041_v41  ;;  %v11956_v63 = vpack.c.bf16 %v11933_v61, %v11933_v61  ;;  %v11119_v41 = vld [vmem:[#allocation2 + $0x1a2c] ss:$16 sps:$4 sm:$0xff]   ;;  %v11122_v61 = vld [vmem:[#allocation2 + $0x1e44] ss:$16 sps:$4 sm:$0xff]  }
 0x3be   :  { %7067 = vmatprep.subr.bf16.mxu0 %v11038_v0  ;;  %v11116_v0 = vld [vmem:[#allocation2 + $0x1e24] ss:$16 sps:$4 sm:$0xff]  }
 0x3c0   :  { %7642 = vmatpush1.bf16.msra.mxu1 %v11039_v7  ;;  %v11114_v7 = vld [vmem:[#allocation2 + $0x1e20] ss:$16 sps:$4 sm:$0xff]  }
 0x3c1   :  { %7068 = vmatpush1.bf16.msra.mxu0 %v11036_v4  ;;  %7643 = vmatprep.subr.bf16.mxu1 %v11047_v35  ;;  %v11958_v4 = vpack.c.bf16 %v254_v40, %v254_v40  ;;  %v11125_v35 = vld [vmem:[#allocation2 + $0x1a4c] ss:$16 sps:$4 sm:$0xff]  }
 0x3c2   :  { %7069 = vmatprep.subr.bf16.mxu0 %v11044_v5  ;;  %v11117_v5 = vld [vmem:[#allocation2 + $0x1a28] ss:$16 sps:$4 sm:$0xff]   ;;  %v11197_v40 = vld [vmem:[#allocation2 + $0x1bcc] ss:$16 sps:$4 sm:$0xff]  }
 0x3c4   :  { %7644 = vmatpush1.bf16.msra.mxu1 %v11045_v50  ;;  %v11123_v50 = vld [vmem:[#allocation2 + $0x1a48] ss:$16 sps:$4 sm:$0xff]  }
 0x3c5   :  { %7070 = vmatpush1.bf16.msra.mxu0 %v11042_v32  ;;  %7645 = vmatprep.subr.bf16.mxu1 %v11053_v3  ;;  %v11120_v32 = vld [vmem:[#allocation2 + $0x1e40] ss:$16 sps:$4 sm:$0xff]  }
 0x3c6   :  { %7071 = vmatprep.subr.bf16.mxu0 %v11050_v8  ;;  %v11128_v8 = vld [vmem:[#allocation2 + $0x1e64] ss:$16 sps:$4 sm:$0xff]   ;;  %v11126_v3 = vld [vmem:[#allocation2 + $0x1e60] ss:$16 sps:$4 sm:$0xff]  }
 0x3c8   :  { %7646 = vmatpush1.bf16.msra.mxu1 %v11051_v14  ;;  %v11134_v14 = vld [vmem:[#allocation2 + $0x1e84] ss:$16 sps:$4 sm:$0xff]  }
 0x3c9   :  { %7072 = vmatpush1.bf16.msra.mxu0 %v11048_v11  ;;  %7647 = vmatprep.subr.bf16.mxu1 %v11059_v44  ;;  %v11129_v11 = vld [vmem:[#allocation2 + $0x1a68] ss:$16 sps:$4 sm:$0xff]   ;;  %v11132_v44 = vld [vmem:[#allocation2 + $0x1e80] ss:$16 sps:$4 sm:$0xff]  }
 0x3ca   :  { %7073 = vmatprep.subr.bf16.mxu0 %v11056_v15  ;;  %v11137_v15 = vld [vmem:[#allocation2 + $0x1a8c] ss:$16 sps:$4 sm:$0xff]  }
 0x3cc   :  { %7648 = vmatpush1.bf16.msra.mxu1 %v11057_v19  ;;  %v11143_v19 = vld [vmem:[#allocation2 + $0x1aac] ss:$16 sps:$4 sm:$0xff]  }
 0x3cd   :  { %7074 = vmatpush1.bf16.msra.mxu0 %v11054_v57  ;;  %7649 = vmatprep.subr.bf16.mxu1 %v11065_v46  ;;  %v11140_v57 = vld [vmem:[#allocation2 + $0x1ea4] ss:$16 sps:$4 sm:$0xff]   ;;  %v11141_v46 = vld [vmem:[#allocation2 + $0x1aa8] ss:$16 sps:$4 sm:$0xff]  }
 0x3ce   :  { %7075 = vmatprep.subr.bf16.mxu0 %v11062_v21  ;;  %v11138_v21 = vld [vmem:[#allocation2 + $0x1ea0] ss:$16 sps:$4 sm:$0xff]  }
 0x3d0   :  { %7650 = vmatpush1.bf16.msra.mxu1 %v11063_v25  ;;  %v11149_v25 = vld [vmem:[#allocation2 + $0x1acc] ss:$16 sps:$4 sm:$0xff]  }
 0x3d1   :  { %7076 = vmatpush1.bf16.msra.mxu0 %v11060_v23  ;;  %7651 = vmatprep.subr.bf16.mxu1 %v11071_v27  ;;  %v11146_v23 = vld [vmem:[#allocation2 + $0x1ec4] ss:$16 sps:$4 sm:$0xff]   ;;  %v11147_v27 = vld [vmem:[#allocation2 + $0x1ac8] ss:$16 sps:$4 sm:$0xff]  }
 0x3d2   :  { %7077 = vmatprep.subr.bf16.mxu0 %v11068_v26  ;;  %v11144_v26 = vld [vmem:[#allocation2 + $0x1ec0] ss:$16 sps:$4 sm:$0xff]  }
 0x3d4   :  { %7652 = vmatpush1.bf16.msra.mxu1 %v11069_v29  ;;  %v11155_v29 = vld [vmem:[#allocation2 + $0x1aec] ss:$16 sps:$4 sm:$0xff]  }
 0x3d5   :  { %7078 = vmatpush1.bf16.msra.mxu0 %v11066_v28  ;;  %7653 = vmatprep.subr.bf16.mxu1 %v11077_v33  ;;  %v11152_v28 = vld [vmem:[#allocation2 + $0x1ee4] ss:$16 sps:$4 sm:$0xff]   ;;  %v11153_v33 = vld [vmem:[#allocation2 + $0x1ae8] ss:$16 sps:$4 sm:$0xff]  }
 0x3d6   :  { %7079 = vmatprep.subr.bf16.mxu0 %v11074_v1  ;;  %v11150_v1 = vld [vmem:[#allocation2 + $0x1ee0] ss:$16 sps:$4 sm:$0xff]  }
 0x3d8   :  { %7654 = vmatpush1.bf16.msra.mxu1 %v11075_v37  ;;  %v11161_v37 = vld [vmem:[#allocation2 + $0x1b0c] ss:$16 sps:$4 sm:$0xff]  }
 0x3d9   :  { %7080 = vmatpush1.bf16.msra.mxu0 %v11072_v34  ;;  %7655 = vmatprep.subr.bf16.mxu1 %v11083_v9  ;;  %v11158_v34 = vld [vmem:[#allocation2 + $0x1f04] ss:$16 sps:$4 sm:$0xff]   ;;  %v11159_v9 = vld [vmem:[#allocation2 + $0x1b08] ss:$16 sps:$4 sm:$0xff]  }
 0x3da   :  { %7081 = vmatprep.subr.bf16.mxu0 %v11080_v60  ;;  %v11156_v60 = vld [vmem:[#allocation2 + $0x1f00] ss:$16 sps:$4 sm:$0xff]  }
 0x3dc   :  { %7656 = vmatpush1.bf16.msra.mxu1 %v11081_v10  ;;  %v11167_v10 = vld [vmem:[#allocation2 + $0x1b2c] ss:$16 sps:$4 sm:$0xff]  }
 0x3dd   :  { %7082 = vmatpush1.bf16.msra.mxu0 %v11078_v39  ;;  %7657 = vmatprep.subr.bf16.mxu1 %v11089_v16  ;;  %v11164_v39 = vld [vmem:[#allocation2 + $0x1f24] ss:$16 sps:$4 sm:$0xff]   ;;  %v11165_v16 = vld [vmem:[#allocation2 + $0x1b28] ss:$16 sps:$4 sm:$0xff]  }
 0x3de   :  { %7083 = vmatprep.subr.bf16.mxu0 %v11086_v42  ;;  %v11162_v42 = vld [vmem:[#allocation2 + $0x1f20] ss:$16 sps:$4 sm:$0xff]  }
 0x3e0   :  { %7658 = vmatpush1.bf16.msra.mxu1 %v11087_v2  ;;  %v11173_v2 = vld [vmem:[#allocation2 + $0x1b4c] ss:$16 sps:$4 sm:$0xff]  }
 0x3e1   :  { %7084 = vmatpush1.bf16.msra.mxu0 %v11084_v45  ;;  %7659 = vmatprep.subr.bf16.mxu1 %v11095_v48  ;;  %v11170_v45 = vld [vmem:[#allocation2 + $0x1f44] ss:$16 sps:$4 sm:$0xff]   ;;  %v11171_v48 = vld [vmem:[#allocation2 + $0x1b48] ss:$16 sps:$4 sm:$0xff]  }
 0x3e2   :  { %7085 = vmatprep.subr.bf16.mxu0 %v11092_v20  ;;  %v11168_v20 = vld [vmem:[#allocation2 + $0x1f40] ss:$16 sps:$4 sm:$0xff]  }
 0x3e4   :  { %7660 = vmatpush1.bf16.msra.mxu1 %v11093_v6  ;;  %v11179_v6 = vld [vmem:[#allocation2 + $0x1b6c] ss:$16 sps:$4 sm:$0xff]  }
 0x3e5   :  { %7086 = vmatpush1.bf16.msra.mxu0 %v11090_v24  ;;  %7661 = vmatprep.subr.bf16.mxu1 %v11101_v31  ;;  %v11176_v24 = vld [vmem:[#allocation2 + $0x1f64] ss:$16 sps:$4 sm:$0xff]   ;;  %v11177_v31 = vld [vmem:[#allocation2 + $0x1b68] ss:$16 sps:$4 sm:$0xff]  }
 0x3e6   :  { %7087 = vmatprep.subr.bf16.mxu0 %v11098_v53  ;;  %v11174_v53 = vld [vmem:[#allocation2 + $0x1f60] ss:$16 sps:$4 sm:$0xff]  }
 0x3e8   :  { %7662 = vmatpush1.bf16.msra.mxu1 %v11099_v56  ;;  %v11180_v56 = vld [vmem:[#allocation2 + $0x1f80] ss:$16 sps:$4 sm:$0xff]  }
 0x3e9   :  { %7088 = vmatpush1.bf16.msra.mxu0 %v11096_v55  ;;  %7663 = vmatprep.subr.bf16.mxu1 %v11107_v18  ;;  %v11185_v55 = vld [vmem:[#allocation2 + $0x1b8c] ss:$16 sps:$4 sm:$0xff]   ;;  %v11188_v18 = vld [vmem:[#allocation2 + $0x1fa4] ss:$16 sps:$4 sm:$0xff]  }
 0x3ea   :  { %7089 = vmatprep.subr.bf16.mxu0 %v11104_v59  ;;  %v11183_v59 = vld [vmem:[#allocation2 + $0x1b88] ss:$16 sps:$4 sm:$0xff]  }
 0x3ec   :  { %7664 = vmatpush1.bf16.msra.mxu1 %v11105_v51  ;;  %v11186_v51 = vld [vmem:[#allocation2 + $0x1fa0] ss:$16 sps:$4 sm:$0xff]  }
 0x3ed   :  { %7090 = vmatpush1.bf16.msra.mxu0 %v11102_v36  ;;  %7674 = vmatprep.subr.bf16.mxu1 %v11113_v22  ;;  %v11191_v36 = vld [vmem:[#allocation2 + $0x1bac] ss:$16 sps:$4 sm:$0xff]   ;;  %v11194_v22 = vld [vmem:[#allocation2 + $0x1fc4] ss:$16 sps:$4 sm:$0xff]  }
 0x3ee   :  { %7100 = vmatprep.subr.bf16.mxu0 %v11110_v62  ;;  %v11189_v62 = vld [vmem:[#allocation2 + $0x1ba8] ss:$16 sps:$4 sm:$0xff]  }
 0x3ef   :  { %7666 = vmatmul.mubr.bf16.vlgmr.msra.gmra.mrb[4].mxu1 %v11918_v38  ;;  %v11131_v38 = vld [vmem:[#allocation2 + $0x1a6c] ss:$16 sps:$4 sm:$0xff]  }
 0x3f0   :  { %7092 = vmatmul.mubr.bf16.vlgmr.msra.gmra.mrb[0].mxu0 %v11956_v63  ;;  %7675 = vmatpush1.bf16.msra.mxu1 %v11111_v49  ;;  %v11195_v49 = vld [vmem:[#allocation2 + $0x1bc8] ss:$16 sps:$4 sm:$0xff]  }
 0x3f1   :  { %7101 = vmatpush1.bf16.msra.mxu0 %v11108_v30  ;;  %7676 = vmatprep.subr.bf16.mxu1 %v11119_v41  ;;  %v11192_v30 = vld [vmem:[#allocation2 + $0x1fc0] ss:$16 sps:$4 sm:$0xff]   ;;  %v11203_v41 = vld [vmem:[#allocation2 + $0x1bec] ss:$16 sps:$4 sm:$0xff]  }
 0x3f2   :  { %7102 = vmatprep.subr.bf16.mxu0 %v11116_v0  ;;  %7132 = vmatprep.mubr.bf16.mxu0 %v11958_v4  ;;  %v11200_v0 = vld [vmem:[#allocation2 + $0x1fe4] ss:$16 sps:$4 sm:$0xff]  }
 0x3f3   :  { %7706 = vmatprep.mubr.bf16.mxu1 %v11920_v47  ;;  %v11135_v47 = vld [vmem:[#allocation2 + $0x1a88] ss:$16 sps:$4 sm:$0xff]  }
 0x3f4   :  { %7677 = vmatpush1.bf16.msra.mxu1 %v11117_v5  ;;  %v11201_v5 = vld [vmem:[#allocation2 + $0x1be8] ss:$16 sps:$4 sm:$0xff]  }
 0x3f5   :  { %7103 = vmatpush1.bf16.msra.mxu0 %v11114_v7  ;;  %7678 = vmatprep.subr.bf16.mxu1 %v11125_v35  ;;  %v11198_v7 = vld [vmem:[#allocation2 + $0x1fe0] ss:$16 sps:$4 sm:$0xff]   ;;  %v11966_v35 = vpack.c.bf16 %v11950_v17, %v11950_v17  ;;  %v11304_v17 = vld [vmem:[#allocation6 + $0x10] ss:$8 sps:$4 sm:$0xff]  }
 0x3f6   :  { %7104 = vmatprep.subr.bf16.mxu0 %v11122_v61  ;;  %v11207_v61 = vld [vmem:[#allocation2 + $0x1c0c] ss:$16 sps:$4 sm:$0xff]  }
 0x3f8   :  { %7679 = vmatpush1.bf16.msra.mxu1 %v11123_v50  ;;  %v11210_v50 = vld [vmem:[#allocation2 + $0x1c2c] ss:$16 sps:$4 sm:$0xff]  }
 0x3f9   :  { %7105 = vmatpush1.bf16.msra.mxu0 %v11120_v32  ;;  %7680 = vmatprep.subr.bf16.mxu1 %v11131_v38  ;;  %v11205_v32 = vld [vmem:[#allocation2 + $0x1c08] ss:$16 sps:$4 sm:$0xff]  }
 0x3fa   :  { %7106 = vmatprep.subr.bf16.mxu0 %v11128_v8  ;;  %v11301_v8 = vld [vmem:[#allocation6] ss:$8 sps:$4 sm:$0xff]   ;;  %v11303_v38 = vld [vmem:[#allocation6 + $0x4] ss:$8 sps:$4 sm:$0xff]  }
 0x3fc   :  { %7681 = vmatpush1.bf16.msra.mxu1 %v11129_v11  ;;  %v11306_v11 = vld [vmem:[#allocation6 + $0x14] ss:$8 sps:$4 sm:$0xff]  }
 0x3fd   :  { %7107 = vmatpush1.bf16.msra.mxu0 %v11126_v3  ;;  %7682 = vmatprep.subr.bf16.mxu1 %v11137_v15  ;;  %v11208_v3 = vld [vmem:[#allocation2 + $0x1c28] ss:$16 sps:$4 sm:$0xff]  }
 0x3fe   :  { %7108 = vmatprep.subr.bf16.mxu0 %v11134_v14  ;;  %v11213_v14 = vld [vmem:[#allocation2 + $0x1c4c] ss:$16 sps:$4 sm:$0xff]   ;;  %v11309_v15 = vld [vmem:[#allocation6 + $0x24] ss:$8 sps:$4 sm:$0xff]  }
 0x400   :  { %7683 = vmatpush1.bf16.msra.mxu1 %v11135_v47  ;;  %v11216_v47 = vld [vmem:[#allocation2 + $0x1c6c] ss:$16 sps:$4 sm:$0xff]  }
 0x401   :  { %7109 = vmatpush1.bf16.msra.mxu0 %v11132_v44  ;;  %7684 = vmatprep.subr.bf16.mxu1 %v11143_v19  ;;  %v11211_v44 = vld [vmem:[#allocation2 + $0x1c48] ss:$16 sps:$4 sm:$0xff]  }
 0x402   :  { %7110 = vmatprep.subr.bf16.mxu0 %v11140_v57  ;;  %v11312_v57 = vld [vmem:[#allocation6 + $0x34] ss:$8 sps:$4 sm:$0xff]  }
 0x403   :  { %v11214_v19 = vld [vmem:[#allocation2 + $0x1c68] ss:$16 sps:$4 sm:$0xff]  }
 0x404   :  { %7685 = vmatpush1.bf16.msra.mxu1 %v11141_v46  ;;  %v11315_v46 = vld [vmem:[#allocation6 + $0x44] ss:$8 sps:$4 sm:$0xff]  }
 0x405   :  { %7111 = vmatpush1.bf16.msra.mxu0 %v11138_v21  ;;  %7686 = vmatprep.subr.bf16.mxu1 %v11149_v25  ;;  %v11310_v21 = vld [vmem:[#allocation6 + $0x30] ss:$8 sps:$4 sm:$0xff]  }
 0x406   :  { %7112 = vmatprep.subr.bf16.mxu0 %v11146_v23  ;;  %v11217_v23 = vld [vmem:[#allocation2 + $0x1c88] ss:$16 sps:$4 sm:$0xff]   ;;  %v11222_v25 = vld [vmem:[#allocation2 + $0x1cac] ss:$16 sps:$4 sm:$0xff]  }
 0x408   :  { %7687 = vmatpush1.bf16.msra.mxu1 %v11147_v27  ;;  %v11318_v27 = vld [vmem:[#allocation6 + $0x54] ss:$8 sps:$4 sm:$0xff]  }
 0x409   :  { %7113 = vmatpush1.bf16.msra.mxu0 %v11144_v26  ;;  %7688 = vmatprep.subr.bf16.mxu1 %v11155_v29  ;;  %v11313_v26 = vld [vmem:[#allocation6 + $0x40] ss:$8 sps:$4 sm:$0xff]  }
 0x40a   :  { %7114 = vmatprep.subr.bf16.mxu0 %v11152_v28  ;;  %v11220_v28 = vld [vmem:[#allocation2 + $0x1ca8] ss:$16 sps:$4 sm:$0xff]   ;;  %v11225_v29 = vld [vmem:[#allocation2 + $0x1ccc] ss:$16 sps:$4 sm:$0xff]  }
 0x40c   :  { %7689 = vmatpush1.bf16.msra.mxu1 %v11153_v33  ;;  %v11321_v33 = vld [vmem:[#allocation6 + $0x64] ss:$8 sps:$4 sm:$0xff]  }
 0x40d   :  { %7115 = vmatpush1.bf16.msra.mxu0 %v11150_v1  ;;  %7690 = vmatprep.subr.bf16.mxu1 %v11161_v37  ;;  %v11316_v1 = vld [vmem:[#allocation6 + $0x50] ss:$8 sps:$4 sm:$0xff]  }
 0x40e   :  { %7116 = vmatprep.subr.bf16.mxu0 %v11158_v34  ;;  %v11223_v34 = vld [vmem:[#allocation2 + $0x1cc8] ss:$16 sps:$4 sm:$0xff]   ;;  %v11228_v37 = vld [vmem:[#allocation2 + $0x1cec] ss:$16 sps:$4 sm:$0xff]  }
 0x410   :  { %7691 = vmatpush1.bf16.msra.mxu1 %v11159_v9  ;;  %v11324_v9 = vld [vmem:[#allocation6 + $0x74] ss:$8 sps:$4 sm:$0xff]  }
 0x411   :  { %7117 = vmatpush1.bf16.msra.mxu0 %v11156_v60  ;;  %7692 = vmatprep.subr.bf16.mxu1 %v11167_v10  ;;  %v11319_v60 = vld [vmem:[#allocation6 + $0x60] ss:$8 sps:$4 sm:$0xff]  }
 0x412   :  { %7118 = vmatprep.subr.bf16.mxu0 %v11164_v39  ;;  %v11226_v39 = vld [vmem:[#allocation2 + $0x1ce8] ss:$16 sps:$4 sm:$0xff]   ;;  %v11231_v10 = vld [vmem:[#allocation2 + $0x1d0c] ss:$16 sps:$4 sm:$0xff]  }
 0x414   :  { %7693 = vmatpush1.bf16.msra.mxu1 %v11165_v16  ;;  %v11327_v16 = vld [vmem:[#allocation6 + $0x84] ss:$8 sps:$4 sm:$0xff]  }
 0x415   :  { %7119 = vmatpush1.bf16.msra.mxu0 %v11162_v42  ;;  %7694 = vmatprep.subr.bf16.mxu1 %v11173_v2  ;;  %v11322_v42 = vld [vmem:[#allocation6 + $0x70] ss:$8 sps:$4 sm:$0xff]  }
 0x416   :  { %7120 = vmatprep.subr.bf16.mxu0 %v11170_v45  ;;  %v11229_v45 = vld [vmem:[#allocation2 + $0x1d08] ss:$16 sps:$4 sm:$0xff]   ;;  %v11234_v2 = vld [vmem:[#allocation2 + $0x1d2c] ss:$16 sps:$4 sm:$0xff]  }
 0x418   :  { %7695 = vmatpush1.bf16.msra.mxu1 %v11171_v48  ;;  %v11330_v48 = vld [vmem:[#allocation6 + $0x94] ss:$8 sps:$4 sm:$0xff]  }
 0x419   :  { %7121 = vmatpush1.bf16.msra.mxu0 %v11168_v20  ;;  %7696 = vmatprep.subr.bf16.mxu1 %v11179_v6  ;;  %v11325_v20 = vld [vmem:[#allocation6 + $0x80] ss:$8 sps:$4 sm:$0xff]  }
 0x41a   :  { %7122 = vmatprep.subr.bf16.mxu0 %v11176_v24  ;;  %v11232_v24 = vld [vmem:[#allocation2 + $0x1d28] ss:$16 sps:$4 sm:$0xff]   ;;  %v11237_v6 = vld [vmem:[#allocation2 + $0x1d4c] ss:$16 sps:$4 sm:$0xff]  }
 0x41c   :  { %7697 = vmatpush1.bf16.msra.mxu1 %v11177_v31  ;;  %v11333_v31 = vld [vmem:[#allocation6 + $0xa4] ss:$8 sps:$4 sm:$0xff]  }
 0x41d   :  { %7123 = vmatpush1.bf16.msra.mxu0 %v11174_v53  ;;  %7698 = vmatprep.subr.bf16.mxu1 %v11185_v55  ;;  %v11328_v53 = vld [vmem:[#allocation6 + $0x90] ss:$8 sps:$4 sm:$0xff]  }
 0x41e   :  { %7124 = vmatprep.subr.bf16.mxu0 %v11182_v54  ;;  %v11235_v54 = vld [vmem:[#allocation2 + $0x1d48] ss:$16 sps:$4 sm:$0xff]   ;;  %v11240_v55 = vld [vmem:[#allocation2 + $0x1d6c] ss:$16 sps:$4 sm:$0xff]  }
 0x420   :  { %7699 = vmatpush1.bf16.msra.mxu1 %v11183_v59  ;;  %v11336_v59 = vld [vmem:[#allocation6 + $0xb4] ss:$8 sps:$4 sm:$0xff]  }
 0x421   :  { %7125 = vmatpush1.bf16.msra.mxu0 %v11180_v56  ;;  %7700 = vmatprep.subr.bf16.mxu1 %v11191_v36  ;;  %v11331_v56 = vld [vmem:[#allocation6 + $0xa0] ss:$8 sps:$4 sm:$0xff]  }
 0x422   :  { %7126 = vmatprep.subr.bf16.mxu0 %v11188_v18  ;;  %v11238_v18 = vld [vmem:[#allocation2 + $0x1d68] ss:$16 sps:$4 sm:$0xff]   ;;  %v11243_v36 = vld [vmem:[#allocation2 + $0x1d8c] ss:$16 sps:$4 sm:$0xff]  }
 0x424   :  { %7701 = vmatpush1.bf16.msra.mxu1 %v11189_v62  ;;  %v11339_v62 = vld [vmem:[#allocation6 + $0xc4] ss:$8 sps:$4 sm:$0xff]  }
 0x425   :  { %7127 = vmatpush1.bf16.msra.mxu0 %v11186_v51  ;;  %7702 = vmatprep.subr.bf16.mxu1 %v11197_v40  ;;  %v11334_v51 = vld [vmem:[#allocation6 + $0xb0] ss:$8 sps:$4 sm:$0xff]  }
 0x426   :  { %7128 = vmatprep.subr.bf16.mxu0 %v11194_v22  ;;  %v11241_v22 = vld [vmem:[#allocation2 + $0x1d88] ss:$16 sps:$4 sm:$0xff]   ;;  %v11246_v40 = vld [vmem:[#allocation2 + $0x1dac] ss:$16 sps:$4 sm:$0xff]  }
 0x428   :  { %7703 = vmatpush1.bf16.msra.mxu1 %v11195_v49  ;;  %v11342_v49 = vld [vmem:[#allocation6 + $0xd4] ss:$8 sps:$4 sm:$0xff]  }
 0x429   :  { %7129 = vmatpush1.bf16.msra.mxu0 %v11192_v30  ;;  %7704 = vmatprep.subr.bf16.mxu1 %v11203_v41  ;;  %v11337_v30 = vld [vmem:[#allocation6 + $0xc0] ss:$8 sps:$4 sm:$0xff]  }
 0x42a   :  { %7130 = vmatprep.subr.bf16.mxu0 %v11200_v0  ;;  %v11244_v0 = vld [vmem:[#allocation2 + $0x1da8] ss:$16 sps:$4 sm:$0xff]   ;;  %v11249_v41 = vld [vmem:[#allocation2 + $0x1dcc] ss:$16 sps:$4 sm:$0xff]  }
 0x42c   :  { %7705 = vmatpush1.bf16.msra.mxu1 %v11201_v5  ;;  %v11247_v5 = vld [vmem:[#allocation2 + $0x1dc8] ss:$16 sps:$4 sm:$0xff]  }
 0x42d   :  { %7131 = vmatpush1.bf16.msra.mxu0 %v11198_v7  ;;  %7715 = vmatprep.subr.bf16.mxu1 %v11207_v61  ;;  %v11340_v7 = vld [vmem:[#allocation6 + $0xd0] ss:$8 sps:$4 sm:$0xff]  }
 0x42e   :  { %8209 = vmatprep.subr.bf16.mxu0 %v11303_v38  ;;  %v11252_v61 = vld [vmem:[#allocation2 + $0x1dec] ss:$16 sps:$4 sm:$0xff]  }
 0x42f   :  { %7707 = vmatmul.mubr.bf16.vlgmr.msra.gmra.mrb[4].mxu1 %v11939_v52  ;;  %v11307_v52 = vld [vmem:[#allocation6 + $0x20] ss:$8 sps:$4 sm:$0xff]  }
 0x430   :  { %7133 = vmatmul.mubr.bf16.vlgmr.msra.gmra.mrb[0].mxu0 %v11966_v35  ;;  %7716 = vmatpush1.bf16.msra.mxu1 %v11205_v32  ;;  %v11250_v32 = vld [vmem:[#allocation2 + $0x1de8] ss:$16 sps:$4 sm:$0xff]   ;;  %v11258_v38 = vld [vmem:[#allocation2 + $0x1e2c] ss:$16 sps:$4 sm:$0xff]  }
 0x431   :  { %7747 = vmatprep.mubr.bf16.mxu1 %v11941_v58  ;;  %7717 = vmatprep.subr.bf16.mxu1 %v11210_v50  ;;  %v11219_v58 = vld [vmem:[#allocation2 + $0x1c8c] ss:$16 sps:$4 sm:$0xff]  }
 0x432   :  { %8210 = vmatpush1.bf16.msra.mxu0 %v11301_v8  ;;  %v11255_v50 = vld [vmem:[#allocation2 + $0x1e0c] ss:$16 sps:$4 sm:$0xff]   ;;  %v11253_v8 = vld [vmem:[#allocation2 + $0x1e08] ss:$16 sps:$4 sm:$0xff]  }
 0x433   :  { %8211 = vmatprep.subr.bf16.mxu0 %v11306_v11  ;;  %v11261_v11 = vld [vmem:[#allocation2 + $0x1e4c] ss:$16 sps:$4 sm:$0xff]  }
 0x434   :  { %7718 = vmatpush1.bf16.msra.mxu1 %v11208_v3  ;;  %v11256_v3 = vld [vmem:[#allocation2 + $0x1e28] ss:$16 sps:$4 sm:$0xff]  }
 0x435   :  { %7719 = vmatprep.subr.bf16.mxu1 %v11213_v14  ;;  %v11259_v14 = vld [vmem:[#allocation2 + $0x1e48] ss:$16 sps:$4 sm:$0xff]  }
 0x436   :  { %8212 = vmatpush1.bf16.msra.mxu0 %v11304_v17  ;;  %v11264_v17 = vld [vmem:[#allocation2 + $0x1e6c] ss:$16 sps:$4 sm:$0xff]  }
 0x437   :  { %8213 = vmatprep.subr.bf16.mxu0 %v11309_v15  ;;  %v11262_v15 = vld [vmem:[#allocation2 + $0x1e68] ss:$16 sps:$4 sm:$0xff]  }
 0x438   :  { %7720 = vmatpush1.bf16.msra.mxu1 %v11211_v44  ;;  %v11267_v44 = vld [vmem:[#allocation2 + $0x1e8c] ss:$16 sps:$4 sm:$0xff]  }
 0x439   :  { %7721 = vmatprep.subr.bf16.mxu1 %v11216_v47  ;;  %v11265_v47 = vld [vmem:[#allocation2 + $0x1e88] ss:$16 sps:$4 sm:$0xff]  }
 0x43a   :  { %8214 = vmatpush1.bf16.msra.mxu0 %v11307_v52  ;;  %v11270_v52 = vld [vmem:[#allocation2 + $0x1eac] ss:$16 sps:$4 sm:$0xff]  }
 0x43b   :  { %8215 = vmatprep.subr.bf16.mxu0 %v11312_v57  ;;  %v11273_v57 = vld [vmem:[#allocation2 + $0x1ecc] ss:$16 sps:$4 sm:$0xff]  }
 0x43c   :  { %7722 = vmatpush1.bf16.msra.mxu1 %v11214_v19  ;;  %v11345_v19 = vld [vmem:[#allocation6 + $0xe4] ss:$8 sps:$4 sm:$0xff]  }
 0x43d   :  { %7723 = vmatprep.subr.bf16.mxu1 %v11219_v58  ;;  %v11271_v58 = vld [vmem:[#allocation2 + $0x1ec8] ss:$16 sps:$4 sm:$0xff]  }
 0x43e   :  { %8216 = vmatpush1.bf16.msra.mxu0 %v11310_v21  ;;  %v11276_v21 = vld [vmem:[#allocation2 + $0x1eec] ss:$16 sps:$4 sm:$0xff]  }
 0x43f   :  { %8217 = vmatprep.subr.bf16.mxu0 %v11315_v46  ;;  %v11348_v46 = vld [vmem:[#allocation6 + $0xf4] ss:$8 sps:$4 sm:$0xff]  }
 0x440   :  { %7724 = vmatpush1.bf16.msra.mxu1 %v11217_v23  ;;  %v11346_v23 = vld [vmem:[#allocation6 + $0xf0] ss:$8 sps:$4 sm:$0xff]  }
 0x441   :  { %7725 = vmatprep.subr.bf16.mxu1 %v11222_v25  ;;  %v11274_v25 = vld [vmem:[#allocation2 + $0x1ee8] ss:$16 sps:$4 sm:$0xff]  }
 0x442   :  { %8218 = vmatpush1.bf16.msra.mxu0 %v11313_v26  ;;  %v11279_v26 = vld [vmem:[#allocation2 + $0x1f0c] ss:$16 sps:$4 sm:$0xff]  }
 0x443   :  { %8219 = vmatprep.subr.bf16.mxu0 %v11318_v27  ;;  %v11277_v27 = vld [vmem:[#allocation2 + $0x1f08] ss:$16 sps:$4 sm:$0xff]  }
 0x444   :  { %7726 = vmatpush1.bf16.msra.mxu1 %v11220_v28  ;;  %v11351_v28 = vld [vmem:[#allocation6 + $0x104] ss:$8 sps:$4 sm:$0xff]  }
 0x445   :  { %7727 = vmatprep.subr.bf16.mxu1 %v11225_v29  ;;  %v11282_v29 = vld [vmem:[#allocation2 + $0x1f2c] ss:$16 sps:$4 sm:$0xff]  }
 0x446   :  { %8220 = vmatpush1.bf16.msra.mxu0 %v11316_v1  ;;  %v11280_v1 = vld [vmem:[#allocation2 + $0x1f28] ss:$16 sps:$4 sm:$0xff]  }
 0x447   :  { %8221 = vmatprep.subr.bf16.mxu0 %v11321_v33  ;;  %v11285_v33 = vld [vmem:[#allocation2 + $0x1f4c] ss:$16 sps:$4 sm:$0xff]  }
 0x448   :  { %7728 = vmatpush1.bf16.msra.mxu1 %v11223_v34  ;;  %v11283_v34 = vld [vmem:[#allocation2 + $0x1f48] ss:$16 sps:$4 sm:$0xff]  }
 0x449   :  { %7729 = vmatprep.subr.bf16.mxu1 %v11228_v37  ;;  %v11288_v37 = vld [vmem:[#allocation2 + $0x1f6c] ss:$16 sps:$4 sm:$0xff]  }
 0x44a   :  { %8222 = vmatpush1.bf16.msra.mxu0 %v11319_v60  ;;  %v11286_v60 = vld [vmem:[#allocation2 + $0x1f68] ss:$16 sps:$4 sm:$0xff]  }
 0x44b   :  { %8223 = vmatprep.subr.bf16.mxu0 %v11324_v9  ;;  %v11291_v9 = vld [vmem:[#allocation2 + $0x1f8c] ss:$16 sps:$4 sm:$0xff]  }
 0x44c   :  { %7730 = vmatpush1.bf16.msra.mxu1 %v11226_v39  ;;  %v11289_v39 = vld [vmem:[#allocation2 + $0x1f88] ss:$16 sps:$4 sm:$0xff]  }
 0x44d   :  { %7731 = vmatprep.subr.bf16.mxu1 %v11231_v10  ;;  %v11294_v10 = vld [vmem:[#allocation2 + $0x1fac] ss:$16 sps:$4 sm:$0xff]  }
 0x44e   :  { %8224 = vmatpush1.bf16.msra.mxu0 %v11322_v42  ;;  %v11292_v42 = vld [vmem:[#allocation2 + $0x1fa8] ss:$16 sps:$4 sm:$0xff]  }
 0x44f   :  { %8225 = vmatprep.subr.bf16.mxu0 %v11327_v16  ;;  %v11297_v16 = vld [vmem:[#allocation2 + $0x1fcc] ss:$16 sps:$4 sm:$0xff]  }
 0x450   :  { %7732 = vmatpush1.bf16.msra.mxu1 %v11229_v45  ;;  %v11295_v45 = vld [vmem:[#allocation2 + $0x1fc8] ss:$16 sps:$4 sm:$0xff]  }
 0x451   :  { %7733 = vmatprep.subr.bf16.mxu1 %v11234_v2  ;;  %v11300_v2 = vld [vmem:[#allocation2 + $0x1fec] ss:$16 sps:$4 sm:$0xff]  }
 0x452   :  { %8226 = vmatpush1.bf16.msra.mxu0 %v11325_v20  ;;  %v11298_v20 = vld [vmem:[#allocation2 + $0x1fe8] ss:$16 sps:$4 sm:$0xff]  }
 0x453   :  { %8227 = vmatprep.subr.bf16.mxu0 %v11330_v48  ;;  %v1347_v48 = vsub.s32 0, %v11682_v43 }
 0x454   :  { %7734 = vmatpush1.bf16.msra.mxu1 %v11232_v24  ;;  %v11975_v24 = vld [vmem:[#allocation4] sm:$0xf] }
 0x455   :  { %7735 = vmatprep.subr.bf16.mxu1 %v11237_v6  ;;  %v1351_v6 = vsub.s32 1, %v11682_v43 }
 0x456   :  { %8228 = vmatpush1.bf16.msra.mxu0 %v11328_v53  ;;  %v1348_v53 = vrot.slane %v11975_v24, %v1347_v48 }
 0x457   :  { %8229 = vmatprep.subr.bf16.mxu0 %v11333_v31  ;;  %v1352_v31 = vrot.slane %v11975_v24, %v1351_v6 }
 0x458   :  { %7736 = vmatpush1.bf16.msra.mxu1 %v11235_v54  ;;  %v6520_v54 = vadd.f32 %v11770_v12, %v1348_v53  ;;  %v11397_v12 = vld [vmem:[#allocation9 + $0x40] sm:$0xff]   ;;  %v1359_v53 = vsub.s32 3, %v11682_v43 }
 0x459   :  { %7737 = vmatprep.subr.bf16.mxu1 %v11240_v55  ;;  %v6522_v55 = vadd.f32 %v11772_v13, %v1352_v31  ;;  %v11398_v13 = vld [vmem:[#allocation9] sm:$0xff]  }
 0x45a   :  { %8230 = vmatpush1.bf16.msra.mxu0 %v11331_v56 }
 0x45b   :  { %8231 = vmatprep.subr.bf16.mxu0 %v11336_v59 }
 0x45c   :  { %7738 = vmatpush1.bf16.msra.mxu1 %v11238_v18 }
 0x45d   :  { %7739 = vmatprep.subr.bf16.mxu1 %v11243_v36 }
 0x45e   :  { %8232 = vmatpush1.bf16.msra.mxu0 %v11334_v51 }
 0x45f   :  { %8233 = vmatprep.subr.bf16.mxu0 %v11339_v62 }
 0x460   :  { %7740 = vmatpush1.bf16.msra.mxu1 %v11241_v22 }
 0x461   :  { %7741 = vmatprep.subr.bf16.mxu1 %v11246_v40 }
 0x462   :  { %8234 = vmatpush1.bf16.msra.mxu0 %v11337_v30 }
 0x463   :  { %8235 = vmatprep.subr.bf16.mxu0 %v11342_v49 }
 0x464   :  { %7742 = vmatpush1.bf16.msra.mxu1 %v11244_v0  ;;  %v11349_v0 = vld [vmem:[#allocation6 + $0x100] ss:$8 sps:$4 sm:$0xff]  }
 0x465   :  { %7743 = vmatprep.subr.bf16.mxu1 %v11249_v41 }
 0x466   :  { %8236 = vmatpush1.bf16.msra.mxu0 %v11340_v7  ;;  %v11354_v7 = vld [vmem:[#allocation6 + $0x114] ss:$8 sps:$4 sm:$0xff]  }
 0x467   :  { %8237 = vmatprep.subr.bf16.mxu0 %v11345_v19  ;;  %v11407_v19 = vld [vmem:[#allocation9 + $0x68] sm:$0xff]  }
 0x468   :  { %7744 = vmatpush1.bf16.msra.mxu1 %v11247_v5  ;;  %v11399_v5 = vld [vmem:[#allocation9 + $0x48] sm:$0xff]  }
 0x469   :  { %7745 = vmatprep.subr.bf16.mxu1 %v11252_v61  ;;  %v11352_v61 = vld [vmem:[#allocation6 + $0x110] ss:$8 sps:$4 sm:$0xff]  }
 0x46c   :  { %7746 = vmatpush1.bf16.msra.mxu1 %v11250_v32  ;;  %v11357_v32 = vld [vmem:[#allocation6 + $0x124] ss:$8 sps:$4 sm:$0xff]  }
 0x46d   :  { %7756 = vmatprep.subr.bf16.mxu1 %v11255_v50  ;;  %v11400_v50 = vld [vmem:[#allocation9 + $0x8] sm:$0xff]  }
 0x46f   :  { %7748 = vmatmul.mubr.bf16.vlgmr.msra.gmra.mrb[4].mxu1 %v11956_v63  ;;  %v11268_v63 = vld [vmem:[#allocation2 + $0x1ea8] ss:$16 sps:$4 sm:$0xff]  }
 0x470   :  { %7757 = vmatpush1.bf16.msra.mxu1 %v11253_v8  ;;  %7788 = vmatprep.mubr.bf16.mxu1 %v11958_v4  ;;  %v11343_v4 = vld [vmem:[#allocation6 + $0xe0] ss:$8 sps:$4 sm:$0xff]   ;;  %v11401_v8 = vld [vmem:[#allocation9 + $0x50] sm:$0xff]  }
 0x471   :  { %7758 = vmatprep.subr.bf16.mxu1 %v11258_v38  ;;  %8238 = vmatpush1.bf16.msra.mxu0 %v11343_v4  ;;  %v11355_v38 = vld [vmem:[#allocation6 + $0x120] ss:$8 sps:$4 sm:$0xff]   ;;  %v11364_v4 = vld [vmem:[#allocation6 + $0x150] ss:$8 sps:$4 sm:$0xff]  }
 0x472   :  { %8239 = vmatprep.subr.bf16.mxu0 %v11348_v46  ;;  %v11367_v46 = vld [vmem:[#allocation6 + $0x160] ss:$8 sps:$4 sm:$0xff]  }
 0x474   :  { %7759 = vmatpush1.bf16.msra.mxu1 %v11256_v3  ;;  %v11360_v3 = vld [vmem:[#allocation6 + $0x134] ss:$8 sps:$4 sm:$0xff]  }
 0x475   :  { %7760 = vmatprep.subr.bf16.mxu1 %v11261_v11  ;;  %8240 = vmatpush1.bf16.msra.mxu0 %v11346_v23  ;;  %v11402_v11 = vld [vmem:[#allocation9 + $0x10] sm:$0xff]  }
 0x476   :  { %8250 = vmatprep.subr.bf16.mxu0 %v11351_v28  ;;  %v11372_v23 = vld [vmem:[#allocation6 + $0x174] ss:$8 sps:$4 sm:$0xff]  }
 0x477   :  { %v11378_v28 = vld [vmem:[#allocation6 + $0x194] ss:$8 sps:$4 sm:$0xff]  }
 0x478   :  { %7761 = vmatpush1.bf16.msra.mxu1 %v11259_v14  ;;  %v11403_v14 = vld [vmem:[#allocation9 + $0x58] sm:$0xff]  }
 0x479   :  { %7762 = vmatprep.subr.bf16.mxu1 %v11264_v17  ;;  %v11358_v17 = vld [vmem:[#allocation6 + $0x130] ss:$8 sps:$4 sm:$0xff]  }
 0x47c   :  { %7763 = vmatpush1.bf16.msra.mxu1 %v11262_v15  ;;  %v11363_v15 = vld [vmem:[#allocation6 + $0x144] ss:$8 sps:$4 sm:$0xff]  }
 0x47d   :  { %7764 = vmatprep.subr.bf16.mxu1 %v11267_v44  ;;  %v11404_v44 = vld [vmem:[#allocation9 + $0x18] sm:$0xff]  }
 0x480   :  { %7765 = vmatpush1.bf16.msra.mxu1 %v11265_v47  ;;  %v11405_v47 = vld [vmem:[#allocation9 + $0x60] sm:$0xff]  }
 0x481   :  { %7766 = vmatprep.subr.bf16.mxu1 %v11270_v52  ;;  %v11361_v52 = vld [vmem:[#allocation6 + $0x140] ss:$8 sps:$4 sm:$0xff]  }
 0x484   :  { %7767 = vmatpush1.bf16.msra.mxu1 %v11268_v63  ;;  %v11366_v63 = vld [vmem:[#allocation6 + $0x154] ss:$8 sps:$4 sm:$0xff]  }
 0x485   :  { %7768 = vmatprep.subr.bf16.mxu1 %v11273_v57  ;;  %v11406_v57 = vld [vmem:[#allocation9 + $0x20] sm:$0xff]  }
 0x488   :  { %7769 = vmatpush1.bf16.msra.mxu1 %v11271_v58  ;;  %v11369_v58 = vld [vmem:[#allocation6 + $0x164] ss:$8 sps:$4 sm:$0xff]  }
 0x489   :  { %7770 = vmatprep.subr.bf16.mxu1 %v11276_v21  ;;  %v11408_v21 = vld [vmem:[#allocation9 + $0x28] sm:$0xff]  }
 0x48c   :  { %7771 = vmatpush1.bf16.msra.mxu1 %v11274_v25  ;;  %v11370_v25 = vld [vmem:[#allocation6 + $0x170] ss:$8 sps:$4 sm:$0xff]  }
 0x48d   :  { %7772 = vmatprep.subr.bf16.mxu1 %v11279_v26  ;;  %v11375_v26 = vld [vmem:[#allocation6 + $0x184] ss:$8 sps:$4 sm:$0xff]  }
 0x490   :  { %7773 = vmatpush1.bf16.msra.mxu1 %v11277_v27  ;;  %v11373_v27 = vld [vmem:[#allocation6 + $0x180] ss:$8 sps:$4 sm:$0xff]  }
 0x491   :  { %7774 = vmatprep.subr.bf16.mxu1 %v11282_v29  ;;  %v11376_v29 = vld [vmem:[#allocation6 + $0x190] ss:$8 sps:$4 sm:$0xff]  }
 0x494   :  { %7775 = vmatpush1.bf16.msra.mxu1 %v11280_v1  ;;  %v11381_v1 = vld [vmem:[#allocation6 + $0x1a4] ss:$8 sps:$4 sm:$0xff]  }
 0x495   :  { %7776 = vmatprep.subr.bf16.mxu1 %v11285_v33  ;;  %v11379_v33 = vld [vmem:[#allocation6 + $0x1a0] ss:$8 sps:$4 sm:$0xff]  }
 0x498   :  { %7777 = vmatpush1.bf16.msra.mxu1 %v11283_v34  ;;  %v11384_v34 = vld [vmem:[#allocation6 + $0x1b4] ss:$8 sps:$4 sm:$0xff]  }
 0x499   :  { %7778 = vmatprep.subr.bf16.mxu1 %v11288_v37  ;;  %v11382_v37 = vld [vmem:[#allocation6 + $0x1b0] ss:$8 sps:$4 sm:$0xff]  }
 0x49c   :  { %7779 = vmatpush1.bf16.msra.mxu1 %v11286_v60  ;;  %v11387_v60 = vld [vmem:[#allocation6 + $0x1c4] ss:$8 sps:$4 sm:$0xff]  }
 0x49d   :  { %7780 = vmatprep.subr.bf16.mxu1 %v11291_v9  ;;  %v11385_v9 = vld [vmem:[#allocation6 + $0x1c0] ss:$8 sps:$4 sm:$0xff]  }
 0x4a0   :  { %7781 = vmatpush1.bf16.msra.mxu1 %v11289_v39  ;;  %v11390_v39 = vld [vmem:[#allocation6 + $0x1d4] ss:$8 sps:$4 sm:$0xff]  }
 0x4a1   :  { %7782 = vmatprep.subr.bf16.mxu1 %v11294_v10  ;;  %v11388_v10 = vld [vmem:[#allocation6 + $0x1d0] ss:$8 sps:$4 sm:$0xff]  }
 0x4a4   :  { %7783 = vmatpush1.bf16.msra.mxu1 %v11292_v42  ;;  %v11393_v42 = vld [vmem:[#allocation6 + $0x1e4] ss:$8 sps:$4 sm:$0xff]  }
 0x4a5   :  { %7784 = vmatprep.subr.bf16.mxu1 %v11297_v16  ;;  %v11391_v16 = vld [vmem:[#allocation6 + $0x1e0] ss:$8 sps:$4 sm:$0xff]  }
 0x4a8   :  { %7785 = vmatpush1.bf16.msra.mxu1 %v11295_v45  ;;  %v11396_v45 = vld [vmem:[#allocation6 + $0x1f4] ss:$8 sps:$4 sm:$0xff]  }
 0x4a9   :  { %7786 = vmatprep.subr.bf16.mxu1 %v11300_v2  ;;  %v11394_v2 = vld [vmem:[#allocation6 + $0x1f0] ss:$8 sps:$4 sm:$0xff]  }
 0x4ac   :  { %7787 = vmatpush1.bf16.msra.mxu1 %v11298_v20  ;;  %v1355_v20 = vsub.s32 2, %v11682_v43 }
 0x4ad   :  { %9594 = vmatprep.subr.bf16.mxu1 %v11397_v12  ;;  %v7877_v12 = vld [vmem:[#allocation7] sm:$0x3] }
 0x4ae   :  { %v1356_v31 = vrot.slane %v11975_v24, %v1355_v20 }
 0x4af   :  { %7789 = vmatmul.mubr.bf16.vlgmr.msra.gmra.mrb[4].mxu1 %v11966_v35 }
 0x4b0   :  { %9595 = vmatpush3.bf16.msra.mxu1 %v11398_v13  ;;  %v7882_v13 = vrot.slane %v7877_v12, %v1347_v48 }
 0x4b1   :  { %9596 = vmatprep.subr.bf16.mxu1 %v11399_v5  ;;  %v7886_v5 = vrot.slane %v7877_v12, %v1351_v6 }
 0x4b4   :  { %9597 = vmatpush3.bf16.msra.mxu1 %v11400_v50 }
 0x4b5   :  { %9598 = vmatprep.subr.bf16.mxu1 %v11401_v8 }
 0x4b8   :  { %9599 = vmatpush3.bf16.msra.mxu1 %v11402_v11 }
 0x4b9   :  { %9600 = vmatprep.subr.bf16.mxu1 %v11403_v14 }
 0x4bc   :  { %9601 = vmatpush3.bf16.msra.mxu1 %v11404_v44 }
 0x4bd   :  { %9602 = vmatprep.subr.bf16.mxu1 %v11405_v47 }
 0x4c0   :  { %9603 = vmatpush3.bf16.msra.mxu1 %v11406_v57 }
 0x4c1   :  { %9604 = vmatprep.subr.bf16.mxu1 %v11407_v19 }
 0x4c4   :  { %9605 = vmatpush3.bf16.msra.mxu1 %v11408_v21 }
 0x503   :  { %v7134_v56 = vpop.f32.mrb[0].mxu0 }
 0x504   :  { %v9617_v35 = vadd.f32 %v7134_v56, %v6520_v54  ;;  %v7136_v59 = vpop.f32.mrb[1].mxu0  ;;  %v1360_v54 = vrot.slane %v11975_v24, %v1359_v53  ;;  %v11411_v24 = vld [vmem:[#allocation9 + $0x78] sm:$0xff]  }
 0x505   :  { %v9619_v18 = vadd.f32 %v7136_v59, %v6522_v55  ;;  %v7138_v36 = vpop.f32.mrb[2].mxu0 }
 0x506   :  { %vm7797_vm0 = vcmp.gt.f32.partialorder %v9617_v35, 0.0  ;;  %v7801_v51 = vmul.f32 0.2, %v9617_v35  ;;  %v7139_v62 = vpop.f32.mrb[3].mxu0 }
 0x507   :  { %vm7798_vm1 = vcmp.gt.f32.partialorder %v9619_v18, 0.0  ;;  %v7802_v22 = vmul.f32 0.2, %v9619_v18 }
 0x508   :  { %v7805_v40 = vsel %vm7797_vm0, %v9617_v35, %v7801_v51 }
 0x509   :  { %v7806_v30 = vsel %vm7798_vm1, %v9619_v18, %v7802_v22  ;;  %v7809_v41 = vpack.c.bf16 %v7805_v40, %v7805_v40 }
 0x50a   :  { %v7810_v49 = vpack.c.bf16 %v7806_v30, %v7806_v30 }
 0x50c   :  { %8241 = vmatprep.mubr.bf16.mxu0 %v7810_v49 }
 0x50d   :  { %8242 = vmatmul.mubr.bf16.vlgmr.msra.gmra.mrb[4].mxu0 %v7809_v41  ;;  %v11410_v41 = vld [vmem:[#allocation9 + $0x30] sm:$0xff]  }
 0x50e   :  { %8251 = vmatpush1.bf16.msra.mxu0 %v11349_v0  ;;  %v11409_v0 = vld [vmem:[#allocation9 + $0x70] sm:$0xff]  }
 0x50f   :  { %8252 = vmatprep.subr.bf16.mxu0 %v11354_v7  ;;  %9606 = vmatprep.subr.bf16.mxu1 %v11409_v0  ;;  %v11412_v7 = vld [vmem:[#allocation9 + $0x38] sm:$0xff]  }
 0x510   :  { %9607 = vmatpush3.bf16.msra.mxu1 %v11410_v41 }
 0x511   :  { %9608 = vmatprep.subr.bf16.mxu1 %v11411_v24 }
 0x512   :  { %8253 = vmatpush1.bf16.msra.mxu0 %v11352_v61 }
 0x513   :  { %8254 = vmatprep.subr.bf16.mxu0 %v11357_v32 }
 0x514   :  { %9609 = vmatpush3.bf16.msra.mxu1 %v11412_v7 }
 0x516   :  { %8255 = vmatpush1.bf16.msra.mxu0 %v11355_v38 }
 0x517   :  { %8256 = vmatprep.subr.bf16.mxu0 %v11360_v3 }
 0x51a   :  { %8257 = vmatpush1.bf16.msra.mxu0 %v11358_v17 }
 0x51b   :  { %8258 = vmatprep.subr.bf16.mxu0 %v11363_v15 }
 0x51e   :  { %8259 = vmatpush1.bf16.msra.mxu0 %v11361_v52  ;;  %v9577_v52 = vld [vmem:[#allocation10] ss:$0 sm:$0xff] }
 0x51f   :  { %8260 = vmatprep.subr.bf16.mxu0 %v11366_v63 }
 0x522   :  { %8261 = vmatpush1.bf16.msra.mxu0 %v11364_v4 }
 0x523   :  { %8262 = vmatprep.subr.bf16.mxu0 %v11369_v58 }
 0x526   :  { %8263 = vmatpush1.bf16.msra.mxu0 %v11367_v46 }
 0x527   :  { %8264 = vmatprep.subr.bf16.mxu0 %v11372_v23 }
 0x52a   :  { %8265 = vmatpush1.bf16.msra.mxu0 %v11370_v25 }
 0x52b   :  { %8266 = vmatprep.subr.bf16.mxu0 %v11375_v26 }
 0x52e   :  { %8267 = vmatpush1.bf16.msra.mxu0 %v11373_v27 }
 0x52f   :  { %8268 = vmatprep.subr.bf16.mxu0 %v11378_v28 }
 0x532   :  { %8269 = vmatpush1.bf16.msra.mxu0 %v11376_v29 }
 0x533   :  { %8270 = vmatprep.subr.bf16.mxu0 %v11381_v1 }
 0x536   :  { %8271 = vmatpush1.bf16.msra.mxu0 %v11379_v33 }
 0x537   :  { %8272 = vmatprep.subr.bf16.mxu0 %v11384_v34 }
 0x53a   :  { %8273 = vmatpush1.bf16.msra.mxu0 %v11382_v37 }
 0x53b   :  { %8274 = vmatprep.subr.bf16.mxu0 %v11387_v60 }
 0x53e   :  { %8275 = vmatpush1.bf16.msra.mxu0 %v11385_v9 }
 0x53f   :  { %8276 = vmatprep.subr.bf16.mxu0 %v11390_v39 }
 0x542   :  { %8277 = vmatpush1.bf16.msra.mxu0 %v11388_v10 }
 0x543   :  { %8278 = vmatprep.subr.bf16.mxu0 %v11393_v42 }
 0x546   :  { %8279 = vmatpush1.bf16.msra.mxu0 %v11391_v16 }
 0x547   :  { %8280 = vmatprep.subr.bf16.mxu0 %v11396_v45 }
 0x54a   :  { %8281 = vmatpush1.bf16.msra.mxu0 %v11394_v2 }
 0x582   :  { %v7790_v55 = vpop.f32.mrb[4].mxu1 }
 0x583   :  { %v9620_v56 = vadd.f32 %v7790_v55, %v1356_v31  ;;  %v7792_v35 = vpop.f32.mrb[5].mxu1 }
 0x584   :  { %v9621_v59 = vadd.f32 %v7792_v35, %v1360_v54  ;;  %v7794_v18 = vpop.f32.mrb[6].mxu1 }
 0x585   :  { %vm7799_vm2 = vcmp.gt.f32.partialorder %v9620_v56, 0.0  ;;  %v7803_v36 = vmul.f32 0.2, %v9620_v56  ;;  %v7795_v51 = vpop.f32.mrb[7].mxu1 }
 0x586   :  { %vm7800_vm3 = vcmp.gt.f32.partialorder %v9621_v59, 0.0  ;;  %v7804_v62 = vmul.f32 0.2, %v9621_v59 }
 0x587   :  { %v7807_v22 = vsel %vm7799_vm2, %v9620_v56, %v7803_v36 }
 0x588   :  { %v7808_v40 = vsel %vm7800_vm3, %v9621_v59, %v7804_v62  ;;  %v7811_v49 = vpack.c.bf16 %v7807_v22, %v7807_v22 }
 0x589   :  { %v7812_v30 = vpack.c.bf16 %v7808_v40, %v7808_v40 }
 0x58b   :  { %8282 = vmatprep.mubr.bf16.mxu0 %v7812_v30 }
 0x58c   :  { %8283 = vmatmul.mubr.bf16.vlgmr.msra.gmra.mrb[4].mxu0 %v7811_v49 }
 0x65f   :  { %v8284_v61 = vpop.f32.mrb[4].mxu0 }
 0x660   :  { %v9622_v32 = vadd.f32 %v8284_v61, %v7882_v13  ;;  %v8286_v50 = vpop.f32.mrb[5].mxu0 }
 0x661   :  { %v9623_v8 = vadd.f32 %v8286_v50, %v7886_v5  ;;  %v8288_v38 = vpop.f32.mrb[6].mxu0 }
 0x662   :  { %vm8291_vm4 = vcmp.gt.f32.partialorder %v9622_v32, 0.0  ;;  %v8293_v3 = vmul.f32 0.2, %v9622_v32  ;;  %v8289_v11 = vpop.f32.mrb[7].mxu0 }
 0x663   :  { %vm8292_vm5 = vcmp.gt.f32.partialorder %v9623_v8, 0.0  ;;  %v8294_v14 = vmul.f32 0.2, %v9623_v8 }
 0x664   :  { %v8295_v17 = vsel %vm8291_vm4, %v9622_v32, %v8293_v3 }
 0x665   :  { %v8296_v15 = vsel %vm8292_vm5, %v9623_v8, %v8294_v14  ;;  %v8297_v47 = vpack.c.bf16 %v8295_v17, %v8295_v17 }
 0x666   :  { %v8298_v44 = vpack.c.bf16 %v8296_v15, %v8296_v15 }
 0x668   :  { %8466 = vmatprep.mubr.bf16.mxu1 %v8298_v44 }
 0x669   :  { %8467 = vmatmul.mubr.bf16.vlgmr.msra.gmra.mrb[8].mxu1 %v8297_v47 }
 0x73c   :  { %v9610_v48 = vpop.f32.mrb[8].mxu1 }
 0x73d   :  { %v9611_v43 = vpop.f32.mrb[9].mxu1 }
 0x73e   :  { %v9612_v6 = vadd.f32 %v9611_v43, %v9610_v48  ;;  %v9613_v63 = vpop.f32.mrb[10].mxu1 }
 0x73f   :  { %v9614_v57 = vpop.f32.mrb[11].mxu1 }
 0x740   :  { %v8469_v19 = vadd.f32 %v9612_v6, %v9577_v52 }
 0x742   :  { %v8474_v4 = vsub.f32 0.0, %v8469_v19 }
 0x744   :  { %v8475_v58 = vmul.f32 1.442695, %v8474_v4 }
 0x746   :  { %11413 = vpow2.f32 %v8475_v58 }
 0x750   :  { %v11414_v21 = vpop.eup %11413 }
 0x751   :  { %v8477_v46 = vadd.f32 1.0, %v11414_v21 }
 0x753   :  { %11415 = vrcp.f32 %v8477_v46 }
 0x75d   :  { %v11416_v23 = vpop.eup %11415 }
 0x75e   :  { %v8479_v25 = vpack.c.bf16 %v11416_v23, %v11416_v23 }
 0x760   :  { %8480 = vst [vmem:[%s12004_s7] sm:$0x1] %v8479_v25 }
 0x761   :  { %8485 = vsyncpa [#allocation3], 1 }
 0x762   :  { %8486 = vsyncpa [#allocation5], 1 }
 0x763   :  { %8487 = vsyncpa [#allocation8], 1 }
 0x764   :  { %8488 = vsyncpa [#allocation11], 1 }

</bundles_post_ra>
